<compile_context>
chip_gen: v6e
topology: v6e:2x2x1
jax: 0.10.0
libtpu: 0.0.40
codegen_flags: <defaults>
</compile_context>

<pallas_src>
import functools
import math

import numpy as np
import jax
import jax.numpy as jnp
from jax.experimental import pallas as pl
from jax.experimental.pallas import tpu as pltpu

_LANE = 128


def _pad_seq_len(s):
    """Padded sequence length: multiple of 8 (sublane) for short sequences,
    multiple of 128 (lane-dense scores / K^T scratch) once S >= 128."""
    if s < _LANE:
        return ((s + 7) // 8) * 8
    return ((s + _LANE - 1) // _LANE) * _LANE


def _q_tile(sp):
    """Query-tile size: largest friendly divisor of the padded sequence length,
    preferring NQ >= 2 for long sequences so the output tiles actually pipeline."""
    cands = (128, 64, 32, 16, 8) if sp >= 256 else (256, 128, 64, 32, 16, 8)
    for t in cands:
        if sp % t == 0:
            return t
    return sp


def _vmem_budget_bytes():
    """Per-generation VMEM budget with ~20% headroom for compiler scratch."""
    cap = 64 << 20  # conservative default (v7x per-TensorCore VMEM)
    try:
        cap = int(pltpu.get_tpu_info().vmem_capacity_bytes)
    except Exception:
        pass
    return (cap * 4) // 5


# --------------------------------------------------------------------------
# Fused encoder layer kernel.
# grid = (B, NQ): one batch element x one query tile per step.
# K^T / V for the whole (padded) sequence are computed once per batch element
# (qi == 0) and cached in VMEM scratch: K^T as (H, dh, Sp), V as (H, Sp, dh).
# --------------------------------------------------------------------------
def encoder_layer_kernel(*refs, num_heads, seq_len, fuse_pos, gelu_tanh):
    if fuse_pos:
        (x_ref, pos_ref,
         ln1_g, ln1_b,
         wq_ref, bq_ref, wkt_ref, bkt_ref, wv_ref, bv_ref, woh_ref, bo_ref,
         ln2_g, ln2_b,
         w1_ref, b1_ref, w2_ref, b2_ref,
         o_ref, k_scr, v_scr) = refs
    else:
        (x_ref,
         ln1_g, ln1_b,
         wq_ref, bq_ref, wkt_ref, bkt_ref, wv_ref, bv_ref, woh_ref, bo_ref,
         ln2_g, ln2_b,
         w1_ref, b1_ref, w2_ref, b2_ref,
         o_ref, k_scr, v_scr) = refs
        pos_ref = None

    Sp, D = x_ref.shape                      # x block is (Sp, D) (batch dim squeezed)
    TQ = o_ref.shape[0]
    H = num_heads
    dh = D // H
    eps = 1e-5
    scale = 1.0 / math.sqrt(dh)
    qi = pl.program_id(1)

    def layer_norm(v, g_ref, b_ref):         # g/b blocks are (1, D), broadcast over rows
        mu = jnp.mean(v, axis=-1, keepdims=True)
        var = jnp.mean((v - mu) ** 2, axis=-1, keepdims=True)
        return (v - mu) * jax.lax.rsqrt(var + eps) * g_ref[...] + b_ref[...]

    # ---- K^T / V over the full sequence: once per batch element ------------
    @pl.when(qi == 0)
    def _():
        xf = x_ref[...].astype(jnp.float32)                      # (Sp, D)
        if fuse_pos:
            xf = xf + pos_ref[...].astype(jnp.float32)
        ln1 = layer_norm(xf, ln1_g, ln1_b)                       # (Sp, D) f32
        ln1_t = ln1.T.astype(jnp.bfloat16)                       # (D, Sp): one transpose/batch elt
        # K cached pre-transposed: lane dim = Sp (dense when padded); the score
        # matmul below is then a natural batched (q,dh)@(dh,Sp) contraction.
        kT = jnp.dot(wkt_ref[...], ln1_t,
                     preferred_element_type=jnp.float32) + bkt_ref[...]
        k_scr[...] = kT.reshape(H, dh, Sp).astype(jnp.bfloat16)
        v = jnp.dot(ln1.astype(jnp.bfloat16), wv_ref[...],
                    preferred_element_type=jnp.float32) + bv_ref[...]
        v_scr[...] = jnp.transpose(v.reshape(Sp, H, dh),
                                   (1, 0, 2)).astype(jnp.bfloat16)

    # ---- current query tile -------------------------------------------------
    q0 = pl.multiple_of(qi * TQ, TQ)
    x_q = x_ref[pl.ds(q0, TQ), :].astype(jnp.float32)            # (TQ, D)
    if fuse_pos:
        x_q = x_q + pos_ref[pl.ds(q0, TQ), :].astype(jnp.float32)

    ln1_q = layer_norm(x_q, ln1_g, ln1_b).astype(jnp.bfloat16)
    q = jnp.dot(ln1_q, wq_ref[...], preferred_element_type=jnp.float32) + bq_ref[...]
    q = q * scale                                                # fold 1/sqrt(dh) into q
    q_h = jnp.transpose(q.reshape(TQ, H, dh), (1, 0, 2)).astype(jnp.bfloat16)

    # attention: batched MXU contractions with heads as the batch dim
    s = jnp.einsum("hqd,hds->hqs", q_h, k_scr[...],
                   preferred_element_type=jnp.float32)           # (H, TQ, Sp)
    if seq_len != Sp:                                            # static: padded keys masked
        key_idx = jax.lax.broadcasted_iota(jnp.int32, (1, 1, Sp), 2)
        s = jnp.where(key_idx < seq_len, s, jnp.float32(-1e30))
    s = s - jnp.max(s, axis=-1, keepdims=True)
    p = jnp.exp(s)
    p = p * pl.reciprocal(jnp.sum(p, axis=-1, keepdims=True), approx=True)
    o = jnp.einsum("hqs,hsd->hqd", p.astype(jnp.bfloat16), v_scr[...],
                   preferred_element_type=jnp.float32)           # (H, TQ, dh)
    # fused "concat + Wo": batched per-head projection then a cheap sum over heads
    proj = jnp.einsum("hqd,hde->hqe", o.astype(jnp.bfloat16), woh_ref[...],
                      preferred_element_type=jnp.float32)        # (H, TQ, D)
    mha = jnp.sum(proj, axis=0) + bo_ref[...]
    x1 = x_q + mha

    # ---- FFN sublayer --------------------------------------------------------
    ln2 = layer_norm(x1, ln2_g, ln2_b).astype(jnp.bfloat16)
    hdn = jnp.dot(ln2, w1_ref[...], preferred_element_type=jnp.float32) + b1_ref[...]
    if gelu_tanh:
        # optional EUP-friendly tanh approximation (numerics-visible; off by default)
        hdn = jax.nn.gelu(hdn, approximate=True)
    else:
        # exact (erf-based) GELU in f32, matching torch.nn.GELU() default
        hdn = 0.5 * hdn * (1.0 + jax.lax.erf(hdn * (1.0 / math.sqrt(2.0))))
    ffn = jnp.dot(hdn.astype(jnp.bfloat16), w2_ref[...],
                  preferred_element_type=jnp.float32) + b2_ref[...]

    o_ref[...] = (x1 + ffn).astype(o_ref.dtype)


def encoder_layer(x, p, num_heads, seq_len, pos_emb=None, gelu_tanh=False):
    B, Sp, D = x.shape                       # Sp is the padded sequence length
    F = p["w1"].shape[1]
    H = num_heads
    assert D % H == 0, "h_dim must be divisible by num_heads"
    dh = D // H
    TQ = _q_tile(Sp)
    NQ = Sp // TQ
    fuse_pos = pos_emb is not None

    kern = functools.partial(encoder_layer_kernel, num_heads=H, seq_len=seq_len,
                             fuse_pos=fuse_pos, gelu_tanh=gelu_tanh)

    # Host-side layout plumbing (free at kernel time): K weights pre-transposed,
    # output projection head-major (H, dh, D) so no concat/relayout is needed.
    bf16 = jnp.bfloat16
    wq = p["wq"].astype(bf16)
    wkt = p["wk"].astype(bf16).T                     # (D_out, D_in)
    bkt = p["bk"].astype(jnp.float32).T              # (D, 1)
    wv = p["wv"].astype(bf16)
    woh = p["wo"].astype(bf16).reshape(H, dh, D)
    w1 = p["w1"].astype(bf16)
    w2 = p["w2"].astype(bf16)

    x_spec = pl.BlockSpec((None, Sp, D), lambda b, qi: (b, 0, 0))
    out_spec = pl.BlockSpec((None, TQ, D), lambda b, qi: (b, qi, 0))

    const_args, const_shapes = [], []
    if fuse_pos:
        const_args.append(pos_emb)
        const_shapes.append((Sp, D))
    const_args += [p["ln1_g"], p["ln1_b"],
                   wq, p["bq"], wkt, bkt, wv, p["bv"], woh, p["bo"],
                   p["ln2_g"], p["ln2_b"],
                   w1, p["b1"], w2, p["b2"]]
    const_shapes += [(1, D), (1, D),
                     (D, D), (1, D), (D, D), (D, 1), (D, D), (1, D), (H, dh, D), (1, D),
                     (1, D), (1, D),
                     (D, F), (1, F), (F, D), (1, D)]

    # Advisory cost estimate (whole call).
    flops = B * (8 * Sp * D * D + 4 * Sp * Sp * D + 4 * Sp * D * F)
    transcendentals = B * (H * Sp * Sp + Sp * F)
    weight_bytes = (4 * D * D + 2 * D * F) * 2 + (9 * D + F + D) * 4
    bytes_accessed = weight_bytes + 2 * B * Sp * D * 4 + (Sp * D * 4 if fuse_pos else 0)
    budget = _vmem_budget_bytes()

    def _run(single_buffer_consts):
        if single_buffer_consts:
            # Constant-index operands need only one VMEM buffer (index map never
            # changes); halves the resident weight footprint (critical on v7x).
            def const(shape):
                return pl.BlockSpec(shape, lambda b, qi: (0,) * len(shape),
                                    pipeline_mode=pl.Buffered(1))
        else:
            def const(shape):
                return pl.BlockSpec(shape, lambda b, qi: (0,) * len(shape))

        in_specs = [x_spec] + [const(s) for s in const_shapes]
        wfac = 1 if single_buffer_consts else 2
        est_vmem = (weight_bytes * wfac
                    + 2 * Sp * D * 4 + 2 * TQ * D * 4            # x / out blocks
                    + (Sp * D * 4 * wfac if fuse_pos else 0)     # pos
                    + 2 * Sp * D * 2                             # K^T/V scratch (bf16)
                    + 2 * H * TQ * Sp * 4                        # scores + probs
                    + H * TQ * D * 4                             # per-head Wo partials
                    + TQ * F * 4                                 # FFN hidden
                    + 4 * Sp * D * 4)                            # ln1 / transposed copies
        vmem_limit = None if est_vmem <= (16 << 20) else min(int(est_vmem * 5) // 4, budget)

        return pl.pallas_call(
            kern,
            out_shape=jax.ShapeDtypeStruct((B, Sp, D), x.dtype),
            grid=(B, NQ),
            in_specs=in_specs,
            out_specs=out_spec,
            scratch_shapes=[
                pltpu.VMEM((H, dh, Sp), jnp.bfloat16),   # K^T cache (head-major, lane=Sp)
                pltpu.VMEM((H, Sp, dh), jnp.bfloat16),   # V cache (head-major)
            ],
            compiler_params=pltpu.CompilerParams(
                dimension_semantics=("parallel", "arbitrary"),
                vmem_limit_bytes=vmem_limit,
            ),
            cost_estimate=pl.CostEstimate(
                flops=flops, transcendentals=transcendentals,
                bytes_accessed=bytes_accessed),
        )(x, *const_args)

    try:
        return _run(True)
    except Exception:
        # pipeline_mode=pl.Buffered(1) unsupported on this jax version:
        # fall back to default double-buffering of the constant operands.
        return _run(False)


# --------------------------------------------------------------------------
# Full encoder (glue in plain JAX: clf-token concat, pos-emb slice, sequence
# padding to a lane/sublane-friendly length, layer loop).  The positional
# embedding add is fused into the first layer kernel.
# --------------------------------------------------------------------------
def vit_encoder(x, params, num_heads, use_clf_token=False, clf_token=None,
                gelu_tanh=False):
    if use_clf_token:
        tok = jnp.broadcast_to(clf_token[None, :, :], (x.shape[0], 1, x.shape[2]))
        x = jnp.concatenate([tok, x], axis=1)
    B, S, D = x.shape
    pos = params["pos_emb"][:S]
    if not params["layers"]:
        return x + pos[None].astype(x.dtype)

    Sp = _pad_seq_len(S)
    if Sp != S:
        x = jnp.pad(x, ((0, 0), (0, Sp - S), (0, 0)))
        pos = jnp.pad(pos, ((0, Sp - S), (0, 0)))
    for i, lyr in enumerate(params["layers"]):
        x = encoder_layer(x, lyr, num_heads, seq_len=S,
                          pos_emb=pos if i == 0 else None, gelu_tanh=gelu_tanh)
    if Sp != S:
        x = x[:, :S]
    return x


# --------------------------------------------------------------------------
# Deterministic parameter init (shapes per the PyTorch __init__).
# Weights are stored in bf16 (MXU-native); biases / LayerNorm params in f32.
# --------------------------------------------------------------------------
def init_params(key, num_layers, h_dim, d_ff, max_time_steps):
    def dense(k, fan_in, fan_out):
        kw, kb = jax.random.split(k)
        w = (jax.random.normal(kw, (fan_in, fan_out), jnp.float32) * 0.02).astype(jnp.bfloat16)
        b = jax.random.normal(kb, (1, fan_out), jnp.float32) * 0.02
        return w, b

    keys = jax.random.split(key, num_layers + 1)
    pos_emb = jax.random.normal(keys[0], (max_time_steps, h_dim), jnp.float32) * 0.02
    layers = []
    for i in range(num_layers):
        lk = jax.random.split(keys[i + 1], 6)
        wq, bq = dense(lk[0], h_dim, h_dim)
        wk, bk = dense(lk[1], h_dim, h_dim)
        wv, bv = dense(lk[2], h_dim, h_dim)
        wo, bo = dense(lk[3], h_dim, h_dim)
        w1, b1 = dense(lk[4], h_dim, d_ff)
        w2, b2 = dense(lk[5], d_ff, h_dim)
        layers.append(dict(
            ln1_g=jnp.ones((1, h_dim), jnp.float32),
            ln1_b=jnp.zeros((1, h_dim), jnp.float32),
            wq=wq, bq=bq, wk=wk, bk=bk, wv=wv, bv=bv, wo=wo, bo=bo,
            ln2_g=jnp.ones((1, h_dim), jnp.float32),
            ln2_b=jnp.zeros((1, h_dim), jnp.float32),
            w1=w1, b1=b1, w2=w2, b2=b2,
        ))
    return dict(pos_emb=pos_emb, layers=layers)


# --------------------------------------------------------------------------
# Pure-JAX f32 reference (mirrors the PyTorch forward) for a correctness check.
# --------------------------------------------------------------------------
def encoder_layer_ref(x, p, num_heads):
    f32 = lambda a: a.astype(jnp.float32)

    def ln(v, g, b):
        mu = jnp.mean(v, -1, keepdims=True)
        var = jnp.mean((v - mu) ** 2, -1, keepdims=True)
        return (v - mu) * jax.lax.rsqrt(var + 1e-5) * g[0] + b[0]

    B, S, D = x.shape
    dh = D // num_heads
    x_ = ln(x, p["ln1_g"], p["ln1_b"])
    q = x_ @ f32(p["wq"]) + p["bq"][0]
    k = x_ @ f32(p["wk"]) + p["bk"][0]
    v = x_ @ f32(p["wv"]) + p["bv"][0]
    q = q.reshape(B, S, num_heads, dh).transpose(0, 2, 1, 3)
    k = k.reshape(B, S, num_heads, dh).transpose(0, 2, 1, 3)
    v = v.reshape(B, S, num_heads, dh).transpose(0, 2, 1, 3)
    s = jnp.einsum("bhqd,bhkd->bhqk", q, k) / math.sqrt(dh)
    a = jax.nn.softmax(s, axis=-1)
    o = jnp.einsum("bhqk,bhkd->bhqd", a, v).transpose(0, 2, 1, 3).reshape(B, S, D)
    x = x + (o @ f32(p["wo"]) + p["bo"][0])
    x_ = ln(x, p["ln2_g"], p["ln2_b"])
    h = x_ @ f32(p["w1"]) + p["b1"][0]
    h = 0.5 * h * (1.0 + jax.lax.erf(h * (1.0 / math.sqrt(2.0))))
    x = x + (h @ f32(p["w2"]) + p["b2"][0])
    return x


def vit_encoder_ref(x, params, num_heads):
    S = x.shape[1]
    x = x + params["pos_emb"][:S][None]
    for p in params["layers"]:
        x = encoder_layer_ref(x, p, num_heads)
    return x


# --------------------------------------------------------------------------
if __name__ == "__main__":
    num_layers = 2
    h_dim = 32
    num_heads = 4
    d_ff = 64
    max_time_steps = 16

    key = jax.random.PRNGKey(0)
    kx, kp, kx2 = jax.random.split(key, 3)
    params = init_params(kp, num_layers, h_dim, d_ff, max_time_steps)

    # case 1: S already sublane-friendly (no padding path)
    B, S = 2, 8
    x = jax.random.normal(kx, (B, S, h_dim), jnp.float32)
    out = jax.block_until_ready(vit_encoder(x, params, num_heads))
    ref = vit_encoder_ref(x, params, num_heads)
    # bf16 MXU inputs + approx softmax reciprocal vs. full-f32 reference
    np.testing.assert_allclose(np.asarray(out), np.asarray(ref), rtol=2e-2, atol=2e-2)

    # case 2: ragged S -> padded sequence + additive key mask path
    B2, S2 = 1, 12
    x2 = jax.random.normal(kx2, (B2, S2, h_dim), jnp.float32)
    out2 = jax.block_until_ready(vit_encoder(x2, params, num_heads))
    ref2 = vit_encoder_ref(x2, params, num_heads)
    np.testing.assert_allclose(np.asarray(out2), np.asarray(ref2), rtol=2e-2, atol=2e-2)

    print("KERNEL_OK")
</pallas_src>

<mosaic_0001>
module attributes {stable_mosaic.version = 11 : i64} {
  func.func @encoder_layer_kernel(%arg0: i32, %arg1: i32, %arg2: memref<1x8x32xf32, #tpu.memory_space<vmem>>, %arg3: memref<8x32xf32, #tpu.memory_space<vmem>>, %arg4: memref<1x32xf32, #tpu.memory_space<vmem>>, %arg5: memref<1x32xf32, #tpu.memory_space<vmem>>, %arg6: memref<32x32xbf16, #tpu.memory_space<vmem>>, %arg7: memref<1x32xf32, #tpu.memory_space<vmem>>, %arg8: memref<32x32xbf16, #tpu.memory_space<vmem>>, %arg9: memref<32x1xf32, #tpu.memory_space<vmem>>, %arg10: memref<32x32xbf16, #tpu.memory_space<vmem>>, %arg11: memref<1x32xf32, #tpu.memory_space<vmem>>, %arg12: memref<4x8x32xbf16, #tpu.memory_space<vmem>>, %arg13: memref<1x32xf32, #tpu.memory_space<vmem>>, %arg14: memref<1x32xf32, #tpu.memory_space<vmem>>, %arg15: memref<1x32xf32, #tpu.memory_space<vmem>>, %arg16: memref<32x64xbf16, #tpu.memory_space<vmem>>, %arg17: memref<1x64xf32, #tpu.memory_space<vmem>>, %arg18: memref<64x32xbf16, #tpu.memory_space<vmem>>, %arg19: memref<1x32xf32, #tpu.memory_space<vmem>>, %arg20: memref<1x8x32xf32, #tpu.memory_space<vmem>>, %arg21: memref<4x8x8xbf16, #tpu.memory_space<vmem>>, %arg22: memref<4x8x8xbf16, #tpu.memory_space<vmem>>) attributes {dimension_semantics = [#tpu.dimension_semantics<parallel>, #tpu.dimension_semantics<arbitrary>], iteration_bounds = array<i64: 2, 1>, scalar_prefetch = 0 : i64, scratch_operands = 2 : i64, tpu.core_type = #tpu.core_type<tc>, window_params = [{transform_indices = @transform_0, window_bounds = array<i64: 1, 8, 32>}, {pipeline_mode = #tpu.pipeline_mode<synchronous>, transform_indices = @transform_1, window_bounds = array<i64: 8, 32>}, {pipeline_mode = #tpu.pipeline_mode<synchronous>, transform_indices = @transform_2, window_bounds = array<i64: 1, 32>}, {pipeline_mode = #tpu.pipeline_mode<synchronous>, transform_indices = @transform_3, window_bounds = array<i64: 1, 32>}, {pipeline_mode = #tpu.pipeline_mode<synchronous>, transform_indices = @transform_4, window_bounds = array<i64: 32, 32>}, {pipeline_mode = #tpu.pipeline_mode<synchronous>, transform_indices = @transform_5, window_bounds = array<i64: 1, 32>}, {pipeline_mode = #tpu.pipeline_mode<synchronous>, transform_indices = @transform_6, window_bounds = array<i64: 32, 32>}, {pipeline_mode = #tpu.pipeline_mode<synchronous>, transform_indices = @transform_7, window_bounds = array<i64: 32, 1>}, {pipeline_mode = #tpu.pipeline_mode<synchronous>, transform_indices = @transform_8, window_bounds = array<i64: 32, 32>}, {pipeline_mode = #tpu.pipeline_mode<synchronous>, transform_indices = @transform_9, window_bounds = array<i64: 1, 32>}, {pipeline_mode = #tpu.pipeline_mode<synchronous>, transform_indices = @transform_10, window_bounds = array<i64: 4, 8, 32>}, {pipeline_mode = #tpu.pipeline_mode<synchronous>, transform_indices = @transform_11, window_bounds = array<i64: 1, 32>}, {pipeline_mode = #tpu.pipeline_mode<synchronous>, transform_indices = @transform_12, window_bounds = array<i64: 1, 32>}, {pipeline_mode = #tpu.pipeline_mode<synchronous>, transform_indices = @transform_13, window_bounds = array<i64: 1, 32>}, {pipeline_mode = #tpu.pipeline_mode<synchronous>, transform_indices = @transform_14, window_bounds = array<i64: 32, 64>}, {pipeline_mode = #tpu.pipeline_mode<synchronous>, transform_indices = @transform_15, window_bounds = array<i64: 1, 64>}, {pipeline_mode = #tpu.pipeline_mode<synchronous>, transform_indices = @transform_16, window_bounds = array<i64: 64, 32>}, {pipeline_mode = #tpu.pipeline_mode<synchronous>, transform_indices = @transform_17, window_bounds = array<i64: 1, 32>}, {transform_indices = @transform_18, window_bounds = array<i64: 1, 8, 32>}]} {
    %c0_i32 = arith.constant 0 : i32
    %0 = arith.cmpi eq, %arg1, %c0_i32 : i32
    %1 = arith.extui %0 : i1 to i32
    %c0_i32_0 = arith.constant 0 : i32
    %2 = arith.cmpi ne, %1, %c0_i32_0 : i32
    scf.if %2 {
      %c0_59 = arith.constant 0 : index
      %c0_60 = arith.constant 0 : index
      %c0_61 = arith.constant 0 : index
      %117 = vector.load %arg2[%c0_59, %c0_60, %c0_61] : memref<1x8x32xf32, #tpu.memory_space<vmem>>, vector<1x8x32xf32>
      %118 = vector.shape_cast %117 : vector<1x8x32xf32> to vector<8x32xf32>
      %c0_62 = arith.constant 0 : index
      %c0_63 = arith.constant 0 : index
      %119 = vector.load %arg3[%c0_62, %c0_63] : memref<8x32xf32, #tpu.memory_space<vmem>>, vector<8x32xf32>
      %120 = arith.addf %118, %119 : vector<8x32xf32>
      %cst_64 = arith.constant dense<0.000000e+00> : vector<8xf32>
      %121 = vector.multi_reduction <add>, %120, %cst_64 [1] : vector<8x32xf32> to vector<8xf32>
      %122 = vector.shape_cast %121 : vector<8xf32> to vector<8x1xf32>
      %cst_65 = arith.constant 3.200000e+01 : f32
      %123 = vector.broadcast %cst_65 : f32 to vector<8x1xf32>
      %124 = arith.divf %122, %123 : vector<8x1xf32>
      %125 = vector.broadcast %124 : vector<8x1xf32> to vector<8x32xf32>
      %126 = arith.subf %120, %125 : vector<8x32xf32>
      %127 = arith.mulf %126, %126 : vector<8x32xf32>
      %cst_66 = arith.constant dense<0.000000e+00> : vector<8xf32>
      %128 = vector.multi_reduction <add>, %127, %cst_66 [1] : vector<8x32xf32> to vector<8xf32>
      %129 = vector.shape_cast %128 : vector<8xf32> to vector<8x1xf32>
      %cst_67 = arith.constant 3.200000e+01 : f32
      %130 = vector.broadcast %cst_67 : f32 to vector<8x1xf32>
      %131 = arith.divf %129, %130 : vector<8x1xf32>
      %132 = vector.broadcast %124 : vector<8x1xf32> to vector<8x32xf32>
      %133 = arith.subf %120, %132 : vector<8x32xf32>
      %cst_68 = arith.constant 9.99999974E-6 : f32
      %134 = vector.broadcast %cst_68 : f32 to vector<8x1xf32>
      %135 = arith.addf %131, %134 : vector<8x1xf32>
      %136 = math.rsqrt %135 : vector<8x1xf32>
      %137 = vector.broadcast %136 : vector<8x1xf32> to vector<8x32xf32>
      %138 = arith.mulf %133, %137 : vector<8x32xf32>
      %c0_69 = arith.constant 0 : index
      %c0_70 = arith.constant 0 : index
      %139 = vector.load %arg4[%c0_69, %c0_70] : memref<1x32xf32, #tpu.memory_space<vmem>>, vector<1x32xf32>
      %140 = vector.broadcast %139 : vector<1x32xf32> to vector<8x32xf32>
      %141 = arith.mulf %138, %140 : vector<8x32xf32>
      %c0_71 = arith.constant 0 : index
      %c0_72 = arith.constant 0 : index
      %142 = vector.load %arg5[%c0_71, %c0_72] : memref<1x32xf32, #tpu.memory_space<vmem>>, vector<1x32xf32>
      %143 = vector.broadcast %142 : vector<1x32xf32> to vector<8x32xf32>
      %144 = arith.addf %141, %143 : vector<8x32xf32>
      %145 = tpu.transpose %144, [1, 0] : vector<8x32xf32> -> vector<32x8xf32>
      %146 = arith.truncf %145 : vector<32x8xf32> to vector<32x8xbf16>
      %c0_73 = arith.constant 0 : index
      %c0_74 = arith.constant 0 : index
      %147 = vector.load %arg8[%c0_73, %c0_74] : memref<32x32xbf16, #tpu.memory_space<vmem>>, vector<32x32xbf16>
      %cst_75 = arith.constant dense<0.000000e+00> : vector<32x8xf32>
      %148 = tpu.matmul %147, %146, %cst_75 {dimension_numbers = #tpu.dot_dimension_numbers<[1], [0], [0], [1], [0, 0, 1, 1], [], []>} : vector<32x32xbf16>, vector<32x8xbf16>, vector<32x8xf32> -> vector<32x8xf32>
      %c0_76 = arith.constant 0 : index
      %c0_77 = arith.constant 0 : index
      %149 = vector.load %arg9[%c0_76, %c0_77] : memref<32x1xf32, #tpu.memory_space<vmem>>, vector<32x1xf32>
      %150 = vector.broadcast %149 : vector<32x1xf32> to vector<32x8xf32>
      %151 = arith.addf %148, %150 : vector<32x8xf32>
      %152 = vector.shape_cast %151 : vector<32x8xf32> to vector<4x8x8xf32>
      %153 = arith.truncf %152 : vector<4x8x8xf32> to vector<4x8x8xbf16>
      %c0_78 = arith.constant 0 : index
      %c0_79 = arith.constant 0 : index
      %c0_80 = arith.constant 0 : index
      %154 = vector.load %arg21[%c0_78, %c0_79, %c0_80] : memref<4x8x8xbf16, #tpu.memory_space<vmem>>, vector<4x8x8xbf16>
      tpu.vector_store %arg21[%c0_78, %c0_79, %c0_80], %153 {strides = array<i32>} : memref<4x8x8xbf16, #tpu.memory_space<vmem>>, vector<4x8x8xbf16>,
      %155 = arith.truncf %144 : vector<8x32xf32> to vector<8x32xbf16>
      %c0_81 = arith.constant 0 : index
      %c0_82 = arith.constant 0 : index
      %156 = vector.load %arg10[%c0_81, %c0_82] : memref<32x32xbf16, #tpu.memory_space<vmem>>, vector<32x32xbf16>
      %cst_83 = arith.constant dense<0.000000e+00> : vector<8x32xf32>
      %157 = tpu.matmul %155, %156, %cst_83 {dimension_numbers = #tpu.dot_dimension_numbers<[1], [0], [0], [1], [0, 0, 1, 1], [], []>} : vector<8x32xbf16>, vector<32x32xbf16>, vector<8x32xf32> -> vector<8x32xf32>
      %c0_84 = arith.constant 0 : index
      %c0_85 = arith.constant 0 : index
      %158 = vector.load %arg11[%c0_84, %c0_85] : memref<1x32xf32, #tpu.memory_space<vmem>>, vector<1x32xf32>
      %159 = vector.broadcast %158 : vector<1x32xf32> to vector<8x32xf32>
      %160 = arith.addf %157, %159 : vector<8x32xf32>
      %161 = vector.shape_cast %160 : vector<8x32xf32> to vector<8x4x8xf32>
      %162 = tpu.transpose %161, [1, 0, 2] : vector<8x4x8xf32> -> vector<4x8x8xf32>
      %163 = arith.truncf %162 : vector<4x8x8xf32> to vector<4x8x8xbf16>
      %c0_86 = arith.constant 0 : index
      %c0_87 = arith.constant 0 : index
      %c0_88 = arith.constant 0 : index
      %164 = vector.load %arg22[%c0_86, %c0_87, %c0_88] : memref<4x8x8xbf16, #tpu.memory_space<vmem>>, vector<4x8x8xbf16>
      tpu.vector_store %arg22[%c0_86, %c0_87, %c0_88], %163 {strides = array<i32>} : memref<4x8x8xbf16, #tpu.memory_space<vmem>>, vector<4x8x8xbf16>,
    } else {
    }
    %c8_i32 = arith.constant 8 : i32
    %3 = arith.muli %arg1, %c8_i32 : i32
    %4 = tpu.assume_multiple %3, 8 : i32
    %c0 = arith.constant 0 : index
    %5 = arith.index_cast %4 : i32 to index
    %c0_1 = arith.constant 0 : index
    %6 = vector.load %arg2[%c0, %5, %c0_1] : memref<1x8x32xf32, #tpu.memory_space<vmem>>, vector<1x8x32xf32>
    %7 = vector.shape_cast %6 : vector<1x8x32xf32> to vector<8x32xf32>
    %8 = arith.index_cast %4 : i32 to index
    %c0_2 = arith.constant 0 : index
    %9 = vector.load %arg3[%8, %c0_2] : memref<8x32xf32, #tpu.memory_space<vmem>>, vector<8x32xf32>
    %10 = arith.addf %7, %9 : vector<8x32xf32>
    %cst = arith.constant dense<0.000000e+00> : vector<8xf32>
    %11 = vector.multi_reduction <add>, %10, %cst [1] : vector<8x32xf32> to vector<8xf32>
    %12 = vector.shape_cast %11 : vector<8xf32> to vector<8x1xf32>
    %cst_3 = arith.constant 3.200000e+01 : f32
    %13 = vector.broadcast %cst_3 : f32 to vector<8x1xf32>
    %14 = arith.divf %12, %13 : vector<8x1xf32>
    %15 = vector.broadcast %14 : vector<8x1xf32> to vector<8x32xf32>
    %16 = arith.subf %10, %15 : vector<8x32xf32>
    %17 = arith.mulf %16, %16 : vector<8x32xf32>
    %cst_4 = arith.constant dense<0.000000e+00> : vector<8xf32>
    %18 = vector.multi_reduction <add>, %17, %cst_4 [1] : vector<8x32xf32> to vector<8xf32>
    %19 = vector.shape_cast %18 : vector<8xf32> to vector<8x1xf32>
    %cst_5 = arith.constant 3.200000e+01 : f32
    %20 = vector.broadcast %cst_5 : f32 to vector<8x1xf32>
    %21 = arith.divf %19, %20 : vector<8x1xf32>
    %22 = vector.broadcast %14 : vector<8x1xf32> to vector<8x32xf32>
    %23 = arith.subf %10, %22 : vector<8x32xf32>
    %cst_6 = arith.constant 9.99999974E-6 : f32
    %24 = vector.broadcast %cst_6 : f32 to vector<8x1xf32>
    %25 = arith.addf %21, %24 : vector<8x1xf32>
    %26 = math.rsqrt %25 : vector<8x1xf32>
    %27 = vector.broadcast %26 : vector<8x1xf32> to vector<8x32xf32>
    %28 = arith.mulf %23, %27 : vector<8x32xf32>
    %c0_7 = arith.constant 0 : index
    %c0_8 = arith.constant 0 : index
    %29 = vector.load %arg4[%c0_7, %c0_8] : memref<1x32xf32, #tpu.memory_space<vmem>>, vector<1x32xf32>
    %30 = vector.broadcast %29 : vector<1x32xf32> to vector<8x32xf32>
    %31 = arith.mulf %28, %30 : vector<8x32xf32>
    %c0_9 = arith.constant 0 : index
    %c0_10 = arith.constant 0 : index
    %32 = vector.load %arg5[%c0_9, %c0_10] : memref<1x32xf32, #tpu.memory_space<vmem>>, vector<1x32xf32>
    %33 = vector.broadcast %32 : vector<1x32xf32> to vector<8x32xf32>
    %34 = arith.addf %31, %33 : vector<8x32xf32>
    %35 = arith.truncf %34 : vector<8x32xf32> to vector<8x32xbf16>
    %c0_11 = arith.constant 0 : index
    %c0_12 = arith.constant 0 : index
    %36 = vector.load %arg6[%c0_11, %c0_12] : memref<32x32xbf16, #tpu.memory_space<vmem>>, vector<32x32xbf16>
    %cst_13 = arith.constant dense<0.000000e+00> : vector<8x32xf32>
    %37 = tpu.matmul %35, %36, %cst_13 {dimension_numbers = #tpu.dot_dimension_numbers<[1], [0], [0], [1], [0, 0, 1, 1], [], []>} : vector<8x32xbf16>, vector<32x32xbf16>, vector<8x32xf32> -> vector<8x32xf32>
    %c0_14 = arith.constant 0 : index
    %c0_15 = arith.constant 0 : index
    %38 = vector.load %arg7[%c0_14, %c0_15] : memref<1x32xf32, #tpu.memory_space<vmem>>, vector<1x32xf32>
    %39 = vector.broadcast %38 : vector<1x32xf32> to vector<8x32xf32>
    %40 = arith.addf %37, %39 : vector<8x32xf32>
    %cst_16 = arith.constant 0.353553385 : f32
    %41 = vector.broadcast %cst_16 : f32 to vector<8x32xf32>
    %42 = arith.mulf %40, %41 : vector<8x32xf32>
    %43 = vector.shape_cast %42 : vector<8x32xf32> to vector<8x4x8xf32>
    %44 = tpu.transpose %43, [1, 0, 2] : vector<8x4x8xf32> -> vector<4x8x8xf32>
    %45 = arith.truncf %44 : vector<4x8x8xf32> to vector<4x8x8xbf16>
    %c0_17 = arith.constant 0 : index
    %c0_18 = arith.constant 0 : index
    %c0_19 = arith.constant 0 : index
    %46 = vector.load %arg21[%c0_17, %c0_18, %c0_19] : memref<4x8x8xbf16, #tpu.memory_space<vmem>>, vector<4x8x8xbf16>
    "tpu.trace_start"() <{level = 10 : i32, message = "hqd,hds->hqs"}> : () -> ()
    %cst_20 = arith.constant dense<0.000000e+00> : vector<4x8x8xf32>
    %47 = tpu.matmul %45, %46, %cst_20 {dimension_numbers = #tpu.dot_dimension_numbers<[2], [1], [1], [2], [0, 0, 0, 1, 1, 2], [0], [0]>} : vector<4x8x8xbf16>, vector<4x8x8xbf16>, vector<4x8x8xf32> -> vector<4x8x8xf32>
    "tpu.trace_stop"() : () -> ()
    %cst_21 = arith.constant dense<0xFF800000> : vector<4x8xf32>
    %48 = vector.multi_reduction <maximumf>, %47, %cst_21 [2] : vector<4x8x8xf32> to vector<4x8xf32>
    %49 = vector.shape_cast %48 : vector<4x8xf32> to vector<4x8x1xf32>
    %50 = vector.broadcast %49 : vector<4x8x1xf32> to vector<4x8x8xf32>
    %51 = arith.subf %47, %50 : vector<4x8x8xf32>
    %52 = math.exp %51 : vector<4x8x8xf32>
    %cst_22 = arith.constant dense<0.000000e+00> : vector<4x8xf32>
    %53 = vector.multi_reduction <add>, %52, %cst_22 [2] : vector<4x8x8xf32> to vector<4x8xf32>
    %54 = vector.shape_cast %53 : vector<4x8xf32> to vector<4x8x1xf32>
    %55 = tpu.reciprocal %54 {approx = true} : vector<4x8x1xf32> -> vector<4x8x1xf32>
    %56 = vector.broadcast %55 : vector<4x8x1xf32> to vector<4x8x8xf32>
    %57 = arith.mulf %52, %56 : vector<4x8x8xf32>
    %58 = arith.truncf %57 : vector<4x8x8xf32> to vector<4x8x8xbf16>
    %c0_23 = arith.constant 0 : index
    %c0_24 = arith.constant 0 : index
    %c0_25 = arith.constant 0 : index
    %59 = vector.load %arg22[%c0_23, %c0_24, %c0_25] : memref<4x8x8xbf16, #tpu.memory_space<vmem>>, vector<4x8x8xbf16>
    "tpu.trace_start"() <{level = 10 : i32, message = "hqs,hsd->hqd"}> : () -> ()
    %cst_26 = arith.constant dense<0.000000e+00> : vector<4x8x8xf32>
    %60 = tpu.matmul %58, %59, %cst_26 {dimension_numbers = #tpu.dot_dimension_numbers<[2], [1], [1], [2], [0, 0, 0, 1, 1, 2], [0], [0]>} : vector<4x8x8xbf16>, vector<4x8x8xbf16>, vector<4x8x8xf32> -> vector<4x8x8xf32>
    "tpu.trace_stop"() : () -> ()
    %61 = arith.truncf %60 : vector<4x8x8xf32> to vector<4x8x8xbf16>
    %c0_27 = arith.constant 0 : index
    %c0_28 = arith.constant 0 : index
    %c0_29 = arith.constant 0 : index
    %62 = vector.load %arg12[%c0_27, %c0_28, %c0_29] : memref<4x8x32xbf16, #tpu.memory_space<vmem>>, vector<4x8x32xbf16>
    "tpu.trace_start"() <{level = 10 : i32, message = "hqd,hde->hqe"}> : () -> ()
    %cst_30 = arith.constant dense<0.000000e+00> : vector<4x8x32xf32>
    %63 = tpu.matmul %61, %62, %cst_30 {dimension_numbers = #tpu.dot_dimension_numbers<[2], [1], [1], [2], [0, 0, 0, 1, 1, 2], [0], [0]>} : vector<4x8x8xbf16>, vector<4x8x32xbf16>, vector<4x8x32xf32> -> vector<4x8x32xf32>
    "tpu.trace_stop"() : () -> ()
    %cst_31 = arith.constant dense<0.000000e+00> : vector<8x32xf32>
    %64 = vector.multi_reduction <add>, %63, %cst_31 [0] : vector<4x8x32xf32> to vector<8x32xf32>
    %c0_32 = arith.constant 0 : index
    %c0_33 = arith.constant 0 : index
    %65 = vector.load %arg13[%c0_32, %c0_33] : memref<1x32xf32, #tpu.memory_space<vmem>>, vector<1x32xf32>
    %66 = vector.broadcast %65 : vector<1x32xf32> to vector<8x32xf32>
    %67 = arith.addf %64, %66 : vector<8x32xf32>
    %68 = arith.addf %10, %67 : vector<8x32xf32>
    %cst_34 = arith.constant dense<0.000000e+00> : vector<8xf32>
    %69 = vector.multi_reduction <add>, %68, %cst_34 [1] : vector<8x32xf32> to vector<8xf32>
    %70 = vector.shape_cast %69 : vector<8xf32> to vector<8x1xf32>
    %cst_35 = arith.constant 3.200000e+01 : f32
    %71 = vector.broadcast %cst_35 : f32 to vector<8x1xf32>
    %72 = arith.divf %70, %71 : vector<8x1xf32>
    %73 = vector.broadcast %72 : vector<8x1xf32> to vector<8x32xf32>
    %74 = arith.subf %68, %73 : vector<8x32xf32>
    %75 = arith.mulf %74, %74 : vector<8x32xf32>
    %cst_36 = arith.constant dense<0.000000e+00> : vector<8xf32>
    %76 = vector.multi_reduction <add>, %75, %cst_36 [1] : vector<8x32xf32> to vector<8xf32>
    %77 = vector.shape_cast %76 : vector<8xf32> to vector<8x1xf32>
    %cst_37 = arith.constant 3.200000e+01 : f32
    %78 = vector.broadcast %cst_37 : f32 to vector<8x1xf32>
    %79 = arith.divf %77, %78 : vector<8x1xf32>
    %80 = vector.broadcast %72 : vector<8x1xf32> to vector<8x32xf32>
    %81 = arith.subf %68, %80 : vector<8x32xf32>
    %cst_38 = arith.constant 9.99999974E-6 : f32
    %82 = vector.broadcast %cst_38 : f32 to vector<8x1xf32>
    %83 = arith.addf %79, %82 : vector<8x1xf32>
    %84 = math.rsqrt %83 : vector<8x1xf32>
    %85 = vector.broadcast %84 : vector<8x1xf32> to vector<8x32xf32>
    %86 = arith.mulf %81, %85 : vector<8x32xf32>
    %c0_39 = arith.constant 0 : index
    %c0_40 = arith.constant 0 : index
    %87 = vector.load %arg14[%c0_39, %c0_40] : memref<1x32xf32, #tpu.memory_space<vmem>>, vector<1x32xf32>
    %88 = vector.broadcast %87 : vector<1x32xf32> to vector<8x32xf32>
    %89 = arith.mulf %86, %88 : vector<8x32xf32>
    %c0_41 = arith.constant 0 : index
    %c0_42 = arith.constant 0 : index
    %90 = vector.load %arg15[%c0_41, %c0_42] : memref<1x32xf32, #tpu.memory_space<vmem>>, vector<1x32xf32>
    %91 = vector.broadcast %90 : vector<1x32xf32> to vector<8x32xf32>
    %92 = arith.addf %89, %91 : vector<8x32xf32>
    %93 = arith.truncf %92 : vector<8x32xf32> to vector<8x32xbf16>
    %c0_43 = arith.constant 0 : index
    %c0_44 = arith.constant 0 : index
    %94 = vector.load %arg16[%c0_43, %c0_44] : memref<32x64xbf16, #tpu.memory_space<vmem>>, vector<32x64xbf16>
    %cst_45 = arith.constant dense<0.000000e+00> : vector<8x64xf32>
    %95 = tpu.matmul %93, %94, %cst_45 {dimension_numbers = #tpu.dot_dimension_numbers<[1], [0], [0], [1], [0, 0, 1, 1], [], []>} : vector<8x32xbf16>, vector<32x64xbf16>, vector<8x64xf32> -> vector<8x64xf32>
    %c0_46 = arith.constant 0 : index
    %c0_47 = arith.constant 0 : index
    %96 = vector.load %arg17[%c0_46, %c0_47] : memref<1x64xf32, #tpu.memory_space<vmem>>, vector<1x64xf32>
    %97 = vector.broadcast %96 : vector<1x64xf32> to vector<8x64xf32>
    %98 = arith.addf %95, %97 : vector<8x64xf32>
    %cst_48 = arith.constant 5.000000e-01 : f32
    %99 = vector.broadcast %cst_48 : f32 to vector<8x64xf32>
    %100 = arith.mulf %99, %98 : vector<8x64xf32>
    %cst_49 = arith.constant 0.707106769 : f32
    %101 = vector.broadcast %cst_49 : f32 to vector<8x64xf32>
    %102 = arith.mulf %98, %101 : vector<8x64xf32>
    %103 = math.erf %102 : vector<8x64xf32>
    %cst_50 = arith.constant 1.000000e+00 : f32
    %104 = vector.broadcast %cst_50 : f32 to vector<8x64xf32>
    %105 = arith.addf %104, %103 : vector<8x64xf32>
    %106 = arith.mulf %100, %105 : vector<8x64xf32>
    %107 = arith.truncf %106 : vector<8x64xf32> to vector<8x64xbf16>
    %c0_51 = arith.constant 0 : index
    %c0_52 = arith.constant 0 : index
    %108 = vector.load %arg18[%c0_51, %c0_52] : memref<64x32xbf16, #tpu.memory_space<vmem>>, vector<64x32xbf16>
    %cst_53 = arith.constant dense<0.000000e+00> : vector<8x32xf32>
    %109 = tpu.matmul %107, %108, %cst_53 {dimension_numbers = #tpu.dot_dimension_numbers<[1], [0], [0], [1], [0, 0, 1, 1], [], []>} : vector<8x64xbf16>, vector<64x32xbf16>, vector<8x32xf32> -> vector<8x32xf32>
    %c0_54 = arith.constant 0 : index
    %c0_55 = arith.constant 0 : index
    %110 = vector.load %arg19[%c0_54, %c0_55] : memref<1x32xf32, #tpu.memory_space<vmem>>, vector<1x32xf32>
    %111 = vector.broadcast %110 : vector<1x32xf32> to vector<8x32xf32>
    %112 = arith.addf %109, %111 : vector<8x32xf32>
    %113 = arith.addf %68, %112 : vector<8x32xf32>
    %c0_56 = arith.constant 0 : index
    %c0_57 = arith.constant 0 : index
    %c0_58 = arith.constant 0 : index
    %114 = vector.load %arg20[%c0_56, %c0_57, %c0_58] : memref<1x8x32xf32, #tpu.memory_space<vmem>>, vector<1x8x32xf32>
    %115 = vector.shape_cast %114 : vector<1x8x32xf32> to vector<8x32xf32>
    %116 = vector.shape_cast %113 : vector<8x32xf32> to vector<1x8x32xf32>
    tpu.vector_store %arg20[%c0_56, %c0_57, %c0_58], %116 {strides = array<i32>} : memref<1x8x32xf32, #tpu.memory_space<vmem>>, vector<1x8x32xf32>,
    return
  }
  func.func @transform_0(%arg0: i32, %arg1: i32) -> (i32, i32, i32) {
    %c0_i32 = arith.constant 0 : i32
    %c0_i32_0 = arith.constant 0 : i32
    %c0_i32_1 = arith.constant 0 : i32
    return %arg0, %c0_i32, %c0_i32_0 : i32, i32, i32
  }
  func.func @transform_1(%arg0: i32, %arg1: i32) -> (i32, i32) {
    %c0_i32 = arith.constant 0 : i32
    %c0_i32_0 = arith.constant 0 : i32
    %c0_i32_1 = arith.constant 0 : i32
    return %c0_i32, %c0_i32_0 : i32, i32
  }
  func.func @transform_2(%arg0: i32, %arg1: i32) -> (i32, i32) {
    %c0_i32 = arith.constant 0 : i32
    %c0_i32_0 = arith.constant 0 : i32
    %c0_i32_1 = arith.constant 0 : i32
    return %c0_i32, %c0_i32_0 : i32, i32
  }
  func.func @transform_3(%arg0: i32, %arg1: i32) -> (i32, i32) {
    %c0_i32 = arith.constant 0 : i32
    %c0_i32_0 = arith.constant 0 : i32
    %c0_i32_1 = arith.constant 0 : i32
    return %c0_i32, %c0_i32_0 : i32, i32
  }
  func.func @transform_4(%arg0: i32, %arg1: i32) -> (i32, i32) {
    %c0_i32 = arith.constant 0 : i32
    %c0_i32_0 = arith.constant 0 : i32
    %c0_i32_1 = arith.constant 0 : i32
    return %c0_i32, %c0_i32_0 : i32, i32
  }
  func.func @transform_5(%arg0: i32, %arg1: i32) -> (i32, i32) {
    %c0_i32 = arith.constant 0 : i32
    %c0_i32_0 = arith.constant 0 : i32
    %c0_i32_1 = arith.constant 0 : i32
    return %c0_i32, %c0_i32_0 : i32, i32
  }
  func.func @transform_6(%arg0: i32, %arg1: i32) -> (i32, i32) {
    %c0_i32 = arith.constant 0 : i32
    %c0_i32_0 = arith.constant 0 : i32
    %c0_i32_1 = arith.constant 0 : i32
    return %c0_i32, %c0_i32_0 : i32, i32
  }
  func.func @transform_7(%arg0: i32, %arg1: i32) -> (i32, i32) {
    %c0_i32 = arith.constant 0 : i32
    %c0_i32_0 = arith.constant 0 : i32
    %c0_i32_1 = arith.constant 0 : i32
    return %c0_i32, %c0_i32_0 : i32, i32
  }
  func.func @transform_8(%arg0: i32, %arg1: i32) -> (i32, i32) {
    %c0_i32 = arith.constant 0 : i32
    %c0_i32_0 = arith.constant 0 : i32
    %c0_i32_1 = arith.constant 0 : i32
    return %c0_i32, %c0_i32_0 : i32, i32
  }
  func.func @transform_9(%arg0: i32, %arg1: i32) -> (i32, i32) {
    %c0_i32 = arith.constant 0 : i32
    %c0_i32_0 = arith.constant 0 : i32
    %c0_i32_1 = arith.constant 0 : i32
    return %c0_i32, %c0_i32_0 : i32, i32
  }
  func.func @transform_10(%arg0: i32, %arg1: i32) -> (i32, i32, i32) {
    %c0_i32 = arith.constant 0 : i32
    %c0_i32_0 = arith.constant 0 : i32
    %c0_i32_1 = arith.constant 0 : i32
    %c0_i32_2 = arith.constant 0 : i32
    return %c0_i32, %c0_i32_0, %c0_i32_1 : i32, i32, i32
  }
  func.func @transform_11(%arg0: i32, %arg1: i32) -> (i32, i32) {
    %c0_i32 = arith.constant 0 : i32
    %c0_i32_0 = arith.constant 0 : i32
    %c0_i32_1 = arith.constant 0 : i32
    return %c0_i32, %c0_i32_0 : i32, i32
  }
  func.func @transform_12(%arg0: i32, %arg1: i32) -> (i32, i32) {
    %c0_i32 = arith.constant 0 : i32
    %c0_i32_0 = arith.constant 0 : i32
    %c0_i32_1 = arith.constant 0 : i32
    return %c0_i32, %c0_i32_0 : i32, i32
  }
  func.func @transform_13(%arg0: i32, %arg1: i32) -> (i32, i32) {
    %c0_i32 = arith.constant 0 : i32
    %c0_i32_0 = arith.constant 0 : i32
    %c0_i32_1 = arith.constant 0 : i32
    return %c0_i32, %c0_i32_0 : i32, i32
  }
  func.func @transform_14(%arg0: i32, %arg1: i32) -> (i32, i32) {
    %c0_i32 = arith.constant 0 : i32
    %c0_i32_0 = arith.constant 0 : i32
    %c0_i32_1 = arith.constant 0 : i32
    return %c0_i32, %c0_i32_0 : i32, i32
  }
  func.func @transform_15(%arg0: i32, %arg1: i32) -> (i32, i32) {
    %c0_i32 = arith.constant 0 : i32
    %c0_i32_0 = arith.constant 0 : i32
    %c0_i32_1 = arith.constant 0 : i32
    return %c0_i32, %c0_i32_0 : i32, i32
  }
  func.func @transform_16(%arg0: i32, %arg1: i32) -> (i32, i32) {
    %c0_i32 = arith.constant 0 : i32
    %c0_i32_0 = arith.constant 0 : i32
    %c0_i32_1 = arith.constant 0 : i32
    return %c0_i32, %c0_i32_0 : i32, i32
  }
  func.func @transform_17(%arg0: i32, %arg1: i32) -> (i32, i32) {
    %c0_i32 = arith.constant 0 : i32
    %c0_i32_0 = arith.constant 0 : i32
    %c0_i32_1 = arith.constant 0 : i32
    return %c0_i32, %c0_i32_0 : i32, i32
  }
  func.func @transform_18(%arg0: i32, %arg1: i32) -> (i32, i32, i32) {
    %c0_i32 = arith.constant 0 : i32
    %c0_i32_0 = arith.constant 0 : i32
    return %arg0, %arg1, %c0_i32 : i32, i32, i32
  }
}

module attributes {stable_mosaic.version = 11 : i64} {
  func.func @encoder_layer_kernel(%arg0: i32, %arg1: i32, %arg2: memref<1x8x32xf32, #tpu.memory_space<vmem>>, %arg3: memref<8x32xf32, #tpu.memory_space<vmem>>, %arg4: memref<1x32xf32, #tpu.memory_space<vmem>>, %arg5: memref<1x32xf32, #tpu.memory_space<vmem>>, %arg6: memref<32x32xbf16, #tpu.memory_space<vmem>>, %arg7: memref<1x32xf32, #tpu.memory_space<vmem>>, %arg8: memref<32x32xbf16, #tpu.memory_space<vmem>>, %arg9: memref<32x1xf32, #tpu.memory_space<vmem>>, %arg10: memref<32x32xbf16, #tpu.memory_space<vmem>>, %arg11: memref<1x32xf32, #tpu.memory_space<vmem>>, %arg12: memref<4x8x32xbf16, #tpu.memory_space<vmem>>, %arg13: memref<1x32xf32, #tpu.memory_space<vmem>>, %arg14: memref<1x32xf32, #tpu.memory_space<vmem>>, %arg15: memref<1x32xf32, #tpu.memory_space<vmem>>, %arg16: memref<32x64xbf16, #tpu.memory_space<vmem>>, %arg17: memref<1x64xf32, #tpu.memory_space<vmem>>, %arg18: memref<64x32xbf16, #tpu.memory_space<vmem>>, %arg19: memref<1x32xf32, #tpu.memory_space<vmem>>, %arg20: memref<1x8x32xf32, #tpu.memory_space<vmem>>, %arg21: memref<4x8x8xbf16, #tpu.memory_space<vmem>>, %arg22: memref<4x8x8xbf16, #tpu.memory_space<vmem>>) attributes {dimension_semantics = [#tpu.dimension_semantics<parallel>, #tpu.dimension_semantics<arbitrary>], iteration_bounds = array<i64: 2, 1>, scalar_prefetch = 0 : i64, scratch_operands = 2 : i64, tpu.core_type = #tpu.core_type<tc>, window_params = [{transform_indices = @transform_0, window_bounds = array<i64: 1, 8, 32>}, {pipeline_mode = #tpu.pipeline_mode<synchronous>, transform_indices = @transform_1, window_bounds = array<i64: 8, 32>}, {pipeline_mode = #tpu.pipeline_mode<synchronous>, transform_indices = @transform_2, window_bounds = array<i64: 1, 32>}, {pipeline_mode = #tpu.pipeline_mode<synchronous>, transform_indices = @transform_3, window_bounds = array<i64: 1, 32>}, {pipeline_mode = #tpu.pipeline_mode<synchronous>, transform_indices = @transform_4, window_bounds = array<i64: 32, 32>}, {pipeline_mode = #tpu.pipeline_mode<synchronous>, transform_indices = @transform_5, window_bounds = array<i64: 1, 32>}, {pipeline_mode = #tpu.pipeline_mode<synchronous>, transform_indices = @transform_6, window_bounds = array<i64: 32, 32>}, {pipeline_mode = #tpu.pipeline_mode<synchronous>, transform_indices = @transform_7, window_bounds = array<i64: 32, 1>}, {pipeline_mode = #tpu.pipeline_mode<synchronous>, transform_indices = @transform_8, window_bounds = array<i64: 32, 32>}, {pipeline_mode = #tpu.pipeline_mode<synchronous>, transform_indices = @transform_9, window_bounds = array<i64: 1, 32>}, {pipeline_mode = #tpu.pipeline_mode<synchronous>, transform_indices = @transform_10, window_bounds = array<i64: 4, 8, 32>}, {pipeline_mode = #tpu.pipeline_mode<synchronous>, transform_indices = @transform_11, window_bounds = array<i64: 1, 32>}, {pipeline_mode = #tpu.pipeline_mode<synchronous>, transform_indices = @transform_12, window_bounds = array<i64: 1, 32>}, {pipeline_mode = #tpu.pipeline_mode<synchronous>, transform_indices = @transform_13, window_bounds = array<i64: 1, 32>}, {pipeline_mode = #tpu.pipeline_mode<synchronous>, transform_indices = @transform_14, window_bounds = array<i64: 32, 64>}, {pipeline_mode = #tpu.pipeline_mode<synchronous>, transform_indices = @transform_15, window_bounds = array<i64: 1, 64>}, {pipeline_mode = #tpu.pipeline_mode<synchronous>, transform_indices = @transform_16, window_bounds = array<i64: 64, 32>}, {pipeline_mode = #tpu.pipeline_mode<synchronous>, transform_indices = @transform_17, window_bounds = array<i64: 1, 32>}, {transform_indices = @transform_18, window_bounds = array<i64: 1, 8, 32>}]} {
    %c0_i32 = arith.constant 0 : i32
    %0 = arith.cmpi eq, %arg1, %c0_i32 : i32
    %1 = arith.extui %0 : i1 to i32
    %c0_i32_0 = arith.constant 0 : i32
    %2 = arith.cmpi ne, %1, %c0_i32_0 : i32
    scf.if %2 {
      %c0_59 = arith.constant 0 : index
      %c0_60 = arith.constant 0 : index
      %c0_61 = arith.constant 0 : index
      %117 = vector.load %arg2[%c0_59, %c0_60, %c0_61] : memref<1x8x32xf32, #tpu.memory_space<vmem>>, vector<1x8x32xf32>
      %118 = vector.shape_cast %117 : vector<1x8x32xf32> to vector<8x32xf32>
      %c0_62 = arith.constant 0 : index
      %c0_63 = arith.constant 0 : index
      %119 = vector.load %arg3[%c0_62, %c0_63] : memref<8x32xf32, #tpu.memory_space<vmem>>, vector<8x32xf32>
      %120 = arith.addf %118, %119 : vector<8x32xf32>
      %cst_64 = arith.constant dense<0.000000e+00> : vector<8xf32>
      %121 = vector.multi_reduction <add>, %120, %cst_64 [1] : vector<8x32xf32> to vector<8xf32>
      %122 = vector.shape_cast %121 : vector<8xf32> to vector<8x1xf32>
      %cst_65 = arith.constant 3.200000e+01 : f32
      %123 = vector.broadcast %cst_65 : f32 to vector<8x1xf32>
      %124 = arith.divf %122, %123 : vector<8x1xf32>
      %125 = vector.broadcast %124 : vector<8x1xf32> to vector<8x32xf32>
      %126 = arith.subf %120, %125 : vector<8x32xf32>
      %127 = arith.mulf %126, %126 : vector<8x32xf32>
      %cst_66 = arith.constant dense<0.000000e+00> : vector<8xf32>
      %128 = vector.multi_reduction <add>, %127, %cst_66 [1] : vector<8x32xf32> to vector<8xf32>
      %129 = vector.shape_cast %128 : vector<8xf32> to vector<8x1xf32>
      %cst_67 = arith.constant 3.200000e+01 : f32
      %130 = vector.broadcast %cst_67 : f32 to vector<8x1xf32>
      %131 = arith.divf %129, %130 : vector<8x1xf32>
      %132 = vector.broadcast %124 : vector<8x1xf32> to vector<8x32xf32>
      %133 = arith.subf %120, %132 : vector<8x32xf32>
      %cst_68 = arith.constant 9.99999974E-6 : f32
      %134 = vector.broadcast %cst_68 : f32 to vector<8x1xf32>
      %135 = arith.addf %131, %134 : vector<8x1xf32>
      %136 = math.rsqrt %135 : vector<8x1xf32>
      %137 = vector.broadcast %136 : vector<8x1xf32> to vector<8x32xf32>
      %138 = arith.mulf %133, %137 : vector<8x32xf32>
      %c0_69 = arith.constant 0 : index
      %c0_70 = arith.constant 0 : index
      %139 = vector.load %arg4[%c0_69, %c0_70] : memref<1x32xf32, #tpu.memory_space<vmem>>, vector<1x32xf32>
      %140 = vector.broadcast %139 : vector<1x32xf32> to vector<8x32xf32>
      %141 = arith.mulf %138, %140 : vector<8x32xf32>
      %c0_71 = arith.constant 0 : index
      %c0_72 = arith.constant 0 : index
      %142 = vector.load %arg5[%c0_71, %c0_72] : memref<1x32xf32, #tpu.memory_space<vmem>>, vector<1x32xf32>
      %143 = vector.broadcast %142 : vector<1x32xf32> to vector<8x32xf32>
      %144 = arith.addf %141, %143 : vector<8x32xf32>
      %145 = tpu.transpose %144, [1, 0] : vector<8x32xf32> -> vector<32x8xf32>
      %146 = arith.truncf %145 : vector<32x8xf32> to vector<32x8xbf16>
      %c0_73 = arith.constant 0 : index
      %c0_74 = arith.constant 0 : index
      %147 = vector.load %arg8[%c0_73, %c0_74] : memref<32x32xbf16, #tpu.memory_space<vmem>>, vector<32x32xbf16>
      %cst_75 = arith.constant dense<0.000000e+00> : vector<32x8xf32>
      %148 = tpu.matmul %147, %146, %cst_75 {dimension_numbers = #tpu.dot_dimension_numbers<[1], [0], [0], [1], [0, 0, 1, 1], [], []>} : vector<32x32xbf16>, vector<32x8xbf16>, vector<32x8xf32> -> vector<32x8xf32>
      %c0_76 = arith.constant 0 : index
      %c0_77 = arith.constant 0 : index
      %149 = vector.load %arg9[%c0_76, %c0_77] : memref<32x1xf32, #tpu.memory_space<vmem>>, vector<32x1xf32>
      %150 = vector.broadcast %149 : vector<32x1xf32> to vector<32x8xf32>
      %151 = arith.addf %148, %150 : vector<32x8xf32>
      %152 = vector.shape_cast %151 : vector<32x8xf32> to vector<4x8x8xf32>
      %153 = arith.truncf %152 : vector<4x8x8xf32> to vector<4x8x8xbf16>
      %c0_78 = arith.constant 0 : index
      %c0_79 = arith.constant 0 : index
      %c0_80 = arith.constant 0 : index
      %154 = vector.load %arg21[%c0_78, %c0_79, %c0_80] : memref<4x8x8xbf16, #tpu.memory_space<vmem>>, vector<4x8x8xbf16>
      tpu.vector_store %arg21[%c0_78, %c0_79, %c0_80], %153 {strides = array<i32>} : memref<4x8x8xbf16, #tpu.memory_space<vmem>>, vector<4x8x8xbf16>,
      %155 = arith.truncf %144 : vector<8x32xf32> to vector<8x32xbf16>
      %c0_81 = arith.constant 0 : index
      %c0_82 = arith.constant 0 : index
      %156 = vector.load %arg10[%c0_81, %c0_82] : memref<32x32xbf16, #tpu.memory_space<vmem>>, vector<32x32xbf16>
      %cst_83 = arith.constant dense<0.000000e+00> : vector<8x32xf32>
      %157 = tpu.matmul %155, %156, %cst_83 {dimension_numbers = #tpu.dot_dimension_numbers<[1], [0], [0], [1], [0, 0, 1, 1], [], []>} : vector<8x32xbf16>, vector<32x32xbf16>, vector<8x32xf32> -> vector<8x32xf32>
      %c0_84 = arith.constant 0 : index
      %c0_85 = arith.constant 0 : index
      %158 = vector.load %arg11[%c0_84, %c0_85] : memref<1x32xf32, #tpu.memory_space<vmem>>, vector<1x32xf32>
      %159 = vector.broadcast %158 : vector<1x32xf32> to vector<8x32xf32>
      %160 = arith.addf %157, %159 : vector<8x32xf32>
      %161 = vector.shape_cast %160 : vector<8x32xf32> to vector<8x4x8xf32>
      %162 = tpu.transpose %161, [1, 0, 2] : vector<8x4x8xf32> -> vector<4x8x8xf32>
      %163 = arith.truncf %162 : vector<4x8x8xf32> to vector<4x8x8xbf16>
      %c0_86 = arith.constant 0 : index
      %c0_87 = arith.constant 0 : index
      %c0_88 = arith.constant 0 : index
      %164 = vector.load %arg22[%c0_86, %c0_87, %c0_88] : memref<4x8x8xbf16, #tpu.memory_space<vmem>>, vector<4x8x8xbf16>
      tpu.vector_store %arg22[%c0_86, %c0_87, %c0_88], %163 {strides = array<i32>} : memref<4x8x8xbf16, #tpu.memory_space<vmem>>, vector<4x8x8xbf16>,
    } else {
    }
    %c8_i32 = arith.constant 8 : i32
    %3 = arith.muli %arg1, %c8_i32 : i32
    %4 = tpu.assume_multiple %3, 8 : i32
    %c0 = arith.constant 0 : index
    %5 = arith.index_cast %4 : i32 to index
    %c0_1 = arith.constant 0 : index
    %6 = vector.load %arg2[%c0, %5, %c0_1] : memref<1x8x32xf32, #tpu.memory_space<vmem>>, vector<1x8x32xf32>
    %7 = vector.shape_cast %6 : vector<1x8x32xf32> to vector<8x32xf32>
    %8 = arith.index_cast %4 : i32 to index
    %c0_2 = arith.constant 0 : index
    %9 = vector.load %arg3[%8, %c0_2] : memref<8x32xf32, #tpu.memory_space<vmem>>, vector<8x32xf32>
    %10 = arith.addf %7, %9 : vector<8x32xf32>
    %cst = arith.constant dense<0.000000e+00> : vector<8xf32>
    %11 = vector.multi_reduction <add>, %10, %cst [1] : vector<8x32xf32> to vector<8xf32>
    %12 = vector.shape_cast %11 : vector<8xf32> to vector<8x1xf32>
    %cst_3 = arith.constant 3.200000e+01 : f32
    %13 = vector.broadcast %cst_3 : f32 to vector<8x1xf32>
    %14 = arith.divf %12, %13 : vector<8x1xf32>
    %15 = vector.broadcast %14 : vector<8x1xf32> to vector<8x32xf32>
    %16 = arith.subf %10, %15 : vector<8x32xf32>
    %17 = arith.mulf %16, %16 : vector<8x32xf32>
    %cst_4 = arith.constant dense<0.000000e+00> : vector<8xf32>
    %18 = vector.multi_reduction <add>, %17, %cst_4 [1] : vector<8x32xf32> to vector<8xf32>
    %19 = vector.shape_cast %18 : vector<8xf32> to vector<8x1xf32>
    %cst_5 = arith.constant 3.200000e+01 : f32
    %20 = vector.broadcast %cst_5 : f32 to vector<8x1xf32>
    %21 = arith.divf %19, %20 : vector<8x1xf32>
    %22 = vector.broadcast %14 : vector<8x1xf32> to vector<8x32xf32>
    %23 = arith.subf %10, %22 : vector<8x32xf32>
    %cst_6 = arith.constant 9.99999974E-6 : f32
    %24 = vector.broadcast %cst_6 : f32 to vector<8x1xf32>
    %25 = arith.addf %21, %24 : vector<8x1xf32>
    %26 = math.rsqrt %25 : vector<8x1xf32>
    %27 = vector.broadcast %26 : vector<8x1xf32> to vector<8x32xf32>
    %28 = arith.mulf %23, %27 : vector<8x32xf32>
    %c0_7 = arith.constant 0 : index
    %c0_8 = arith.constant 0 : index
    %29 = vector.load %arg4[%c0_7, %c0_8] : memref<1x32xf32, #tpu.memory_space<vmem>>, vector<1x32xf32>
    %30 = vector.broadcast %29 : vector<1x32xf32> to vector<8x32xf32>
    %31 = arith.mulf %28, %30 : vector<8x32xf32>
    %c0_9 = arith.constant 0 : index
    %c0_10 = arith.constant 0 : index
    %32 = vector.load %arg5[%c0_9, %c0_10] : memref<1x32xf32, #tpu.memory_space<vmem>>, vector<1x32xf32>
    %33 = vector.broadcast %32 : vector<1x32xf32> to vector<8x32xf32>
    %34 = arith.addf %31, %33 : vector<8x32xf32>
    %35 = arith.truncf %34 : vector<8x32xf32> to vector<8x32xbf16>
    %c0_11 = arith.constant 0 : index
    %c0_12 = arith.constant 0 : index
    %36 = vector.load %arg6[%c0_11, %c0_12] : memref<32x32xbf16, #tpu.memory_space<vmem>>, vector<32x32xbf16>
    %cst_13 = arith.constant dense<0.000000e+00> : vector<8x32xf32>
    %37 = tpu.matmul %35, %36, %cst_13 {dimension_numbers = #tpu.dot_dimension_numbers<[1], [0], [0], [1], [0, 0, 1, 1], [], []>} : vector<8x32xbf16>, vector<32x32xbf16>, vector<8x32xf32> -> vector<8x32xf32>
    %c0_14 = arith.constant 0 : index
    %c0_15 = arith.constant 0 : index
    %38 = vector.load %arg7[%c0_14, %c0_15] : memref<1x32xf32, #tpu.memory_space<vmem>>, vector<1x32xf32>
    %39 = vector.broadcast %38 : vector<1x32xf32> to vector<8x32xf32>
    %40 = arith.addf %37, %39 : vector<8x32xf32>
    %cst_16 = arith.constant 0.353553385 : f32
    %41 = vector.broadcast %cst_16 : f32 to vector<8x32xf32>
    %42 = arith.mulf %40, %41 : vector<8x32xf32>
    %43 = vector.shape_cast %42 : vector<8x32xf32> to vector<8x4x8xf32>
    %44 = tpu.transpose %43, [1, 0, 2] : vector<8x4x8xf32> -> vector<4x8x8xf32>
    %45 = arith.truncf %44 : vector<4x8x8xf32> to vector<4x8x8xbf16>
    %c0_17 = arith.constant 0 : index
    %c0_18 = arith.constant 0 : index
    %c0_19 = arith.constant 0 : index
    %46 = vector.load %arg21[%c0_17, %c0_18, %c0_19] : memref<4x8x8xbf16, #tpu.memory_space<vmem>>, vector<4x8x8xbf16>
    "tpu.trace_start"() <{level = 10 : i32, message = "hqd,hds->hqs"}> : () -> ()
    %cst_20 = arith.constant dense<0.000000e+00> : vector<4x8x8xf32>
    %47 = tpu.matmul %45, %46, %cst_20 {dimension_numbers = #tpu.dot_dimension_numbers<[2], [1], [1], [2], [0, 0, 0, 1, 1, 2], [0], [0]>} : vector<4x8x8xbf16>, vector<4x8x8xbf16>, vector<4x8x8xf32> -> vector<4x8x8xf32>
    "tpu.trace_stop"() : () -> ()
    %cst_21 = arith.constant dense<0xFF800000> : vector<4x8xf32>
    %48 = vector.multi_reduction <maximumf>, %47, %cst_21 [2] : vector<4x8x8xf32> to vector<4x8xf32>
    %49 = vector.shape_cast %48 : vector<4x8xf32> to vector<4x8x1xf32>
    %50 = vector.broadcast %49 : vector<4x8x1xf32> to vector<4x8x8xf32>
    %51 = arith.subf %47, %50 : vector<4x8x8xf32>
    %52 = math.exp %51 : vector<4x8x8xf32>
    %cst_22 = arith.constant dense<0.000000e+00> : vector<4x8xf32>
    %53 = vector.multi_reduction <add>, %52, %cst_22 [2] : vector<4x8x8xf32> to vector<4x8xf32>
    %54 = vector.shape_cast %53 : vector<4x8xf32> to vector<4x8x1xf32>
    %55 = tpu.reciprocal %54 {approx = true} : vector<4x8x1xf32> -> vector<4x8x1xf32>
    %56 = vector.broadcast %55 : vector<4x8x1xf32> to vector<4x8x8xf32>
    %57 = arith.mulf %52, %56 : vector<4x8x8xf32>
    %58 = arith.truncf %57 : vector<4x8x8xf32> to vector<4x8x8xbf16>
    %c0_23 = arith.constant 0 : index
    %c0_24 = arith.constant 0 : index
    %c0_25 = arith.constant 0 : index
    %59 = vector.load %arg22[%c0_23, %c0_24, %c0_25] : memref<4x8x8xbf16, #tpu.memory_space<vmem>>, vector<4x8x8xbf16>
    "tpu.trace_start"() <{level = 10 : i32, message = "hqs,hsd->hqd"}> : () -> ()
    %cst_26 = arith.constant dense<0.000000e+00> : vector<4x8x8xf32>
    %60 = tpu.matmul %58, %59, %cst_26 {dimension_numbers = #tpu.dot_dimension_numbers<[2], [1], [1], [2], [0, 0, 0, 1, 1, 2], [0], [0]>} : vector<4x8x8xbf16>, vector<4x8x8xbf16>, vector<4x8x8xf32> -> vector<4x8x8xf32>
    "tpu.trace_stop"() : () -> ()
    %61 = arith.truncf %60 : vector<4x8x8xf32> to vector<4x8x8xbf16>
    %c0_27 = arith.constant 0 : index
    %c0_28 = arith.constant 0 : index
    %c0_29 = arith.constant 0 : index
    %62 = vector.load %arg12[%c0_27, %c0_28, %c0_29] : memref<4x8x32xbf16, #tpu.memory_space<vmem>>, vector<4x8x32xbf16>
    "tpu.trace_start"() <{level = 10 : i32, message = "hqd,hde->hqe"}> : () -> ()
    %cst_30 = arith.constant dense<0.000000e+00> : vector<4x8x32xf32>
    %63 = tpu.matmul %61, %62, %cst_30 {dimension_numbers = #tpu.dot_dimension_numbers<[2], [1], [1], [2], [0, 0, 0, 1, 1, 2], [0], [0]>} : vector<4x8x8xbf16>, vector<4x8x32xbf16>, vector<4x8x32xf32> -> vector<4x8x32xf32>
    "tpu.trace_stop"() : () -> ()
    %cst_31 = arith.constant dense<0.000000e+00> : vector<8x32xf32>
    %64 = vector.multi_reduction <add>, %63, %cst_31 [0] : vector<4x8x32xf32> to vector<8x32xf32>
    %c0_32 = arith.constant 0 : index
    %c0_33 = arith.constant 0 : index
    %65 = vector.load %arg13[%c0_32, %c0_33] : memref<1x32xf32, #tpu.memory_space<vmem>>, vector<1x32xf32>
    %66 = vector.broadcast %65 : vector<1x32xf32> to vector<8x32xf32>
    %67 = arith.addf %64, %66 : vector<8x32xf32>
    %68 = arith.addf %10, %67 : vector<8x32xf32>
    %cst_34 = arith.constant dense<0.000000e+00> : vector<8xf32>
    %69 = vector.multi_reduction <add>, %68, %cst_34 [1] : vector<8x32xf32> to vector<8xf32>
    %70 = vector.shape_cast %69 : vector<8xf32> to vector<8x1xf32>
    %cst_35 = arith.constant 3.200000e+01 : f32
    %71 = vector.broadcast %cst_35 : f32 to vector<8x1xf32>
    %72 = arith.divf %70, %71 : vector<8x1xf32>
    %73 = vector.broadcast %72 : vector<8x1xf32> to vector<8x32xf32>
    %74 = arith.subf %68, %73 : vector<8x32xf32>
    %75 = arith.mulf %74, %74 : vector<8x32xf32>
    %cst_36 = arith.constant dense<0.000000e+00> : vector<8xf32>
    %76 = vector.multi_reduction <add>, %75, %cst_36 [1] : vector<8x32xf32> to vector<8xf32>
    %77 = vector.shape_cast %76 : vector<8xf32> to vector<8x1xf32>
    %cst_37 = arith.constant 3.200000e+01 : f32
    %78 = vector.broadcast %cst_37 : f32 to vector<8x1xf32>
    %79 = arith.divf %77, %78 : vector<8x1xf32>
    %80 = vector.broadcast %72 : vector<8x1xf32> to vector<8x32xf32>
    %81 = arith.subf %68, %80 : vector<8x32xf32>
    %cst_38 = arith.constant 9.99999974E-6 : f32
    %82 = vector.broadcast %cst_38 : f32 to vector<8x1xf32>
    %83 = arith.addf %79, %82 : vector<8x1xf32>
    %84 = math.rsqrt %83 : vector<8x1xf32>
    %85 = vector.broadcast %84 : vector<8x1xf32> to vector<8x32xf32>
    %86 = arith.mulf %81, %85 : vector<8x32xf32>
    %c0_39 = arith.constant 0 : index
    %c0_40 = arith.constant 0 : index
    %87 = vector.load %arg14[%c0_39, %c0_40] : memref<1x32xf32, #tpu.memory_space<vmem>>, vector<1x32xf32>
    %88 = vector.broadcast %87 : vector<1x32xf32> to vector<8x32xf32>
    %89 = arith.mulf %86, %88 : vector<8x32xf32>
    %c0_41 = arith.constant 0 : index
    %c0_42 = arith.constant 0 : index
    %90 = vector.load %arg15[%c0_41, %c0_42] : memref<1x32xf32, #tpu.memory_space<vmem>>, vector<1x32xf32>
    %91 = vector.broadcast %90 : vector<1x32xf32> to vector<8x32xf32>
    %92 = arith.addf %89, %91 : vector<8x32xf32>
    %93 = arith.truncf %92 : vector<8x32xf32> to vector<8x32xbf16>
    %c0_43 = arith.constant 0 : index
    %c0_44 = arith.constant 0 : index
    %94 = vector.load %arg16[%c0_43, %c0_44] : memref<32x64xbf16, #tpu.memory_space<vmem>>, vector<32x64xbf16>
    %cst_45 = arith.constant dense<0.000000e+00> : vector<8x64xf32>
    %95 = tpu.matmul %93, %94, %cst_45 {dimension_numbers = #tpu.dot_dimension_numbers<[1], [0], [0], [1], [0, 0, 1, 1], [], []>} : vector<8x32xbf16>, vector<32x64xbf16>, vector<8x64xf32> -> vector<8x64xf32>
    %c0_46 = arith.constant 0 : index
    %c0_47 = arith.constant 0 : index
    %96 = vector.load %arg17[%c0_46, %c0_47] : memref<1x64xf32, #tpu.memory_space<vmem>>, vector<1x64xf32>
    %97 = vector.broadcast %96 : vector<1x64xf32> to vector<8x64xf32>
    %98 = arith.addf %95, %97 : vector<8x64xf32>
    %cst_48 = arith.constant 5.000000e-01 : f32
    %99 = vector.broadcast %cst_48 : f32 to vector<8x64xf32>
    %100 = arith.mulf %99, %98 : vector<8x64xf32>
    %cst_49 = arith.constant 0.707106769 : f32
    %101 = vector.broadcast %cst_49 : f32 to vector<8x64xf32>
    %102 = arith.mulf %98, %101 : vector<8x64xf32>
    %103 = math.erf %102 : vector<8x64xf32>
    %cst_50 = arith.constant 1.000000e+00 : f32
    %104 = vector.broadcast %cst_50 : f32 to vector<8x64xf32>
    %105 = arith.addf %104, %103 : vector<8x64xf32>
    %106 = arith.mulf %100, %105 : vector<8x64xf32>
    %107 = arith.truncf %106 : vector<8x64xf32> to vector<8x64xbf16>
    %c0_51 = arith.constant 0 : index
    %c0_52 = arith.constant 0 : index
    %108 = vector.load %arg18[%c0_51, %c0_52] : memref<64x32xbf16, #tpu.memory_space<vmem>>, vector<64x32xbf16>
    %cst_53 = arith.constant dense<0.000000e+00> : vector<8x32xf32>
    %109 = tpu.matmul %107, %108, %cst_53 {dimension_numbers = #tpu.dot_dimension_numbers<[1], [0], [0], [1], [0, 0, 1, 1], [], []>} : vector<8x64xbf16>, vector<64x32xbf16>, vector<8x32xf32> -> vector<8x32xf32>
    %c0_54 = arith.constant 0 : index
    %c0_55 = arith.constant 0 : index
    %110 = vector.load %arg19[%c0_54, %c0_55] : memref<1x32xf32, #tpu.memory_space<vmem>>, vector<1x32xf32>
    %111 = vector.broadcast %110 : vector<1x32xf32> to vector<8x32xf32>
    %112 = arith.addf %109, %111 : vector<8x32xf32>
    %113 = arith.addf %68, %112 : vector<8x32xf32>
    %c0_56 = arith.constant 0 : index
    %c0_57 = arith.constant 0 : index
    %c0_58 = arith.constant 0 : index
    %114 = vector.load %arg20[%c0_56, %c0_57, %c0_58] : memref<1x8x32xf32, #tpu.memory_space<vmem>>, vector<1x8x32xf32>
    %115 = vector.shape_cast %114 : vector<1x8x32xf32> to vector<8x32xf32>
    %116 = vector.shape_cast %113 : vector<8x32xf32> to vector<1x8x32xf32>
    tpu.vector_store %arg20[%c0_56, %c0_57, %c0_58], %116 {strides = array<i32>} : memref<1x8x32xf32, #tpu.memory_space<vmem>>, vector<1x8x32xf32>,
    return
  }
  func.func @transform_0(%arg0: i32, %arg1: i32) -> (i32, i32, i32) {
    %c0_i32 = arith.constant 0 : i32
    %c0_i32_0 = arith.constant 0 : i32
    %c0_i32_1 = arith.constant 0 : i32
    return %arg0, %c0_i32, %c0_i32_0 : i32, i32, i32
  }
  func.func @transform_1(%arg0: i32, %arg1: i32) -> (i32, i32) {
    %c0_i32 = arith.constant 0 : i32
    %c0_i32_0 = arith.constant 0 : i32
    %c0_i32_1 = arith.constant 0 : i32
    return %c0_i32, %c0_i32_0 : i32, i32
  }
  func.func @transform_2(%arg0: i32, %arg1: i32) -> (i32, i32) {
    %c0_i32 = arith.constant 0 : i32
    %c0_i32_0 = arith.constant 0 : i32
    %c0_i32_1 = arith.constant 0 : i32
    return %c0_i32, %c0_i32_0 : i32, i32
  }
  func.func @transform_3(%arg0: i32, %arg1: i32) -> (i32, i32) {
    %c0_i32 = arith.constant 0 : i32
    %c0_i32_0 = arith.constant 0 : i32
    %c0_i32_1 = arith.constant 0 : i32
    return %c0_i32, %c0_i32_0 : i32, i32
  }
  func.func @transform_4(%arg0: i32, %arg1: i32) -> (i32, i32) {
    %c0_i32 = arith.constant 0 : i32
    %c0_i32_0 = arith.constant 0 : i32
    %c0_i32_1 = arith.constant 0 : i32
    return %c0_i32, %c0_i32_0 : i32, i32
  }
  func.func @transform_5(%arg0: i32, %arg1: i32) -> (i32, i32) {
    %c0_i32 = arith.constant 0 : i32
    %c0_i32_0 = arith.constant 0 : i32
    %c0_i32_1 = arith.constant 0 : i32
    return %c0_i32, %c0_i32_0 : i32, i32
  }
  func.func @transform_6(%arg0: i32, %arg1: i32) -> (i32, i32) {
    %c0_i32 = arith.constant 0 : i32
    %c0_i32_0 = arith.constant 0 : i32
    %c0_i32_1 = arith.constant 0 : i32
    return %c0_i32, %c0_i32_0 : i32, i32
  }
  func.func @transform_7(%arg0: i32, %arg1: i32) -> (i32, i32) {
    %c0_i32 = arith.constant 0 : i32
    %c0_i32_0 = arith.constant 0 : i32
    %c0_i32_1 = arith.constant 0 : i32
    return %c0_i32, %c0_i32_0 : i32, i32
  }
  func.func @transform_8(%arg0: i32, %arg1: i32) -> (i32, i32) {
    %c0_i32 = arith.constant 0 : i32
    %c0_i32_0 = arith.constant 0 : i32
    %c0_i32_1 = arith.constant 0 : i32
    return %c0_i32, %c0_i32_0 : i32, i32
  }
  func.func @transform_9(%arg0: i32, %arg1: i32) -> (i32, i32) {
    %c0_i32 = arith.constant 0 : i32
    %c0_i32_0 = arith.constant 0 : i32
    %c0_i32_1 = arith.constant 0 : i32
    return %c0_i32, %c0_i32_0 : i32, i32
  }
  func.func @transform_10(%arg0: i32, %arg1: i32) -> (i32, i32, i32) {
    %c0_i32 = arith.constant 0 : i32
    %c0_i32_0 = arith.constant 0 : i32
    %c0_i32_1 = arith.constant 0 : i32
    %c0_i32_2 = arith.constant 0 : i32
    return %c0_i32, %c0_i32_0, %c0_i32_1 : i32, i32, i32
  }
  func.func @transform_11(%arg0: i32, %arg1: i32) -> (i32, i32) {
    %c0_i32 = arith.constant 0 : i32
    %c0_i32_0 = arith.constant 0 : i32
    %c0_i32_1 = arith.constant 0 : i32
    return %c0_i32, %c0_i32_0 : i32, i32
  }
  func.func @transform_12(%arg0: i32, %arg1: i32) -> (i32, i32) {
    %c0_i32 = arith.constant 0 : i32
    %c0_i32_0 = arith.constant 0 : i32
    %c0_i32_1 = arith.constant 0 : i32
    return %c0_i32, %c0_i32_0 : i32, i32
  }
  func.func @transform_13(%arg0: i32, %arg1: i32) -> (i32, i32) {
    %c0_i32 = arith.constant 0 : i32
    %c0_i32_0 = arith.constant 0 : i32
    %c0_i32_1 = arith.constant 0 : i32
    return %c0_i32, %c0_i32_0 : i32, i32
  }
  func.func @transform_14(%arg0: i32, %arg1: i32) -> (i32, i32) {
    %c0_i32 = arith.constant 0 : i32
    %c0_i32_0 = arith.constant 0 : i32
    %c0_i32_1 = arith.constant 0 : i32
    return %c0_i32, %c0_i32_0 : i32, i32
  }
  func.func @transform_15(%arg0: i32, %arg1: i32) -> (i32, i32) {
    %c0_i32 = arith.constant 0 : i32
    %c0_i32_0 = arith.constant 0 : i32
    %c0_i32_1 = arith.constant 0 : i32
    return %c0_i32, %c0_i32_0 : i32, i32
  }
  func.func @transform_16(%arg0: i32, %arg1: i32) -> (i32, i32) {
    %c0_i32 = arith.constant 0 : i32
    %c0_i32_0 = arith.constant 0 : i32
    %c0_i32_1 = arith.constant 0 : i32
    return %c0_i32, %c0_i32_0 : i32, i32
  }
  func.func @transform_17(%arg0: i32, %arg1: i32) -> (i32, i32) {
    %c0_i32 = arith.constant 0 : i32
    %c0_i32_0 = arith.constant 0 : i32
    %c0_i32_1 = arith.constant 0 : i32
    return %c0_i32, %c0_i32_0 : i32, i32
  }
  func.func @transform_18(%arg0: i32, %arg1: i32) -> (i32, i32, i32) {
    %c0_i32 = arith.constant 0 : i32
    %c0_i32_0 = arith.constant 0 : i32
    return %arg0, %arg1, %c0_i32 : i32, i32, i32
  }
}

</mosaic_0001>

<bundles_post_ra>
// kernel: tpu_custom_call.1
= control target key start
LH: loop header
LB: loop body
LE: loop exit
PB: predicated region body
PF: predicated region fallthrough
CT: control target
= control target key end

     0   :  { %s3331_s0 = inlined_call_operand.vmem [shape: f32[2,8,32], index: 0, kind: input, shape index: {}]   ;;  %s3332_s1 = inlined_call_operand.hbm [shape: f32[8,32], index: 1, kind: input, shape index: {}]   ;;  %s3333_s2 = inlined_call_operand.vmem [shape: f32[1,32], index: 2, kind: input, shape index: {}]   ;;  %s3334_s3 = inlined_call_operand.hbm [shape: f32[1,32], index: 3, kind: input, shape index: {}]   ;;  %s3335_s4 = inlined_call_operand.vmem [shape: bf16[32,32], index: 4, kind: input, shape index: {}]   ;;  %s3336_s5 = inlined_call_operand.hbm [shape: f32[1,32], index: 5, kind: input, shape index: {}]   ;;  %s3337_s6 = inlined_call_operand.vmem [shape: bf16[32,32], index: 6, kind: input, shape index: {}]   ;;  %s3338_s7 = inlined_call_operand.vmem [shape: f32[32,1], index: 7, kind: input, shape index: {}]   ;;  %s3339_s8 = inlined_call_operand.vmem [shape: bf16[32,32], index: 8, kind: input, shape index: {}]   ;;  %s3340_s9 = inlined_call_operand.hbm [shape: f32[1,32], index: 9, kind: input, shape index: {}]   ;;  %s3341_s10 = inlined_call_operand.vmem [shape: bf16[4,8,32], index: 10, kind: input, shape index: {}]   ;;  %s3342_s11 = inlined_call_operand.vmem [shape: f32[1,32], index: 11, kind: input, shape index: {}]   ;;  %s3343_s12 = inlined_call_operand.vmem [shape: f32[1,32], index: 12, kind: input, shape index: {}]   ;;  %s3344_s13 = inlined_call_operand.vmem [shape: f32[1,32], index: 13, kind: input, shape index: {}]   ;;  %s3345_s14 = inlined_call_operand.vmem [shape: bf16[32,64], index: 14, kind: input, shape index: {}]   ;;  %s3346_s15 = inlined_call_operand.vmem [shape: f32[1,64], index: 15, kind: input, shape index: {}]   ;;  %s3347_s16 = inlined_call_operand.vmem [shape: bf16[64,32], index: 16, kind: input, shape index: {}]   ;;  %s3348_s17 = inlined_call_operand.vmem [shape: f32[1,32], index: 17, kind: input, shape index: {}]   ;;  %s3349_s18 = inlined_call_operand.hbm [shape: f32[2,8,32], index: 18, kind: output, shape index: {}]  }
   0x1   :  { %3361 = sst [smem:[#allocation24_spill]] %s3331_s0 }
   0x2   :  { %3362 = sst [smem:[#allocation25_spill]] %s3332_s1 }
   0x3   :  { %3363 = sst [smem:[#allocation26_spill]] %s3333_s2 }
   0x4   :  { %3364 = sst [smem:[#allocation27_spill]] %s3334_s3 }
   0x5   :  { %23 = vsyncpa [#allocation5], 0 }
   0x6   :  { %24 = vsyncpa [#allocation8], 0 }
   0x7   :  { %25 = vsyncpa [#allocation11], 0 }
   0x8   :  { %26 = vsyncpa [#allocation6], 0 }
   0x9   :  { %28 = vsyncpa [#allocation6 + $0x1], 0  ;;  %s2902_s27 = smov 0   ;;  %s2904_s28 = smov 0  }
   0xa   :  { %s2906_s29 = smov 0   ;;  %s2908_s30 = smov 0  }
   0xb   :  { %s2910_s0 = smov 0   ;;  %s2912_s19 = smov 0  }
   0xc LB: > { %3365 = sst [smem:[#allocation17_spill]] %s2772_s27  ;;  %s2236_s1 = sadd.s32 4294967295, %s2792_s19   ;;  %s2792_s19 = sphi %s2912_s19, %s34_s19   ;;  %s2788_s0 = sphi %s2910_s0, %s3391_s0   ;;  %s2784_s30 = sphi %s2908_s30, %s3390_s30   ;;  %s2780_s29 = sphi %s2906_s29, %s3389_s29   ;;  %s2776_s28 = sphi %s2904_s28, %s3393_s28   ;;  %s2772_s27 = sphi %s2902_s27, %s3392_s27  }
   0xd   : > { %3366 = sst [smem:[#allocation18_spill]] %s2780_s29  ;;  %s2237_s20 = sadd.s32 4294967294, %s2792_s19  }
   0xe   : > { %3367 = sst [smem:[#allocation19_spill]] %s2788_s0  ;;  %s46_s21 = sadd.s32 1, %s2788_s0 }
   0xf   : > { %3368 = sst [smem:[#allocation20_spill]] %s2792_s19  ;;  %s438_s22 = sadd.s32 1, %s2780_s29 }
  0x10   : > { %p48_p0 = scmp.ge.s32.totalorder %s46_s21, 2  ;;  %p448_p1 = scmp.ne.s32.totalorder %s2780_s29, %s2776_s28 }
  0x11   : > { %p449_p2 = scmp.eq.s32.totalorder %s2236_s1, 1  ;;  %p454_p3 = scmp.ne.s32.totalorder %s2776_s28, %s2772_s27 }
  0x12   : > { %s3395_s21 = smov (%p48_p0, %s46_s21), 0  ;;  %p455_p5 = scmp.eq.s32.totalorder %s2237_s20, 1 }
  0x13   : > { %3369 = sst [smem:[#allocation21_spill]] %s3395_s21  ;;  %p2942_p4 = por %p449_p2, %p448_p1 }
  0x14   : > { %s433_s23 = ssub.s32 %s2788_s0, %s3395_s21  ;;  %p2238_p6 = scmp.ge.s32.totalorder %s2792_s19, 1 }
  0x15   : > { %s3370_s2 = scalar_select %p2942_p4, 1, 0 }
  0x16   : > { %p436_p7 = scmp.eq.s32.totalorder %s433_s23, 0  ;;  %p2949_p8 = por %p455_p5, %p454_p3 }
  0x17   : > { %p462_p9 = scmp.lt.s32.totalorder %s2792_s19, 3  ;;  %p2961_p11 = scmp.eq.s32.totalorder %s2236_s1, 0 }
  0x18   : > { %s3371_s24 = scalar_select %p2949_p8, 1, 0 }
  0x19   : > { %s2955_s25 = scalar_select %p436_p7, %s2780_s29, %s438_s22  }
  0x1a   : > { %3372 = sst [smem:[#allocation22_spill]] %s3371_s24  ;;  %p2957_p10 = pnand %p2238_p6, %p462_p9 }
  0x1b   : > { %3373 = sst [smem:[#allocation23_spill]] %s2955_s25  ;;  %s2794_s20 = smov [#allocation7]  }
  0x1c   : > { %s3374_s26 = scalar_select %p2957_p10, 1, 0 }
  0x1d   : > { %s3375_s27 = scalar_select %p2961_p11, 1, 0 }
  0x1e   : > { %p2476_p12 = pneg %p2957_p10  ;;  %s489_s23 = sshll.u32 %s2794_s20, 4  ;;  %s490_s23 = int_to_ptr.vmem [resolvable:$true] %s489_s23 }
  0x1f   : > { %s2795_s22 = smov [#allocation4]   ;;  %s2611_s1 = scalar_lea.vmem %s490_s23, 16 }
  0x20   : > { %p2969_p13 = pnand %p2961_p11, %p2476_p12  ;;  %s475_s0 = sshll.u32 %s2795_s22, 4  ;;  %s476_s0 = int_to_ptr.vmem [resolvable:$true] %s475_s0 }
  0x21   : > { %p2612_p1 = scmp.ne.s32.totalorder %s490_s23, %s2611_s1  ;;  %s2618_s20 = scalar_lea.vmem %s490_s23, 32 }
  0x22   : > { %p2602_p0 = pneg %p2969_p13  ;;  %p2619_p5 = scmp.lt.s32.totalorder %s490_s23, %s490_s23 }
  0x23   : > { %p2620_p6 = scmp.lt.s32.totalorder %s2618_s20, %s2611_s1 }
  0x24   : > { %p2614_p2 = pnand %p2612_p1, %p2602_p0 }
  0x25   : > { %p2621_p7 = por %p2620_p6, %p2619_p5 }
  0x26   : > { %p2615_p3 = pneg %p2614_p2 }
  0x28   : > { %p2622_p9 = pnand %p2621_p7, %p2615_p3 }
  0x2a   : > { %2625 = shalt.err (!%p2622_p9)
}
  0x2b   : > { %s3377_s3 = sld [smem:[#allocation27_spill]]  ;;  %s2637_s22 = scalar_lea.vmem %s476_s0, 128 }
  0x2c   : > { %p2638_p12 = scmp.ne.s32.totalorder %s476_s0, %s2637_s22  ;;  %p2645_p2 = scmp.lt.s32.totalorder %s476_s0, %s476_s0 }
  0x2d   : > { %p2646_p4 = scmp.lt.s32.totalorder %s2637_s22, %s2637_s22 }
  0x2e   : > { %p2640_p8 = pnand %p2638_p12, %p2602_p0 }
  0x2f   : > { %p2647_p11 = por %p2646_p4, %p2645_p2 }
  0x30   : > { %p2641_p1 = pneg %p2640_p8 }
  0x31   : > { %2482 = dma.hbm_to_vmem [thread:$0]  (!%p2969_p13), %s3377_s3, 16, %s490_s23, [#allocation8]  }
  0x32   : > { %p2648_p10 = pnand %p2647_p11, %p2641_p1 }
  0x34   : > { %2651 = shalt.err (!%p2648_p10)
}
  0x35   : > { %s3378_s24 = sld [smem:[#allocation25_spill]]  ;;  %s2796_s29 = smov [#allocation9]  }
  0x36   : > { %s503_s25 = sshll.u32 %s2796_s29, 4  ;;  %s2797_s23 = smov [#allocation10]   ;;  %s504_s25 = int_to_ptr.vmem [resolvable:$true] %s503_s25 }
  0x37   : > { %s523_s3 = sshll.u32 %s2797_s23, 4  ;;  %s2663_s19 = scalar_lea.vmem %s504_s25, 16  ;;  %s524_s3 = int_to_ptr.vmem [resolvable:$true] %s523_s3 }
  0x38   : > { %p2664_p3 = scmp.ne.s32.totalorder %s504_s25, %s2663_s19  ;;  %s2670_s22 = scalar_lea.vmem %s504_s25, 32 }
  0x39   : > { %p2671_p10 = scmp.lt.s32.totalorder %s504_s25, %s504_s25  ;;  %p2672_p11 = scmp.lt.s32.totalorder %s2670_s22, %s2663_s19 }
  0x3a   : > { %p2666_p8 = pnand %p2664_p3, %p2602_p0 }
  0x3b   : > { %2479 = dma.hbm_to_vmem [thread:$0]  (!%p2969_p13), %s3378_s24, 128, %s476_s0, [#allocation5]  }
  0x3c   : > { %p2667_p4 = pneg %p2666_p8  ;;  %p2673_p5 = por %p2672_p11, %p2671_p10 }
  0x3e   : > { %p2674_p6 = pnand %p2673_p5, %p2667_p4 }
  0x40   : > { %2677 = shalt.err (!%p2674_p6)
}
  0x41   : > { %2485 = dma.hbm_to_vmem [thread:$0]  (!%p2969_p13), %s3336_s5, 16, %s504_s25, [#allocation8]  }
  0x42   : > { %s2689_s1 = scalar_lea.vmem %s524_s3, 16  ;;  %s2696_s20 = scalar_lea.vmem %s524_s3, 32 }
  0x43   : > { %p2690_p7 = scmp.ne.s32.totalorder %s524_s3, %s2689_s1  ;;  %p2697_p1 = scmp.lt.s32.totalorder %s524_s3, %s524_s3 }
  0x44   : > { %p2698_p2 = scmp.lt.s32.totalorder %s2696_s20, %s2689_s1 }
  0x45   : > { %p2692_p9 = pnand %p2690_p7, %p2602_p0 }
  0x46   : > { %p2699_p3 = por %p2698_p2, %p2697_p1 }
  0x47   : > { %p2693_p12 = pneg %p2692_p9 }
  0x49   : > { %p2700_p8 = pnand %p2699_p3, %p2693_p12 }
  0x4b   : > { %2703 = shalt.err (!%p2700_p8)
}
  0x4c   : > { %2488 = dma.hbm_to_vmem [thread:$0]  (!%p2969_p13), %s3340_s9, 16, %s524_s3, [#allocation11]  }
  0x4d   : > { %p3379_p4 = scmp.ne.s32.totalorder %s3374_s26, 0 }
  0x4e   : > { %p3380_p10 = scmp.ne.s32.totalorder (!%p3379_p4), %s3375_s27, 0 }
  0x4f   : > { %567 = sbr.rel (%p3379_p4) target bundleno = 2422 (0x976), region = 92 }
  0x54   : > { %2755 = dma.done.wait (%p3380_p10), [#allocation5], 128  }
  0x55   : > { %2757 = vsyncadd (%p3380_p10), [#allocation5], 4294967168 }
  0x56   : > { %2759 = dma.done.wait (%p3380_p10), [#allocation8], 32  }
  0x57   : > { %2761 = vsyncadd (%p3380_p10), [#allocation8], 4294967264 }
  0x58   : > { %2763 = dma.done.wait (%p3380_p10), [#allocation11], 16  }
  0x59   : > { %2765 = vsyncadd (%p3380_p10), [#allocation11], 4294967280  ;;  %p632_p13 = scmp.lt.s32.totalorder %s2784_s30, 1  ;;  %s3381_s23 = sld [smem:[#allocation24_spill]]  ;;  %vm644_vm0 = vcmask 261120   ;;  %v1036_v1 = vld [vmem:[#allocation4] sm:$0xff]  ;;  %v893_v61 = vlaneseq }
  0x5a   : > { %v2564_v14 = vld [vmem:[%s3335_s4 + $0x8] sm:$0xff]   ;;  %v2798_v15 = vmov 0.0   ;;  %vm2799_vm1 = vmmov 0   ;;  %v2565_v16 = vld [vmem:[%s3335_s4] sm:$0xff]   ;;  %s3382_s29 = sld [smem:[#allocation26_spill]]  ;;  %v2800_v36 = vmov 0  }
  0x5b   : > { %s633_s3 = scalar_select %p632_p13, %s2784_s30, 1  ;;  %2358 = vmatprep.subr.bf16.mxu0 %v2798_v15  ;;  %2362 = vmatprep.mubr.msk.bf16.mxu0 %vm2799_vm1, %v2798_v15  ;;  %v2264_v26 = vld [vmem:[#allocation7] ss:$0 sm:$0xff]  ;;  %v2566_v34 = vld [vmem:[%s3337_s6] sm:$0xff]   ;;  %v2265_v47 = vld [vmem:[#allocation9] ss:$0 sm:$0xff] }
  0x5c   : > { %2359 = vmatpush3.bf16.msra.mxu0 %v2564_v14  ;;  %2346 = vmatprep.mubr.msk.bf16.mxu1 %vm644_vm0, %v2566_v34  ;;  %v713_v35 = vld [vmem:[%s3338_s7] sm:$0xff]  ;;  %v2567_v43 = vld [vmem:[%s3337_s6 + $0x8] sm:$0xff]   ;;  %s2801_s20 = smov 120   ;;  %s2802_s19 = smov 112   ;;  %v715_v55 = vld [vmem:[%s3338_s7 + $0x10] sm:$0xff]  ;;  %vm806_vm2 = vcmask 60416  }
  0x5d   : > { %s2250_s21 = sshll.u32 %s633_s3, 3  ;;  %2360 = vmatprep.subr.bf16.mxu0 %v2798_v15  ;;  %2562 = vset.pattern.permute.xlu1 %v2800_v36  ;;  %v2568_v44 = vld [vmem:[%s3339_s8 + $0x8] sm:$0xff]   ;;  %v2569_v45 = vld [vmem:[%s3339_s8] sm:$0xff]   ;;  %v716_v56 = vld [vmem:[%s3338_s7 + $0x18] sm:$0xff]  ;;  %v2804_v59 = vmov 1983009808  }
  0x5e   : > { %v714_v54 = vld [vmem:[%s3338_s7 + $0x8] sm:$0xff]  ;;  %v891_v60 = vunpack.c.l.s4 %v2804_v59  ;;  %vm1295_vm3 = vcmask 1043456   ;;  %vm1291_vm4 = vcmask 64512   ;;  %vm2062_vm5 = vcmask 523264   ;;  %s629_s24 = sand.u32 1, %s2776_s28   ;;  %p3383_p11 = scmp.ne.s32.totalorder %s3370_s2, 0 }
  0x5f   : > { %s635_s22 = scalar_lea.vmem %s3381_s23, %s2250_s21  ;;  %s2249_s1 = sshll.u32 %s629_s24, 3 }
  0x60   : > { %v1034_v0 = vld [vmem:[%s635_s22] sm:$0xff]  ;;  %2361 = vmatpush3.bf16.msra.mxu0 %v2565_v16  ;;  %v892_v63 = vunpack.c.0.s8 %v891_v60  ;;  %s631_s3 = scalar_lea.vmem [#allocation12], %s2249_s1  ;;  %s2806_s27 = smov [#allocation12]  }
  0x61   : > { %v3026_v2 = vadd.f32 %v1036_v1, %v1034_v0  ;;  %2372 = vmatprep.subr.bf16.mxu0 %v2798_v15  ;;  %v2263_v24 = vld [vmem:[%s3382_s29] ss:$0 sm:$0xff]  ;;  %s2803_s29 = smov 104   ;;  %v894_v0 = vshrl.u32 %v893_v61, 7  ;;  %s2123_s21 = sshll.u32 %s631_s3, 4  ;;  %s3286_s21 = int_to_ptr.vmem [resolvable:$true] %s2123_s21 }
  0x62   : > { %s2704_s22 = scalar_lea.vmem %s3286_s21, 128  ;;  %s2708_s0 = sshll.u32 %s2806_s27, 4  ;;  %s2709_s0 = int_to_ptr.vmem [resolvable:$false] %s2708_s0 }
  0x63   : > { %v1039_v3 = vsel %vm644_vm0, %v3026_v2, 0.0  ;;  %p2705_p0 = scmp.ne.s32.totalorder %s3286_s21, %s2704_s22  ;;  %s2710_s1 = scalar_lea.vmem %s2709_s0, 256 }
  0x64   : > { %1040 = vadd.xlane.f32.xlu0 %v1039_v3  ;;  %p2711_p7 = scmp.lt.s32.totalorder %s3286_s21, %s2709_s0  ;;  %p2712_p9 = scmp.lt.s32.totalorder %s2710_s1, %s2704_s22 }
  0x65   : > { %p2706_p5 = pnand %p2705_p0, %p3383_p11 }
  0x66   : > { %p2713_p12 = por %p2712_p9, %p2711_p7 }
  0x67   : > { %p2707_p6 = pneg %p2706_p5 }
  0x68   : > { %646 = vadd.xlane.f32.xlu0 %v1039_v3  ;;  %v2805_v3 = vmov 1934713408  }
  0x69   : > { %p2714_p1 = pnand %p2713_p12, %p2707_p6 }
  0xed   : > { %v1041_v4 = vpop.xlane.xlu0 %1040 }
  0xee   : > { %v1043_v5 = vmul.f32 0.03125, %v1041_v4  ;;  %v923_v4 = vunpack.c.l.s4 %v2805_v3 }
  0xf0   : > { %v1044_v6 = vsub.f32 %v3026_v2, %v1043_v5 }
  0xf1   : > { %v647_v7 = vpop.xlane.xlu0 %646 }
  0xf2   : > { %v649_v8 = vmul.f32 0.03125, %v647_v7  ;;  %v1045_v9 = vmul.f32 %v1044_v6, %v1044_v6  ;;  %v3088_v7 = vsub.s32 %v892_v63, %v894_v0 }
  0xf4   : > { %v650_v10 = vsub.f32 %v3026_v2, %v649_v8  ;;  %v1046_v11 = vsel %vm644_vm0, %v1045_v9, 0.0 }
  0xf5   : > { %1047 = vadd.xlane.f32.xlu1 %v1046_v11 }
  0xf6   : > { %v651_v12 = vmul.f32 %v650_v10, %v650_v10 }
  0xf8   : > { %v652_v13 = vsel %vm644_vm0, %v651_v12, 0.0 }
  0xf9   : > { %653 = vadd.xlane.f32.xlu1 %v652_v13 }
 0x10a   : > { %719 = vperm.xlu1 %2562, %v713_v35  }
 0x17e   : > { %v1048_v17 = vpop.xlane.xlu1 %1047 }
 0x17f   : > { %v1049_v18 = vmul.f32 0.03125, %v1048_v17 }
 0x181   : > { %v1050_v19 = vadd.f32 1e-05, %v1049_v18 }
 0x182   : > { %v654_v20 = vpop.xlane.xlu1 %653 }
 0x183   : > { %2576 = vrsqrt.f32 %v1050_v19  ;;  %v655_v21 = vmul.f32 0.03125, %v654_v20 }
 0x185   : > { %v656_v22 = vadd.f32 1e-05, %v655_v21 }
 0x186   : > { %v720_v57 = vpop.permute.xlu1 %719 }
 0x187   : > { %2578 = vrsqrt.f32 %v656_v22 }
 0x190   : > { %v2577_v23 = vpop.eup %2576 }
 0x191   : > { %v1052_v25 = vmul.f32 %v2577_v23, %v1044_v6 }
 0x193   : > { %v1060_v27 = vmul.f32 %v2263_v24, %v1052_v25 }
 0x194   : > { %v2579_v28 = vpop.eup %2578 }
 0x195   : > { %v1068_v29 = vadd.f32 %v2264_v26, %v1060_v27  ;;  %v658_v30 = vmul.f32 %v2579_v28, %v650_v10  ;;  %v924_v10 = vunpack.c.0.s8 %v923_v4 }
 0x197   : > { %v1069_v31 = vpack.c.bf16 %v1068_v29, %v1068_v29  ;;  %v666_v32 = vmul.f32 %v2263_v24, %v658_v30  ;;  %v3094_v16 = vsub.s32 %v924_v10, %v894_v0 }
 0x199   : > { %2363 = vmatmul.mubr.msk.bf16.vlgmr.msra.gmra.mxu0 %vm644_vm0, %v1069_v31  ;;  %v674_v33 = vadd.f32 %v2264_v26, %v666_v32 }
 0x19a   : > { %2374 = vmatprep.mubr.msk.bf16.mxu0 %vm2799_vm1, %v2798_v15 }
 0x19b   : > { %675 = vxpose.xlu0.b32.start.end [1/1] (short) (narrow) %v674_v33, 32  ;;  %v811_v46 = vpack.c.bf16 %v674_v33, %v674_v33 }
 0x1c4   : > { %2563 = vset.pattern.permute.xlu0 %v2800_v36 }
 0x217   : > { %v691_v37 = vpop.trf.xlu0 }
 0x21b   : > { %v692_v38 = vpop.trf.xlu0 }
 0x21c   : > { %v707_v42 = vpack.c.bf16 %v692_v38, %v691_v37 }
 0x21f   : > { %v693_v39 = vpop.trf.xlu0 }
 0x223   : > { %v694_v40 = vpop.trf.xlu0 }
 0x224   : > { %v708_v41 = vpack.c.bf16 %v694_v40, %v693_v39 }
 0x226   : > { %2342 = vmatprep.subr.bf16.mxu1 %v708_v41 }
 0x227   : > { %2343 = vmatpush3.bf16.msra.mxu1 %v708_v41 }
 0x228   : > { %2344 = vmatprep.subr.bf16.mxu1 %v707_v42 }
 0x22b   : > { %2345 = vmatpush3.bf16.msra.mxu1 %v707_v42 }
 0x22c   : > { %2350 = vmatprep.subr.bf16.mxu1 %v2798_v15 }
 0x22e   : > { %2347 = vmatmul.mubr.msk.bf16.vlgmr.msra.gmra.mxu1 %vm644_vm0, %v2567_v43 }
 0x22f   : > { %2351 = vmatpush3.bf16.msra.mxu1 %v2568_v44  ;;  %2354 = vmatprep.mubr.msk.bf16.mxu1 %vm2799_vm1, %v2798_v15 }
 0x230   : > { %2352 = vmatprep.subr.bf16.mxu1 %v2798_v15 }
 0x233   : > { %2353 = vmatpush3.bf16.msra.mxu1 %v2569_v45 }
 0x234   : > { %2366 = vmatprep.subr.bf16.mxu1 %v2798_v15 }
 0x236   : > { %2355 = vmatmul.mubr.msk.bf16.vlgmr.msra.gmra.mxu1 %vm644_vm0, %v811_v46 }
 0x237   : > { %2368 = vmatprep.mubr.msk.bf16.mxu1 %vm2799_vm1, %v2798_v15 }
 0x259   : > { %v1130_v48 = vpop.f32.mrf.mxu0 }
 0x25a   : > { %v1131_v49 = vadd.f32 %v2265_v47, %v1130_v48 }
 0x25b   : > { %v2364_v50 = vpop.f32.mrf.mxu0 }
 0x25c   : > { %v1136_v51 = vmul.f32 0.35355338, %v1131_v49 }
 0x25d   : > { %v1133_v52 = vpop.f32.mrf.mxu0 }
 0x25e   : > { %1138 = vrot.lane.b32.xlu1 %v1136_v51, %s2801_s20 }
 0x25f   : > { %v2365_v53 = vpop.f32.mrf.mxu0 }
 0x262   : > { %1141 = vrot.lane.b32.xlu1 %v1136_v51, %s2802_s19 }
 0x266   : > { %1144 = vrot.lane.b32.xlu1 %v1136_v51, %s2803_s29 }
 0x26a   : > { %724 = vperm.xlu1 %2562, %v714_v54  }
 0x26e   : > { %729 = vperm.xlu1 %2562, %v715_v55  }
 0x272   : > { %734 = vperm.xlu1 %2562, %v716_v56  }
 0x2d0   : > { %v1139_v58 = vpop.permute.xlu1 %1138 }
 0x2d4   : > { %v1142_v62 = vpop.permute.xlu1 %1141 }
 0x2d5   : > { %v1147_v8 = vcombine.low %v1136_v51, %v1142_v62  ;;  %v1148_v9 = vcombine.high %v1136_v51, %v1142_v62 }
 0x2d7   : > { %v1155_v13 = vrot.slane %v1147_v8, %v3088_v7  ;;  %v1162_v14 = vrot.slane %v1148_v9, %v3088_v7 }
 0x2d8   : > { %v1145_v1 = vpop.permute.xlu1 %1144 }
 0x2d9   : > { %v1163_v5 = vcombine.low %v1139_v58, %v1145_v1  ;;  %v1164_v6 = vcombine.high %v1139_v58, %v1145_v1 }
 0x2db   : > { %v1171_v11 = vrot.slane %v1163_v5, %v3088_v7  ;;  %v1178_v12 = vrot.slane %v1164_v6, %v3088_v7 }
 0x2dd   : > { %v1179_v17 = vcombine.low %v1155_v13, %v1171_v11  ;;  %v1180_v18 = vcombine.high %v1155_v13, %v1171_v11  ;;  %v1195_v19 = vcombine.low %v1162_v14, %v1178_v12  ;;  %v1196_v20 = vcombine.high %v1162_v14, %v1178_v12 }
 0x2df   : > { %v1187_v21 = vrot.slane %v1179_v17, %v3094_v16  ;;  %v1194_v22 = vrot.slane %v1180_v18, %v3094_v16  ;;  %v1203_v24 = vrot.slane %v1195_v19, %v3094_v16  ;;  %v1210_v25 = vrot.slane %v1196_v20, %v3094_v16 }
 0x2e1   : > { %v1215_v26 = vcombine.low %v1187_v21, %v1194_v22  ;;  %v2269_v27 = vcombine.high %v1187_v21, %v1194_v22  ;;  %v1231_v28 = vcombine.low %v1203_v24, %v1210_v25  ;;  %v2270_v29 = vcombine.high %v1203_v24, %v1210_v25 }
 0x2e3   : > { %v1222_v31 = vrot.slane %v1215_v26, %v3088_v7  ;;  %v1230_v33 = vrot.slane %v2269_v27, %v3088_v7  ;;  %v1238_v34 = vrot.slane %v1231_v28, %v3088_v7  ;;  %v1246_v35 = vrot.slane %v2270_v29, %v3088_v7 }
 0x2e5   : > { %v725_v23 = vpop.permute.xlu1 %724  ;;  %v1247_v42 = vcombine.low %v1222_v31, %v1230_v33  ;;  %v1263_v43 = vcombine.low %v1238_v34, %v1246_v35  ;;  %v1248_v55 = vcombine.high %v1222_v31, %v1230_v33  ;;  %v1264_v56 = vcombine.high %v1238_v34, %v1246_v35 }
 0x2e7   : > { %v1255_v51 = vrot.slane %v1247_v42, %v3094_v16  ;;  %v1271_v52 = vrot.slane %v1263_v43, %v3094_v16  ;;  %v1262_v0 = vrot.slane %v1248_v55, %v3094_v16  ;;  %v1278_v1 = vrot.slane %v1264_v56, %v3094_v16 }
 0x2e9   : > { %v730_v30 = vpop.permute.xlu1 %729  ;;  %v1280_v63 = vcombine.high %v1255_v51, %v1271_v52  ;;  %v1281_v9 = vcombine.low %v1262_v0, %v1278_v1  ;;  %v1282_v12 = vcombine.high %v1262_v0, %v1278_v1 }
 0x2eb   : > { %v1284_v8 = vpack.c.bf16 %v1280_v63, %v1280_v63  ;;  %v1285_v11 = vpack.c.bf16 %v1281_v9, %v1281_v9  ;;  %v1286_v13 = vpack.c.bf16 %v1282_v12, %v1282_v12 }
 0x2ed   : > { %v735_v40 = vpop.permute.xlu1 %734 }
 0x2ee   : > { %v2348_v32 = vpop.f32.mrf.mxu1 }
 0x2ef   : > { %v796_v36 = vadd.f32 %v2348_v32, %v730_v30 }
 0x2f0   : > { %v787_v37 = vpop.f32.mrf.mxu1 }
 0x2f1   : > { %v804_v38 = vpack.c.bf16 %v796_v36, %v796_v36  ;;  %v788_v39 = vadd.f32 %v787_v37, %v720_v57  ;;  %v1279_v57 = vcombine.low %v1255_v51, %v1271_v52  ;;  %v2257_v36 = vld [vmem:[#allocation10] ss:$0 sm:$0xff] }
 0x2f2   : > { %v2349_v41 = vpop.f32.mrf.mxu1 }
 0x2f3   : > { %809 = vst.msk [vmem:[#allocation2 + $0x8] sm:$0xf] %vm806_vm2, %v804_v38  ;;  %v802_v44 = vpack.c.bf16 %v788_v39, %v788_v39  ;;  %v799_v45 = vadd.f32 %v2349_v41, %v735_v40  ;;  %v1283_v62 = vpack.c.bf16 %v1279_v57, %v1279_v57 }
 0x2f4   : > { %v790_v46 = vpop.f32.mrf.mxu1 }
 0x2f5   : > { %807 = vst.msk [vmem:[#allocation2] sm:$0xf] %vm806_vm2, %v802_v44  ;;  %v805_v47 = vpack.c.bf16 %v799_v45, %v799_v45  ;;  %v791_v48 = vadd.f32 %v790_v46, %v725_v23 }
 0x2f6   : > { %v3106_v49 = vpop.f32.mrf.mxu1 }
 0x2f7   : > { %810 = vst.msk [vmem:[#allocation2 + $0xc] sm:$0xf] %vm806_vm2, %v805_v47  ;;  %v803_v50 = vpack.c.bf16 %v791_v48, %v791_v48  ;;  %v873_v37 = vadd.f32 %v2257_v36, %v3106_v49 }
 0x2f8   : > { %v2356_v53 = vpop.f32.mrf.mxu1 }
 0x2f9   : > { %808 = vst.msk [vmem:[#allocation2 + $0x4] sm:$0xf] %vm806_vm2, %v803_v50 }
 0x2fa   : > { %v875_v54 = vpop.f32.mrf.mxu1  ;;  %v1289_v61 = vld [vmem:[#allocation2 + $0x8] sm:$0xf] }
 0x2fb   : > { %v1389_v5 = vsel %vm1295_vm3, %v1289_v61, 0 }
 0x2fc   : > { %v2357_v58 = vpop.f32.mrf.mxu1  ;;  %v1287_v59 = vld [vmem:[#allocation2] sm:$0xf] }
 0x2fd   : > { %v1297_v60 = vsel %vm1295_vm3, %v1287_v59, 0 }
 0x2fe   : > { %2367 = vmatpush3.bf16.msra.mxu1 %v1297_v60  ;;  %v1290_v6 = vld [vmem:[#allocation2 + $0xc] sm:$0xf] }
 0x2ff   : > { %2378 = vmatprep.subr.bf16.mxu1 %v2798_v15  ;;  %v1435_v10 = vsel %vm1295_vm3, %v1290_v6, 0 }
 0x300   : > { %v1288_v3 = vld [vmem:[#allocation2 + $0x4] sm:$0xf] }
 0x301   : > { %2369 = vmatmul.mubr.msk.bf16.vlgmr.msra.gmra.mxu1 %vm1291_vm4, %v1283_v62  ;;  %v1343_v4 = vsel %vm1295_vm3, %v1288_v3, 0 }
 0x302   : > { %2373 = vmatpush3.bf16.msra.mxu0 %v1343_v4  ;;  %2379 = vmatpush3.bf16.msra.mxu1 %v1389_v5 }
 0x303   : > { %2384 = vmatprep.subr.bf16.mxu0 %v2798_v15  ;;  %2380 = vmatprep.mubr.msk.bf16.mxu1 %vm2799_vm1, %v2798_v15 }
 0x304   : > { %2390 = vmatprep.subr.bf16.mxu1 %v2798_v15 }
 0x305   : > { %2375 = vmatmul.mubr.msk.bf16.vlgmr.msra.gmra.mxu0 %vm1291_vm4, %v1284_v8 }
 0x306   : > { %2385 = vmatpush3.bf16.msra.mxu0 %v1435_v10  ;;  %2386 = vmatprep.mubr.msk.bf16.mxu0 %vm2799_vm1, %v2798_v15 }
 0x307   : > { %2396 = vmatprep.subr.bf16.mxu0 %v2798_v15 }
 0x309   : > { %2381 = vmatmul.mubr.msk.bf16.vlgmr.msra.gmra.mxu1 %vm1291_vm4, %v1285_v11 }
 0x30a   : > { %2392 = vmatprep.mubr.msk.bf16.mxu1 %vm2799_vm1, %v2798_v15 }
 0x30d   : > { %2387 = vmatmul.mubr.msk.bf16.vlgmr.msra.gmra.mxu0 %vm1291_vm4, %v1286_v13 }
 0x30e   : > { %2398 = vmatprep.mubr.msk.bf16.mxu0 %vm2799_vm1, %v2798_v15 }
 0x3c1   : > { %v1333_v14 = vpop.f32.mrf.mxu1 }
 0x3c2   : > { %v1477_v17 = vsel %vm1291_vm4, %v1333_v14, -inf }
 0x3c3   : > { %1478 = vmax.xlane.f32.xlu1 %v1477_v17  ;;  %v2370_v18 = vpop.f32.mrf.mxu1 }
 0x3c5   : > { %v1336_v19 = vpop.f32.mrf.mxu1  ;;  %v1379_v20 = vpop.f32.mrf.mxu0 }
 0x3c6   : > { %v1480_v21 = vsel %vm1291_vm4, %v1379_v20, -inf }
 0x3c7   : > { %v2371_v22 = vpop.f32.mrf.mxu1  ;;  %1481 = vmax.xlane.f32.xlu0 %v1480_v21  ;;  %v2376_v23 = vpop.f32.mrf.mxu0 }
 0x3c9   : > { %v1382_v24 = vpop.f32.mrf.mxu0  ;;  %v1425_v25 = vpop.f32.mrf.mxu1 }
 0x3ca   : > { %v1483_v26 = vsel %vm1291_vm4, %v1425_v25, -inf }
 0x3cb   : > { %v2377_v27 = vpop.f32.mrf.mxu0  ;;  %1484 = vmax.xlane.f32.xlu1 %v1483_v26  ;;  %v2382_v28 = vpop.f32.mrf.mxu1 }
 0x3cd   : > { %v1428_v29 = vpop.f32.mrf.mxu1  ;;  %v1471_v30 = vpop.f32.mrf.mxu0 }
 0x3ce   : > { %v1486_v31 = vsel %vm1291_vm4, %v1471_v30, -inf }
 0x3cf   : > { %v2383_v32 = vpop.f32.mrf.mxu1  ;;  %1487 = vmax.xlane.f32.xlu1 %v1486_v31  ;;  %v2388_v33 = vpop.f32.mrf.mxu0 }
 0x3d1   : > { %v1474_v34 = vpop.f32.mrf.mxu0 }
 0x3d3   : > { %v2389_v35 = vpop.f32.mrf.mxu0 }
 0x3dd   : > { %882 = vrot.lane.b32.xlu0 %v873_v37, %s2802_s19 }
 0x3e0   : > { %879 = vrot.lane.b32.xlu1 %v873_v37, %s2801_s20 }
 0x3e4   : > { %885 = vrot.lane.b32.xlu1 %v873_v37, %s2803_s29  ;;  %s2297_s29 = sshll.u32 %s2784_s30, 7  ;;  %s2109_s30 = scalar_lea.sflag [#allocation6], %s629_s24 }
 0x3e5   : > { %s3284_s23 = scalar_lea.hbm %s3349_s18, %s2297_s29 }
 0x44c   : > { %v1479_v38 = vpop.xlane.xlu1 %1478 }
 0x44d   : > { %v1489_v39 = vsub.f32 %v1333_v14, %v1479_v38 }
 0x44f   : > { %v1493_v40 = vmul.f32 1.442695, %v1489_v39 }
 0x450   : > { %v1482_v41 = vpop.xlane.xlu0 %1481 }
 0x451   : > { %2580 = vpow2.f32 %v1493_v40  ;;  %v1490_v42 = vsub.f32 %v1379_v20, %v1482_v41 }
 0x453   : > { %v1495_v43 = vmul.f32 1.442695, %v1490_v42 }
 0x454   : > { %v1485_v44 = vpop.xlane.xlu1 %1484  ;;  %v883_v49 = vpop.permute.xlu0 %882 }
 0x455   : > { %2582 = vpow2.f32 %v1495_v43  ;;  %v1491_v45 = vsub.f32 %v1425_v25, %v1485_v44  ;;  %v888_v53 = vcombine.low %v873_v37, %v883_v49  ;;  %v889_v54 = vcombine.high %v873_v37, %v883_v49 }
 0x457   : > { %v1497_v46 = vmul.f32 1.442695, %v1491_v45  ;;  %v896_v60 = vrot.slane %v888_v53, %v3088_v7  ;;  %v903_v61 = vrot.slane %v889_v54, %v3088_v7 }
 0x458   : > { %v1488_v47 = vpop.xlane.xlu1 %1487 }
 0x459   : > { %2584 = vpow2.f32 %v1497_v46  ;;  %v1492_v48 = vsub.f32 %v1471_v30, %v1488_v47 }
 0x45b   : > { %v1499_v50 = vmul.f32 1.442695, %v1492_v48 }
 0x45c   : > { %v880_v51 = vpop.permute.xlu1 %879 }
 0x45d   : > { %2586 = vpow2.f32 %v1499_v50 }
 0x45e   : > { %v3142_v52 = vpop.eup %2580 }
 0x45f   : > { %v1501_v55 = vsel %vm1291_vm4, %v3142_v52, 0.0 }
 0x460   : > { %1502 = vadd.xlane.f32.xlu1 %v1501_v55  ;;  %v886_v56 = vpop.permute.xlu1 %885 }
 0x461   : > { %v904_v57 = vcombine.low %v880_v51, %v886_v56  ;;  %v905_v58 = vcombine.high %v880_v51, %v886_v56 }
 0x462   : > { %v3146_v59 = vpop.eup %2582 }
 0x463   : > { %v912_v62 = vrot.slane %v904_v57, %v3088_v7  ;;  %v919_v63 = vrot.slane %v905_v58, %v3088_v7  ;;  %v1504_v0 = vsel %vm1291_vm4, %v3146_v59, 0.0 }
 0x464   : > { %1505 = vadd.xlane.f32.xlu0 %v1504_v0 }
 0x465   : > { %v920_v1 = vcombine.low %v896_v60, %v912_v62  ;;  %v921_v3 = vcombine.high %v896_v60, %v912_v62  ;;  %v936_v4 = vcombine.low %v903_v61, %v919_v63  ;;  %v937_v5 = vcombine.high %v903_v61, %v919_v63  ;;  %v1717_v63 = vld [vmem:[%s3341_s10] sm:$0xf] }
 0x466   : > { %v3154_v6 = vpop.eup %2584  ;;  %v1725_v0 = vsel %vm1295_vm3, %v1717_v63, 0 }
 0x467   : > { %v928_v8 = vrot.slane %v920_v1, %v3094_v16  ;;  %v935_v9 = vrot.slane %v921_v3, %v3094_v16  ;;  %v944_v10 = vrot.slane %v936_v4, %v3094_v16  ;;  %v951_v11 = vrot.slane %v937_v5, %v3094_v16  ;;  %v1718_v1 = vld [vmem:[%s3341_s10 + $0x4] sm:$0xf]  ;;  %v1719_v4 = vld [vmem:[%s3341_s10 + $0x8] sm:$0xf] }
 0x468   : > { %v1507_v12 = vsel %vm1291_vm4, %v3154_v6, 0.0  ;;  %v1771_v3 = vsel %vm1295_vm3, %v1718_v1, 0 }
 0x469   : > { %v956_v13 = vcombine.low %v928_v8, %v935_v9  ;;  %v2261_v14 = vcombine.high %v928_v8, %v935_v9  ;;  %v972_v17 = vcombine.low %v944_v10, %v951_v11  ;;  %v2262_v18 = vcombine.high %v944_v10, %v951_v11  ;;  %1508 = vadd.xlane.f32.xlu1 %v1507_v12  ;;  %v1720_v10 = vld [vmem:[%s3341_s10 + $0xc] sm:$0xf] }
 0x46a   : > { %v3162_v19 = vpop.eup %2586  ;;  %v1817_v8 = vsel %vm1295_vm3, %v1719_v4, 0 }
 0x46b   : > { %v963_v20 = vrot.slane %v956_v13, %v3088_v7  ;;  %v971_v21 = vrot.slane %v2261_v14, %v3088_v7  ;;  %v979_v22 = vrot.slane %v972_v17, %v3088_v7  ;;  %v987_v23 = vrot.slane %v2262_v18, %v3088_v7 }
 0x46c   : > { %v1510_v24 = vsel %vm1291_vm4, %v3162_v19, 0.0  ;;  %v1863_v14 = vsel %vm1295_vm3, %v1720_v10, 0  ;;  %v2572_v10 = vld [vmem:[%s3347_s16 + $0x18] sm:$0xff]  }
 0x46d   : > { %v988_v25 = vcombine.low %v963_v20, %v971_v21  ;;  %v989_v26 = vcombine.high %v963_v20, %v971_v21  ;;  %v1004_v27 = vcombine.low %v979_v22, %v987_v23  ;;  %v1005_v28 = vcombine.high %v979_v22, %v987_v23  ;;  %1511 = vadd.xlane.f32.xlu1 %v1510_v24 }
 0x46f   : > { %v996_v29 = vrot.slane %v988_v25, %v3094_v16  ;;  %v1003_v30 = vrot.slane %v989_v26, %v3094_v16  ;;  %v1012_v31 = vrot.slane %v1004_v27, %v3094_v16  ;;  %v1019_v32 = vrot.slane %v1005_v28, %v3094_v16 }
 0x471   : > { %v1020_v33 = vcombine.low %v996_v29, %v1012_v31  ;;  %v1021_v34 = vcombine.high %v996_v29, %v1012_v31  ;;  %v1022_v35 = vcombine.low %v1003_v30, %v1019_v32  ;;  %v1023_v7 = vcombine.high %v1003_v30, %v1019_v32 }
 0x473   : > { %v1024_v36 = vpack.c.bf16 %v1020_v33, %v1020_v33  ;;  %v1025_v37 = vpack.c.bf16 %v1021_v34, %v1021_v34  ;;  %v1026_v38 = vpack.c.bf16 %v1022_v35, %v1022_v35  ;;  %v1027_v39 = vpack.c.bf16 %v1023_v7, %v1023_v7 }
 0x475   : > { %1028 = vst.msk [vmem:[#allocation3] sm:$0xf] %vm806_vm2, %v1024_v36  ;;  %1029 = vst.msk [vmem:[#allocation3 + $0x4] sm:$0xf] %vm806_vm2, %v1025_v37 }
 0x476   : > { %1030 = vst.msk [vmem:[#allocation3 + $0x8] sm:$0xf] %vm806_vm2, %v1026_v38  ;;  %1031 = vst.msk [vmem:[#allocation3 + $0xc] sm:$0xf] %vm806_vm2, %v1027_v39 }
 0x47c   : > { %v1525_v40 = vld [vmem:[#allocation3] sm:$0xf]  ;;  %v1526_v41 = vld [vmem:[#allocation3 + $0x4] sm:$0xf] }
 0x47d   : > { %v1533_v16 = vsel %vm1295_vm3, %v1525_v40, 0  ;;  %v1579_v42 = vsel %vm1295_vm3, %v1526_v41, 0  ;;  %v1527_v49 = vld [vmem:[#allocation3 + $0x8] sm:$0xf]  ;;  %v1528_v55 = vld [vmem:[#allocation3 + $0xc] sm:$0xf] }
 0x47e   : > { %2391 = vmatpush3.bf16.msra.mxu1 %v1533_v16  ;;  %2397 = vmatpush3.bf16.msra.mxu0 %v1579_v42  ;;  %v1625_v53 = vsel %vm1295_vm3, %v1527_v49, 0 }
 0x47f   : > { %2402 = vmatprep.subr.bf16.mxu1 %v2798_v15  ;;  %2408 = vmatprep.subr.bf16.mxu0 %v2798_v15 }
 0x4e9   : > { %v1503_v43 = vpop.xlane.xlu1 %1502 }
 0x4ea   : > { %2588 = vrcp.f32 %v1503_v43 }
 0x4ed   : > { %v1506_v44 = vpop.xlane.xlu0 %1505 }
 0x4ee   : > { %2590 = vrcp.f32 %v1506_v44 }
 0x4f2   : > { %v1509_v45 = vpop.xlane.xlu1 %1508 }
 0x4f3   : > { %2592 = vrcp.f32 %v1509_v45 }
 0x4f6   : > { %v1512_v46 = vpop.xlane.xlu1 %1511 }
 0x4f7   : > { %v2589_v47 = vpop.eup %2588  ;;  %2594 = vrcp.f32 %v1512_v46 }
 0x4f8   : > { %v1517_v48 = vmul.f32 %v2589_v47, %v3142_v52  ;;  %v1671_v52 = vsel %vm1295_vm3, %v1528_v55, 0  ;;  %v2283_v47 = vld [vmem:[%s3342_s11] ss:$0 sm:$0xff] }
 0x4fa   : > { %v1521_v50 = vpack.c.bf16 %v1517_v48, %v1517_v48 }
 0x4fb   : > { %v2591_v51 = vpop.eup %2590 }
 0x4fc   : > { %2393 = vmatmul.mubr.msk.bf16.vlgmr.msra.gmra.mxu1 %vm1291_vm4, %v1521_v50  ;;  %v1518_v54 = vmul.f32 %v2591_v51, %v3146_v59 }
 0x4fd   : > { %2403 = vmatpush3.bf16.msra.mxu1 %v1625_v53  ;;  %2404 = vmatprep.mubr.msk.bf16.mxu1 %vm2799_vm1, %v2798_v15 }
 0x4fe   : > { %v1522_v56 = vpack.c.bf16 %v1518_v54, %v1518_v54  ;;  %2414 = vmatprep.subr.bf16.mxu1 %v2798_v15 }
 0x500   : > { %v2593_v57 = vpop.eup %2592  ;;  %2399 = vmatmul.mubr.msk.bf16.vlgmr.msra.gmra.mxu0 %vm1291_vm4, %v1522_v56 }
 0x501   : > { %2409 = vmatpush3.bf16.msra.mxu0 %v1671_v52  ;;  %v1519_v58 = vmul.f32 %v2593_v57, %v3154_v6  ;;  %2410 = vmatprep.mubr.msk.bf16.mxu0 %vm2799_vm1, %v2798_v15 }
 0x502   : > { %2420 = vmatprep.subr.bf16.mxu0 %v2798_v15 }
 0x503   : > { %v1523_v59 = vpack.c.bf16 %v1519_v58, %v1519_v58 }
 0x504   : > { %v2595_v60 = vpop.eup %2594 }
 0x505   : > { %2405 = vmatmul.mubr.msk.bf16.vlgmr.msra.gmra.mxu1 %vm1291_vm4, %v1523_v59  ;;  %v1520_v61 = vmul.f32 %v2595_v60, %v3162_v19 }
 0x506   : > { %2416 = vmatprep.mubr.msk.bf16.mxu1 %vm2799_vm1, %v2798_v15  ;;  %2415 = vmatpush3.bf16.msra.mxu1 %v1725_v0 }
 0x507   : > { %v1524_v62 = vpack.c.bf16 %v1520_v61, %v1520_v61  ;;  %2426 = vmatprep.subr.bf16.mxu1 %v2798_v15  ;;  %v2570_v61 = vld [vmem:[%s3345_s14 + $0x8] sm:$0xff]  }
 0x509   : > { %2411 = vmatmul.mubr.msk.bf16.vlgmr.msra.gmra.mxu0 %vm1291_vm4, %v1524_v62  ;;  %v2571_v62 = vld [vmem:[%s3345_s14] sm:$0xff]  }
 0x50a   : > { %2422 = vmatprep.mubr.msk.bf16.mxu0 %vm2799_vm1, %v2798_v15  ;;  %2421 = vmatpush3.bf16.msra.mxu0 %v1771_v3  ;;  %v2284_v3 = vld [vmem:[%s3343_s12] ss:$0 sm:$0xff] }
 0x50b   : > { %2432 = vmatprep.subr.bf16.mxu0 %v2798_v15 }
 0x5bc   : > { %v1569_v5 = vpop.f32.mrf.mxu1 }
 0x5bd   : > { %v1713_v6 = vpack.c.bf16 %v1569_v5, %v1569_v5  ;;  %v2285_v5 = vld [vmem:[%s3344_s13] ss:$0 sm:$0xff] }
 0x5be   : > { %v2394_v9 = vpop.f32.mrf.mxu1 }
 0x5bf   : > { %2417 = vmatmul.mubr.msk.bf16.vlgmr.msra.gmra.mxu1 %vm1291_vm4, %v1713_v6 }
 0x5c0   : > { %v1572_v11 = vpop.f32.mrf.mxu1  ;;  %v1615_v12 = vpop.f32.mrf.mxu0  ;;  %2427 = vmatpush3.bf16.msra.mxu1 %v1817_v8  ;;  %2428 = vmatprep.mubr.msk.bf16.mxu1 %vm2799_vm1, %v2798_v15 }
 0x5c1   : > { %v1714_v13 = vpack.c.bf16 %v1615_v12, %v1615_v12  ;;  %2438 = vmatprep.subr.bf16.mxu1 %v2798_v15  ;;  %v2573_v11 = vld [vmem:[%s3347_s16 + $0x10] sm:$0xff]   ;;  %v2574_v12 = vld [vmem:[%s3347_s16 + $0x8] sm:$0xff]  }
 0x5c2   : > { %v2395_v17 = vpop.f32.mrf.mxu1  ;;  %v2400_v18 = vpop.f32.mrf.mxu0 }
 0x5c3   : > { %2423 = vmatmul.mubr.msk.bf16.vlgmr.msra.gmra.mxu0 %vm1291_vm4, %v1714_v13  ;;  %v2575_v13 = vld [vmem:[%s3347_s16] sm:$0xff]  }
 0x5c4   : > { %v1618_v19 = vpop.f32.mrf.mxu0  ;;  %2433 = vmatpush3.bf16.msra.mxu0 %v1863_v14  ;;  %2434 = vmatprep.mubr.msk.bf16.mxu0 %vm2799_vm1, %v2798_v15  ;;  %v2286_v14 = vld [vmem:[%s3346_s15] ss:$0 sm:$0xff] }
 0x5c5   : > { %v1661_v20 = vpop.f32.mrf.mxu1  ;;  %2446 = vmatprep.subr.bf16.mxu0 %v2798_v15 }
 0x5c6   : > { %v1715_v21 = vpack.c.bf16 %v1661_v20, %v1661_v20  ;;  %v2401_v22 = vpop.f32.mrf.mxu0 }
 0x5c7   : > { %v2406_v23 = vpop.f32.mrf.mxu1 }
 0x5c8   : > { %2429 = vmatmul.mubr.msk.bf16.vlgmr.msra.gmra.mxu1 %vm1291_vm4, %v1715_v21 }
 0x5c9   : > { %v1664_v24 = vpop.f32.mrf.mxu1  ;;  %v1707_v25 = vpop.f32.mrf.mxu0  ;;  %2442 = vmatprep.mubr.msk.bf16.mxu1 %vm2799_vm1, %v2798_v15  ;;  %2439 = vmatpush3.bf16.msra.mxu1 %v2570_v61 }
 0x5ca   : > { %v1716_v26 = vpack.c.bf16 %v1707_v25, %v1707_v25  ;;  %2440 = vmatprep.subr.bf16.mxu1 %v2798_v15 }
 0x5cb   : > { %v2407_v27 = vpop.f32.mrf.mxu1  ;;  %v2412_v28 = vpop.f32.mrf.mxu0 }
 0x5cc   : > { %2435 = vmatmul.mubr.msk.bf16.vlgmr.msra.gmra.mxu0 %vm1291_vm4, %v1716_v26  ;;  %v2290_v27 = vld [vmem:[%s3348_s17] ss:$0 sm:$0xff] }
 0x5cd   : > { %v1710_v29 = vpop.f32.mrf.mxu0  ;;  %2454 = vmatprep.mubr.msk.bf16.mxu0 %vm2799_vm1, %v2798_v15  ;;  %2441 = vmatpush3.bf16.msra.mxu1 %v2571_v62 }
 0x5ce   : > { %2447 = vmatpush3.bf16.msra.mxu0 %v2572_v10 }
 0x5cf   : > { %v2413_v30 = vpop.f32.mrf.mxu0  ;;  %2448 = vmatprep.subr.bf16.mxu0 %v2798_v15 }
 0x5d2   : > { %2449 = vmatpush3.bf16.msra.mxu0 %v2573_v11 }
 0x5d3   : > { %2450 = vmatprep.subr.bf16.mxu0 %v2798_v15 }
 0x5d6   : > { %2451 = vmatpush3.bf16.msra.mxu0 %v2574_v12 }
 0x5d7   : > { %2452 = vmatprep.subr.bf16.mxu0 %v2798_v15 }
 0x5da   : > { %2453 = vmatpush3.bf16.msra.mxu0 %v2575_v13 }
 0x67f   : > { %v1761_v31 = vpop.f32.mrf.mxu1 }
 0x680   : > { %v1905_v39 = vsel %vm644_vm0, %v1761_v31, 0.0 }
 0x681   : > { %v2418_v32 = vpop.f32.mrf.mxu1 }
 0x683   : > { %v1764_v33 = vpop.f32.mrf.mxu1  ;;  %v1807_v34 = vpop.f32.mrf.mxu0 }
 0x684   : > { %v1906_v36 = vsel %vm644_vm0, %v1807_v34, 0.0 }
 0x685   : > { %v2419_v35 = vpop.f32.mrf.mxu1  ;;  %v2424_v7 = vpop.f32.mrf.mxu0  ;;  %v1907_v16 = vadd.f32 %v1906_v36, %v1905_v39 }
 0x687   : > { %v1810_v37 = vpop.f32.mrf.mxu0 }
 0x688   : > { %v1853_v38 = vpop.f32.mrf.mxu1 }
 0x689   : > { %v1908_v40 = vsel %vm644_vm0, %v1853_v38, 0.0  ;;  %v2425_v41 = vpop.f32.mrf.mxu0 }
 0x68a   : > { %v2430_v42 = vpop.f32.mrf.mxu1  ;;  %v1909_v43 = vadd.f32 %v1908_v40, %v1907_v16 }
 0x68c   : > { %v1856_v44 = vpop.f32.mrf.mxu1  ;;  %v1899_v45 = vpop.f32.mrf.mxu0 }
 0x68d   : > { %v1910_v46 = vsel %vm644_vm0, %v1899_v45, 0.0 }
 0x68e   : > { %v1911_v48 = vadd.f32 %v1910_v46, %v1909_v43  ;;  %v2431_v49 = vpop.f32.mrf.mxu1  ;;  %v2436_v50 = vpop.f32.mrf.mxu0 }
 0x690   : > { %v1919_v51 = vadd.f32 %v2283_v47, %v1911_v48  ;;  %v1902_v53 = vpop.f32.mrf.mxu0 }
 0x692   : > { %v2437_v54 = vpop.f32.mrf.mxu0  ;;  %v1920_v55 = vadd.f32 %v1919_v51, %v3026_v2 }
 0x694   : > { %v1921_v56 = vsel %vm644_vm0, %v1920_v55, 0.0 }
 0x695   : > { %1922 = vadd.xlane.f32.xlu1 %v1921_v56 }
 0x71e   : > { %v1923_v57 = vpop.xlane.xlu1 %1922 }
 0x71f   : > { %v1924_v52 = vmul.f32 0.03125, %v1923_v57 }
 0x721   : > { %v1925_v58 = vsub.f32 %v1920_v55, %v1924_v52 }
 0x723   : > { %v1926_v59 = vmul.f32 %v1925_v58, %v1925_v58 }
 0x725   : > { %v1927_v60 = vsel %vm644_vm0, %v1926_v59, 0.0 }
 0x726   : > { %1928 = vadd.xlane.f32.xlu1 %v1927_v60 }
 0x7af   : > { %v1929_v2 = vpop.xlane.xlu1 %1928 }
 0x7b0   : > { %v1930_v63 = vmul.f32 0.03125, %v1929_v2 }
 0x7b2   : > { %v1931_v0 = vadd.f32 1e-05, %v1930_v63 }
 0x7b4   : > { %2596 = vrsqrt.f32 %v1931_v0 }
 0x7c1   : > { %v2597_v1 = vpop.eup %2596 }
 0x7c2   : > { %v1933_v4 = vmul.f32 %v2597_v1, %v1925_v58 }
 0x7c4   : > { %v1941_v6 = vmul.f32 %v2284_v3, %v1933_v4 }
 0x7c6   : > { %v1949_v8 = vadd.f32 %v2285_v5, %v1941_v6 }
 0x7c8   : > { %v1950_v9 = vpack.c.bf16 %v1949_v8, %v1949_v8 }
 0x7ca   : > { %2443 = vmatmul.mubr.msk.bf16.vlgmr.msra.gmra.mxu1 %vm644_vm0, %v1950_v9 }
 0x88a   : > { %v2011_v17 = vpop.f32.mrf.mxu1 }
 0x88b   : > { %v2012_v18 = vadd.f32 %v2286_v14, %v2011_v17 }
 0x88c   : > { %v2444_v19 = vpop.f32.mrf.mxu1 }
 0x88d   : > { %v2018_v20 = vmul.f32 0.70710677, %v2012_v18  ;;  %v2017_v15 = vmul.f32 0.5, %v2012_v18 }
 0x88e   : > { %v2014_v21 = vpop.f32.mrf.mxu1 }
 0x88f   : > { %2598 = verf.f32 %v2018_v20 }
 0x890   : > { %v2445_v22 = vpop.f32.mrf.mxu1 }
 0x89c   : > { %v2599_v23 = vpop.eup %2598 }
 0x89d   : > { %v2020_v24 = vadd.f32 1.0, %v2599_v23 }
 0x89f   : > { %v2021_v25 = vmul.f32 %v2020_v24, %v2017_v15 }
 0x8a1   : > { %v2022_v26 = vpack.c.bf16 %v2021_v25, %v2021_v25 }
 0x8a3   : > { %2455 = vmatmul.mubr.msk.bf16.vlgmr.msra.gmra.mxu0 %vm2062_vm5, %v2022_v26 }
 0x963   : > { %v2100_v28 = vpop.f32.mrf.mxu0 }
 0x964   : > { %v2101_v29 = vadd.f32 %v2290_v27, %v2100_v28 }
 0x965   : > { %v2456_v30 = vpop.f32.mrf.mxu0 }
 0x966   : > { %v2106_v31 = vadd.f32 %v2101_v29, %v1920_v55 }
 0x967   : > { %v2103_v32 = vpop.f32.mrf.mxu0 }
 0x968   : > { %2107 = vst.msk [vmem:[%s631_s3] sm:$0xff] %vm644_vm0, %v2106_v31 }
 0x969   : > { %v2457_v33 = vpop.f32.mrf.mxu0 }
 0x96a   : > { %2717 = shalt.err (!%p2714_p1)
}
 0x96b   : > { %s2718_s20 = scalar_lea.hbm %s3284_s23, 128  ;;  %s2722_s29 = scalar_lea.hbm %s3349_s18, 256 }
 0x96c   : > { %p2719_p2 = scmp.ne.s32.totalorder %s3284_s23, %s2718_s20  ;;  %p2723_p4 = scmp.lt.s32.totalorder %s3284_s23, %s3349_s18 }
 0x96d   : > { %p2724_p10 = scmp.lt.s32.totalorder %s2722_s29, %s2718_s20 }
 0x96e   : > { %p2720_p3 = pnand %p2719_p2, %p3383_p11 }
 0x96f   : > { %p2725_p13 = por %p2724_p10, %p2723_p4 }
 0x970   : > { %p2721_p8 = pneg %p2720_p3 }
 0x972   : > { %p2726_p0 = pnand %p2725_p13, %p2721_p8 }
 0x974   : > { %2729 = shalt.err (!%p2726_p0)
}
 0x975   : > { %2474 = dma.vmem_to_hbm [thread:$0]  (%p3383_p11), %s3286_s21, 128, %s3284_s23, %s2109_s30  }
 0x976 PF: > { %s3384_s25 = sld [smem:[#allocation20_spill]] }
 0x977   : > { %s3385_s22 = sld [smem:[#allocation17_spill]] }
 0x978   : > { %s3386_s27 = sld [smem:[#allocation22_spill]] }
 0x97c   : > { %p2501_p5 = scmp.ge.s32.totalorder %s3384_s25, 2 }
 0x97d   : > { %s2135_s0 = sand.u32 1, %s3385_s22  }
 0x97e   : > { %p3387_p6 = scmp.ne.s32.totalorder %s3386_s27, 0  ;;  %s2136_s1 = scalar_lea.sflag [#allocation6], %s2135_s0 }
 0x980   : > { %p2490_p7 = pnand %p2501_p5, %p3387_p6 }
 0x982   : > { %p2491_p9 = pneg %p2490_p7 }
 0x984   : > { %2767 = dma.done.wait (%p2491_p9), %s2136_s1, 128  }
 0x985   : > { %2769 = vsyncadd (%p2491_p9), %s2136_s1, 4294967168  ;;  %s34_s19 = sadd.s32 1, %s3384_s25   ;;  %s3388_s2 = sld [smem:[#allocation18_spill]] }
 0x986   : > { %p31_p12 = scmp.ge.s32.totalorder %s34_s19, 4   ;;  %s3389_s29 = sld [smem:[#allocation23_spill]] }
 0x987   : > { %s3390_s30 = sld [smem:[#allocation19_spill]]  ;;  %s3392_s27 = smov %s2776_s28 }
 0x988   : > { %s3391_s0 = sld [smem:[#allocation21_spill]]  ;;  %33 = sbr.rel (!%p31_p12) target bundleno = 12 (0xc), region = 150 }
 0x98b   : > { %s3393_s28 = smov %s3388_s2 }
 0x98d   :  { %2141 = vsyncpa [#allocation5], 1 }
 0x98e   :  { %2143 = vsyncpa [#allocation5 + $0x1], 1 }
 0x98f   :  { %2144 = vsyncpa [#allocation8], 1 }
 0x990   :  { %2145 = vsyncpa [#allocation11], 1 }
 0x991   :  { %2146 = vsyncpa [#allocation6], 1 }
 0x992   :  { %2148 = vsyncpa [#allocation6 + $0x1], 1 }

// kernel: tpu_custom_call.1
= control target key start
LH: loop header
LB: loop body
LE: loop exit
PB: predicated region body
PF: predicated region fallthrough
CT: control target
= control target key end

     0   :  { %s3331_s0 = inlined_call_operand.vmem [shape: f32[2,8,32], index: 0, kind: input, shape index: {}]   ;;  %s3332_s1 = inlined_call_operand.hbm [shape: f32[8,32], index: 1, kind: input, shape index: {}]   ;;  %s3333_s2 = inlined_call_operand.vmem [shape: f32[1,32], index: 2, kind: input, shape index: {}]   ;;  %s3334_s3 = inlined_call_operand.hbm [shape: f32[1,32], index: 3, kind: input, shape index: {}]   ;;  %s3335_s4 = inlined_call_operand.vmem [shape: bf16[32,32], index: 4, kind: input, shape index: {}]   ;;  %s3336_s5 = inlined_call_operand.hbm [shape: f32[1,32], index: 5, kind: input, shape index: {}]   ;;  %s3337_s6 = inlined_call_operand.vmem [shape: bf16[32,32], index: 6, kind: input, shape index: {}]   ;;  %s3338_s7 = inlined_call_operand.vmem [shape: f32[32,1], index: 7, kind: input, shape index: {}]   ;;  %s3339_s8 = inlined_call_operand.vmem [shape: bf16[32,32], index: 8, kind: input, shape index: {}]   ;;  %s3340_s9 = inlined_call_operand.hbm [shape: f32[1,32], index: 9, kind: input, shape index: {}]   ;;  %s3341_s10 = inlined_call_operand.vmem [shape: bf16[4,8,32], index: 10, kind: input, shape index: {}]   ;;  %s3342_s11 = inlined_call_operand.vmem [shape: f32[1,32], index: 11, kind: input, shape index: {}]   ;;  %s3343_s12 = inlined_call_operand.vmem [shape: f32[1,32], index: 12, kind: input, shape index: {}]   ;;  %s3344_s13 = inlined_call_operand.vmem [shape: f32[1,32], index: 13, kind: input, shape index: {}]   ;;  %s3345_s14 = inlined_call_operand.vmem [shape: bf16[32,64], index: 14, kind: input, shape index: {}]   ;;  %s3346_s15 = inlined_call_operand.vmem [shape: f32[1,64], index: 15, kind: input, shape index: {}]   ;;  %s3347_s16 = inlined_call_operand.vmem [shape: bf16[64,32], index: 16, kind: input, shape index: {}]   ;;  %s3348_s17 = inlined_call_operand.vmem [shape: f32[1,32], index: 17, kind: input, shape index: {}]   ;;  %s3349_s18 = inlined_call_operand.hbm [shape: f32[2,8,32], index: 18, kind: output, shape index: {}]  }
   0x1   :  { %3361 = sst [smem:[#allocation24_spill]] %s3331_s0 }
   0x2   :  { %3362 = sst [smem:[#allocation25_spill]] %s3332_s1 }
   0x3   :  { %3363 = sst [smem:[#allocation26_spill]] %s3333_s2 }
   0x4   :  { %3364 = sst [smem:[#allocation27_spill]] %s3334_s3 }
   0x5   :  { %23 = vsyncpa [#allocation5], 0 }
   0x6   :  { %24 = vsyncpa [#allocation8], 0 }
   0x7   :  { %25 = vsyncpa [#allocation11], 0 }
   0x8   :  { %26 = vsyncpa [#allocation6], 0 }
   0x9   :  { %28 = vsyncpa [#allocation6 + $0x1], 0  ;;  %s2902_s27 = smov 0   ;;  %s2904_s28 = smov 0  }
   0xa   :  { %s2906_s29 = smov 0   ;;  %s2908_s30 = smov 0  }
   0xb   :  { %s2910_s0 = smov 0   ;;  %s2912_s19 = smov 0  }
   0xc LB: > { %3365 = sst [smem:[#allocation17_spill]] %s2772_s27  ;;  %s2236_s1 = sadd.s32 4294967295, %s2792_s19   ;;  %s2792_s19 = sphi %s2912_s19, %s34_s19   ;;  %s2788_s0 = sphi %s2910_s0, %s3391_s0   ;;  %s2784_s30 = sphi %s2908_s30, %s3390_s30   ;;  %s2780_s29 = sphi %s2906_s29, %s3389_s29   ;;  %s2776_s28 = sphi %s2904_s28, %s3393_s28   ;;  %s2772_s27 = sphi %s2902_s27, %s3392_s27  }
   0xd   : > { %3366 = sst [smem:[#allocation18_spill]] %s2780_s29  ;;  %s2237_s20 = sadd.s32 4294967294, %s2792_s19  }
   0xe   : > { %3367 = sst [smem:[#allocation19_spill]] %s2788_s0  ;;  %s46_s21 = sadd.s32 1, %s2788_s0 }
   0xf   : > { %3368 = sst [smem:[#allocation20_spill]] %s2792_s19  ;;  %s438_s22 = sadd.s32 1, %s2780_s29 }
  0x10   : > { %p48_p0 = scmp.ge.s32.totalorder %s46_s21, 2  ;;  %p448_p1 = scmp.ne.s32.totalorder %s2780_s29, %s2776_s28 }
  0x11   : > { %p449_p2 = scmp.eq.s32.totalorder %s2236_s1, 1  ;;  %p454_p3 = scmp.ne.s32.totalorder %s2776_s28, %s2772_s27 }
  0x12   : > { %s3395_s21 = smov (%p48_p0, %s46_s21), 0  ;;  %p455_p5 = scmp.eq.s32.totalorder %s2237_s20, 1 }
  0x13   : > { %3369 = sst [smem:[#allocation21_spill]] %s3395_s21  ;;  %p2942_p4 = por %p449_p2, %p448_p1 }
  0x14   : > { %s433_s23 = ssub.s32 %s2788_s0, %s3395_s21  ;;  %p2238_p6 = scmp.ge.s32.totalorder %s2792_s19, 1 }
  0x15   : > { %s3370_s2 = scalar_select %p2942_p4, 1, 0 }
  0x16   : > { %p436_p7 = scmp.eq.s32.totalorder %s433_s23, 0  ;;  %p2949_p8 = por %p455_p5, %p454_p3 }
  0x17   : > { %p462_p9 = scmp.lt.s32.totalorder %s2792_s19, 3  ;;  %p2961_p11 = scmp.eq.s32.totalorder %s2236_s1, 0 }
  0x18   : > { %s3371_s24 = scalar_select %p2949_p8, 1, 0 }
  0x19   : > { %s2955_s25 = scalar_select %p436_p7, %s2780_s29, %s438_s22  }
  0x1a   : > { %3372 = sst [smem:[#allocation22_spill]] %s3371_s24  ;;  %p2957_p10 = pnand %p2238_p6, %p462_p9 }
  0x1b   : > { %3373 = sst [smem:[#allocation23_spill]] %s2955_s25  ;;  %s2794_s20 = smov [#allocation7]  }
  0x1c   : > { %s3374_s26 = scalar_select %p2957_p10, 1, 0 }
  0x1d   : > { %s3375_s27 = scalar_select %p2961_p11, 1, 0 }
  0x1e   : > { %p2476_p12 = pneg %p2957_p10  ;;  %s489_s23 = sshll.u32 %s2794_s20, 4  ;;  %s490_s23 = int_to_ptr.vmem [resolvable:$true] %s489_s23 }
  0x1f   : > { %s2795_s22 = smov [#allocation4]   ;;  %s2611_s1 = scalar_lea.vmem %s490_s23, 16 }
  0x20   : > { %p2969_p13 = pnand %p2961_p11, %p2476_p12  ;;  %s475_s0 = sshll.u32 %s2795_s22, 4  ;;  %s476_s0 = int_to_ptr.vmem [resolvable:$true] %s475_s0 }
  0x21   : > { %p2612_p1 = scmp.ne.s32.totalorder %s490_s23, %s2611_s1  ;;  %s2618_s20 = scalar_lea.vmem %s490_s23, 32 }
  0x22   : > { %p2602_p0 = pneg %p2969_p13  ;;  %p2619_p5 = scmp.lt.s32.totalorder %s490_s23, %s490_s23 }
  0x23   : > { %p2620_p6 = scmp.lt.s32.totalorder %s2618_s20, %s2611_s1 }
  0x24   : > { %p2614_p2 = pnand %p2612_p1, %p2602_p0 }
  0x25   : > { %p2621_p7 = por %p2620_p6, %p2619_p5 }
  0x26   : > { %p2615_p3 = pneg %p2614_p2 }
  0x28   : > { %p2622_p9 = pnand %p2621_p7, %p2615_p3 }
  0x2a   : > { %2625 = shalt.err (!%p2622_p9)
}
  0x2b   : > { %s3377_s3 = sld [smem:[#allocation27_spill]]  ;;  %s2637_s22 = scalar_lea.vmem %s476_s0, 128 }
  0x2c   : > { %p2638_p12 = scmp.ne.s32.totalorder %s476_s0, %s2637_s22  ;;  %p2645_p2 = scmp.lt.s32.totalorder %s476_s0, %s476_s0 }
  0x2d   : > { %p2646_p4 = scmp.lt.s32.totalorder %s2637_s22, %s2637_s22 }
  0x2e   : > { %p2640_p8 = pnand %p2638_p12, %p2602_p0 }
  0x2f   : > { %p2647_p11 = por %p2646_p4, %p2645_p2 }
  0x30   : > { %p2641_p1 = pneg %p2640_p8 }
  0x31   : > { %2482 = dma.hbm_to_vmem [thread:$0]  (!%p2969_p13), %s3377_s3, 16, %s490_s23, [#allocation8]  }
  0x32   : > { %p2648_p10 = pnand %p2647_p11, %p2641_p1 }
  0x34   : > { %2651 = shalt.err (!%p2648_p10)
}
  0x35   : > { %s3378_s24 = sld [smem:[#allocation25_spill]]  ;;  %s2796_s29 = smov [#allocation9]  }
  0x36   : > { %s503_s25 = sshll.u32 %s2796_s29, 4  ;;  %s2797_s23 = smov [#allocation10]   ;;  %s504_s25 = int_to_ptr.vmem [resolvable:$true] %s503_s25 }
  0x37   : > { %s523_s3 = sshll.u32 %s2797_s23, 4  ;;  %s2663_s19 = scalar_lea.vmem %s504_s25, 16  ;;  %s524_s3 = int_to_ptr.vmem [resolvable:$true] %s523_s3 }
  0x38   : > { %p2664_p3 = scmp.ne.s32.totalorder %s504_s25, %s2663_s19  ;;  %s2670_s22 = scalar_lea.vmem %s504_s25, 32 }
  0x39   : > { %p2671_p10 = scmp.lt.s32.totalorder %s504_s25, %s504_s25  ;;  %p2672_p11 = scmp.lt.s32.totalorder %s2670_s22, %s2663_s19 }
  0x3a   : > { %p2666_p8 = pnand %p2664_p3, %p2602_p0 }
  0x3b   : > { %2479 = dma.hbm_to_vmem [thread:$0]  (!%p2969_p13), %s3378_s24, 128, %s476_s0, [#allocation5]  }
  0x3c   : > { %p2667_p4 = pneg %p2666_p8  ;;  %p2673_p5 = por %p2672_p11, %p2671_p10 }
  0x3e   : > { %p2674_p6 = pnand %p2673_p5, %p2667_p4 }
  0x40   : > { %2677 = shalt.err (!%p2674_p6)
}
  0x41   : > { %2485 = dma.hbm_to_vmem [thread:$0]  (!%p2969_p13), %s3336_s5, 16, %s504_s25, [#allocation8]  }
  0x42   : > { %s2689_s1 = scalar_lea.vmem %s524_s3, 16  ;;  %s2696_s20 = scalar_lea.vmem %s524_s3, 32 }
  0x43   : > { %p2690_p7 = scmp.ne.s32.totalorder %s524_s3, %s2689_s1  ;;  %p2697_p1 = scmp.lt.s32.totalorder %s524_s3, %s524_s3 }
  0x44   : > { %p2698_p2 = scmp.lt.s32.totalorder %s2696_s20, %s2689_s1 }
  0x45   : > { %p2692_p9 = pnand %p2690_p7, %p2602_p0 }
  0x46   : > { %p2699_p3 = por %p2698_p2, %p2697_p1 }
  0x47   : > { %p2693_p12 = pneg %p2692_p9 }
  0x49   : > { %p2700_p8 = pnand %p2699_p3, %p2693_p12 }
  0x4b   : > { %2703 = shalt.err (!%p2700_p8)
}
  0x4c   : > { %2488 = dma.hbm_to_vmem [thread:$0]  (!%p2969_p13), %s3340_s9, 16, %s524_s3, [#allocation11]  }
  0x4d   : > { %p3379_p4 = scmp.ne.s32.totalorder %s3374_s26, 0 }
  0x4e   : > { %p3380_p10 = scmp.ne.s32.totalorder (!%p3379_p4), %s3375_s27, 0 }
  0x4f   : > { %567 = sbr.rel (%p3379_p4) target bundleno = 2422 (0x976), region = 92 }
  0x54   : > { %2755 = dma.done.wait (%p3380_p10), [#allocation5], 128  }
  0x55   : > { %2757 = vsyncadd (%p3380_p10), [#allocation5], 4294967168 }
  0x56   : > { %2759 = dma.done.wait (%p3380_p10), [#allocation8], 32  }
  0x57   : > { %2761 = vsyncadd (%p3380_p10), [#allocation8], 4294967264 }
  0x58   : > { %2763 = dma.done.wait (%p3380_p10), [#allocation11], 16  }
  0x59   : > { %2765 = vsyncadd (%p3380_p10), [#allocation11], 4294967280  ;;  %p632_p13 = scmp.lt.s32.totalorder %s2784_s30, 1  ;;  %s3381_s23 = sld [smem:[#allocation24_spill]]  ;;  %vm644_vm0 = vcmask 261120   ;;  %v1036_v1 = vld [vmem:[#allocation4] sm:$0xff]  ;;  %v893_v61 = vlaneseq }
  0x5a   : > { %v2564_v14 = vld [vmem:[%s3335_s4 + $0x8] sm:$0xff]   ;;  %v2798_v15 = vmov 0.0   ;;  %vm2799_vm1 = vmmov 0   ;;  %v2565_v16 = vld [vmem:[%s3335_s4] sm:$0xff]   ;;  %s3382_s29 = sld [smem:[#allocation26_spill]]  ;;  %v2800_v36 = vmov 0  }
  0x5b   : > { %s633_s3 = scalar_select %p632_p13, %s2784_s30, 1  ;;  %2358 = vmatprep.subr.bf16.mxu0 %v2798_v15  ;;  %2362 = vmatprep.mubr.msk.bf16.mxu0 %vm2799_vm1, %v2798_v15  ;;  %v2264_v26 = vld [vmem:[#allocation7] ss:$0 sm:$0xff]  ;;  %v2566_v34 = vld [vmem:[%s3337_s6] sm:$0xff]   ;;  %v2265_v47 = vld [vmem:[#allocation9] ss:$0 sm:$0xff] }
  0x5c   : > { %2359 = vmatpush3.bf16.msra.mxu0 %v2564_v14  ;;  %2346 = vmatprep.mubr.msk.bf16.mxu1 %vm644_vm0, %v2566_v34  ;;  %v713_v35 = vld [vmem:[%s3338_s7] sm:$0xff]  ;;  %v2567_v43 = vld [vmem:[%s3337_s6 + $0x8] sm:$0xff]   ;;  %s2801_s20 = smov 120   ;;  %s2802_s19 = smov 112   ;;  %v715_v55 = vld [vmem:[%s3338_s7 + $0x10] sm:$0xff]  ;;  %vm806_vm2 = vcmask 60416  }
  0x5d   : > { %s2250_s21 = sshll.u32 %s633_s3, 3  ;;  %2360 = vmatprep.subr.bf16.mxu0 %v2798_v15  ;;  %2562 = vset.pattern.permute.xlu1 %v2800_v36  ;;  %v2568_v44 = vld [vmem:[%s3339_s8 + $0x8] sm:$0xff]   ;;  %v2569_v45 = vld [vmem:[%s3339_s8] sm:$0xff]   ;;  %v716_v56 = vld [vmem:[%s3338_s7 + $0x18] sm:$0xff]  ;;  %v2804_v59 = vmov 1983009808  }
  0x5e   : > { %v714_v54 = vld [vmem:[%s3338_s7 + $0x8] sm:$0xff]  ;;  %v891_v60 = vunpack.c.l.s4 %v2804_v59  ;;  %vm1295_vm3 = vcmask 1043456   ;;  %vm1291_vm4 = vcmask 64512   ;;  %vm2062_vm5 = vcmask 523264   ;;  %s629_s24 = sand.u32 1, %s2776_s28   ;;  %p3383_p11 = scmp.ne.s32.totalorder %s3370_s2, 0 }
  0x5f   : > { %s635_s22 = scalar_lea.vmem %s3381_s23, %s2250_s21  ;;  %s2249_s1 = sshll.u32 %s629_s24, 3 }
  0x60   : > { %v1034_v0 = vld [vmem:[%s635_s22] sm:$0xff]  ;;  %2361 = vmatpush3.bf16.msra.mxu0 %v2565_v16  ;;  %v892_v63 = vunpack.c.0.s8 %v891_v60  ;;  %s631_s3 = scalar_lea.vmem [#allocation12], %s2249_s1  ;;  %s2806_s27 = smov [#allocation12]  }
  0x61   : > { %v3026_v2 = vadd.f32 %v1036_v1, %v1034_v0  ;;  %2372 = vmatprep.subr.bf16.mxu0 %v2798_v15  ;;  %v2263_v24 = vld [vmem:[%s3382_s29] ss:$0 sm:$0xff]  ;;  %s2803_s29 = smov 104   ;;  %v894_v0 = vshrl.u32 %v893_v61, 7  ;;  %s2123_s21 = sshll.u32 %s631_s3, 4  ;;  %s3286_s21 = int_to_ptr.vmem [resolvable:$true] %s2123_s21 }
  0x62   : > { %s2704_s22 = scalar_lea.vmem %s3286_s21, 128  ;;  %s2708_s0 = sshll.u32 %s2806_s27, 4  ;;  %s2709_s0 = int_to_ptr.vmem [resolvable:$false] %s2708_s0 }
  0x63   : > { %v1039_v3 = vsel %vm644_vm0, %v3026_v2, 0.0  ;;  %p2705_p0 = scmp.ne.s32.totalorder %s3286_s21, %s2704_s22  ;;  %s2710_s1 = scalar_lea.vmem %s2709_s0, 256 }
  0x64   : > { %1040 = vadd.xlane.f32.xlu0 %v1039_v3  ;;  %p2711_p7 = scmp.lt.s32.totalorder %s3286_s21, %s2709_s0  ;;  %p2712_p9 = scmp.lt.s32.totalorder %s2710_s1, %s2704_s22 }
  0x65   : > { %p2706_p5 = pnand %p2705_p0, %p3383_p11 }
  0x66   : > { %p2713_p12 = por %p2712_p9, %p2711_p7 }
  0x67   : > { %p2707_p6 = pneg %p2706_p5 }
  0x68   : > { %646 = vadd.xlane.f32.xlu0 %v1039_v3  ;;  %v2805_v3 = vmov 1934713408  }
  0x69   : > { %p2714_p1 = pnand %p2713_p12, %p2707_p6 }
  0xed   : > { %v1041_v4 = vpop.xlane.xlu0 %1040 }
  0xee   : > { %v1043_v5 = vmul.f32 0.03125, %v1041_v4  ;;  %v923_v4 = vunpack.c.l.s4 %v2805_v3 }
  0xf0   : > { %v1044_v6 = vsub.f32 %v3026_v2, %v1043_v5 }
  0xf1   : > { %v647_v7 = vpop.xlane.xlu0 %646 }
  0xf2   : > { %v649_v8 = vmul.f32 0.03125, %v647_v7  ;;  %v1045_v9 = vmul.f32 %v1044_v6, %v1044_v6  ;;  %v3088_v7 = vsub.s32 %v892_v63, %v894_v0 }
  0xf4   : > { %v650_v10 = vsub.f32 %v3026_v2, %v649_v8  ;;  %v1046_v11 = vsel %vm644_vm0, %v1045_v9, 0.0 }
  0xf5   : > { %1047 = vadd.xlane.f32.xlu1 %v1046_v11 }
  0xf6   : > { %v651_v12 = vmul.f32 %v650_v10, %v650_v10 }
  0xf8   : > { %v652_v13 = vsel %vm644_vm0, %v651_v12, 0.0 }
  0xf9   : > { %653 = vadd.xlane.f32.xlu1 %v652_v13 }
 0x10a   : > { %719 = vperm.xlu1 %2562, %v713_v35  }
 0x17e   : > { %v1048_v17 = vpop.xlane.xlu1 %1047 }
 0x17f   : > { %v1049_v18 = vmul.f32 0.03125, %v1048_v17 }
 0x181   : > { %v1050_v19 = vadd.f32 1e-05, %v1049_v18 }
 0x182   : > { %v654_v20 = vpop.xlane.xlu1 %653 }
 0x183   : > { %2576 = vrsqrt.f32 %v1050_v19  ;;  %v655_v21 = vmul.f32 0.03125, %v654_v20 }
 0x185   : > { %v656_v22 = vadd.f32 1e-05, %v655_v21 }
 0x186   : > { %v720_v57 = vpop.permute.xlu1 %719 }
 0x187   : > { %2578 = vrsqrt.f32 %v656_v22 }
 0x190   : > { %v2577_v23 = vpop.eup %2576 }
 0x191   : > { %v1052_v25 = vmul.f32 %v2577_v23, %v1044_v6 }
 0x193   : > { %v1060_v27 = vmul.f32 %v2263_v24, %v1052_v25 }
 0x194   : > { %v2579_v28 = vpop.eup %2578 }
 0x195   : > { %v1068_v29 = vadd.f32 %v2264_v26, %v1060_v27  ;;  %v658_v30 = vmul.f32 %v2579_v28, %v650_v10  ;;  %v924_v10 = vunpack.c.0.s8 %v923_v4 }
 0x197   : > { %v1069_v31 = vpack.c.bf16 %v1068_v29, %v1068_v29  ;;  %v666_v32 = vmul.f32 %v2263_v24, %v658_v30  ;;  %v3094_v16 = vsub.s32 %v924_v10, %v894_v0 }
 0x199   : > { %2363 = vmatmul.mubr.msk.bf16.vlgmr.msra.gmra.mxu0 %vm644_vm0, %v1069_v31  ;;  %v674_v33 = vadd.f32 %v2264_v26, %v666_v32 }
 0x19a   : > { %2374 = vmatprep.mubr.msk.bf16.mxu0 %vm2799_vm1, %v2798_v15 }
 0x19b   : > { %675 = vxpose.xlu0.b32.start.end [1/1] (short) (narrow) %v674_v33, 32  ;;  %v811_v46 = vpack.c.bf16 %v674_v33, %v674_v33 }
 0x1c4   : > { %2563 = vset.pattern.permute.xlu0 %v2800_v36 }
 0x217   : > { %v691_v37 = vpop.trf.xlu0 }
 0x21b   : > { %v692_v38 = vpop.trf.xlu0 }
 0x21c   : > { %v707_v42 = vpack.c.bf16 %v692_v38, %v691_v37 }
 0x21f   : > { %v693_v39 = vpop.trf.xlu0 }
 0x223   : > { %v694_v40 = vpop.trf.xlu0 }
 0x224   : > { %v708_v41 = vpack.c.bf16 %v694_v40, %v693_v39 }
 0x226   : > { %2342 = vmatprep.subr.bf16.mxu1 %v708_v41 }
 0x227   : > { %2343 = vmatpush3.bf16.msra.mxu1 %v708_v41 }
 0x228   : > { %2344 = vmatprep.subr.bf16.mxu1 %v707_v42 }
 0x22b   : > { %2345 = vmatpush3.bf16.msra.mxu1 %v707_v42 }
 0x22c   : > { %2350 = vmatprep.subr.bf16.mxu1 %v2798_v15 }
 0x22e   : > { %2347 = vmatmul.mubr.msk.bf16.vlgmr.msra.gmra.mxu1 %vm644_vm0, %v2567_v43 }
 0x22f   : > { %2351 = vmatpush3.bf16.msra.mxu1 %v2568_v44  ;;  %2354 = vmatprep.mubr.msk.bf16.mxu1 %vm2799_vm1, %v2798_v15 }
 0x230   : > { %2352 = vmatprep.subr.bf16.mxu1 %v2798_v15 }
 0x233   : > { %2353 = vmatpush3.bf16.msra.mxu1 %v2569_v45 }
 0x234   : > { %2366 = vmatprep.subr.bf16.mxu1 %v2798_v15 }
 0x236   : > { %2355 = vmatmul.mubr.msk.bf16.vlgmr.msra.gmra.mxu1 %vm644_vm0, %v811_v46 }
 0x237   : > { %2368 = vmatprep.mubr.msk.bf16.mxu1 %vm2799_vm1, %v2798_v15 }
 0x259   : > { %v1130_v48 = vpop.f32.mrf.mxu0 }
 0x25a   : > { %v1131_v49 = vadd.f32 %v2265_v47, %v1130_v48 }
 0x25b   : > { %v2364_v50 = vpop.f32.mrf.mxu0 }
 0x25c   : > { %v1136_v51 = vmul.f32 0.35355338, %v1131_v49 }
 0x25d   : > { %v1133_v52 = vpop.f32.mrf.mxu0 }
 0x25e   : > { %1138 = vrot.lane.b32.xlu1 %v1136_v51, %s2801_s20 }
 0x25f   : > { %v2365_v53 = vpop.f32.mrf.mxu0 }
 0x262   : > { %1141 = vrot.lane.b32.xlu1 %v1136_v51, %s2802_s19 }
 0x266   : > { %1144 = vrot.lane.b32.xlu1 %v1136_v51, %s2803_s29 }
 0x26a   : > { %724 = vperm.xlu1 %2562, %v714_v54  }
 0x26e   : > { %729 = vperm.xlu1 %2562, %v715_v55  }
 0x272   : > { %734 = vperm.xlu1 %2562, %v716_v56  }
 0x2d0   : > { %v1139_v58 = vpop.permute.xlu1 %1138 }
 0x2d4   : > { %v1142_v62 = vpop.permute.xlu1 %1141 }
 0x2d5   : > { %v1147_v8 = vcombine.low %v1136_v51, %v1142_v62  ;;  %v1148_v9 = vcombine.high %v1136_v51, %v1142_v62 }
 0x2d7   : > { %v1155_v13 = vrot.slane %v1147_v8, %v3088_v7  ;;  %v1162_v14 = vrot.slane %v1148_v9, %v3088_v7 }
 0x2d8   : > { %v1145_v1 = vpop.permute.xlu1 %1144 }
 0x2d9   : > { %v1163_v5 = vcombine.low %v1139_v58, %v1145_v1  ;;  %v1164_v6 = vcombine.high %v1139_v58, %v1145_v1 }
 0x2db   : > { %v1171_v11 = vrot.slane %v1163_v5, %v3088_v7  ;;  %v1178_v12 = vrot.slane %v1164_v6, %v3088_v7 }
 0x2dd   : > { %v1179_v17 = vcombine.low %v1155_v13, %v1171_v11  ;;  %v1180_v18 = vcombine.high %v1155_v13, %v1171_v11  ;;  %v1195_v19 = vcombine.low %v1162_v14, %v1178_v12  ;;  %v1196_v20 = vcombine.high %v1162_v14, %v1178_v12 }
 0x2df   : > { %v1187_v21 = vrot.slane %v1179_v17, %v3094_v16  ;;  %v1194_v22 = vrot.slane %v1180_v18, %v3094_v16  ;;  %v1203_v24 = vrot.slane %v1195_v19, %v3094_v16  ;;  %v1210_v25 = vrot.slane %v1196_v20, %v3094_v16 }
 0x2e1   : > { %v1215_v26 = vcombine.low %v1187_v21, %v1194_v22  ;;  %v2269_v27 = vcombine.high %v1187_v21, %v1194_v22  ;;  %v1231_v28 = vcombine.low %v1203_v24, %v1210_v25  ;;  %v2270_v29 = vcombine.high %v1203_v24, %v1210_v25 }
 0x2e3   : > { %v1222_v31 = vrot.slane %v1215_v26, %v3088_v7  ;;  %v1230_v33 = vrot.slane %v2269_v27, %v3088_v7  ;;  %v1238_v34 = vrot.slane %v1231_v28, %v3088_v7  ;;  %v1246_v35 = vrot.slane %v2270_v29, %v3088_v7 }
 0x2e5   : > { %v725_v23 = vpop.permute.xlu1 %724  ;;  %v1247_v42 = vcombine.low %v1222_v31, %v1230_v33  ;;  %v1263_v43 = vcombine.low %v1238_v34, %v1246_v35  ;;  %v1248_v55 = vcombine.high %v1222_v31, %v1230_v33  ;;  %v1264_v56 = vcombine.high %v1238_v34, %v1246_v35 }
 0x2e7   : > { %v1255_v51 = vrot.slane %v1247_v42, %v3094_v16  ;;  %v1271_v52 = vrot.slane %v1263_v43, %v3094_v16  ;;  %v1262_v0 = vrot.slane %v1248_v55, %v3094_v16  ;;  %v1278_v1 = vrot.slane %v1264_v56, %v3094_v16 }
 0x2e9   : > { %v730_v30 = vpop.permute.xlu1 %729  ;;  %v1280_v63 = vcombine.high %v1255_v51, %v1271_v52  ;;  %v1281_v9 = vcombine.low %v1262_v0, %v1278_v1  ;;  %v1282_v12 = vcombine.high %v1262_v0, %v1278_v1 }
 0x2eb   : > { %v1284_v8 = vpack.c.bf16 %v1280_v63, %v1280_v63  ;;  %v1285_v11 = vpack.c.bf16 %v1281_v9, %v1281_v9  ;;  %v1286_v13 = vpack.c.bf16 %v1282_v12, %v1282_v12 }
 0x2ed   : > { %v735_v40 = vpop.permute.xlu1 %734 }
 0x2ee   : > { %v2348_v32 = vpop.f32.mrf.mxu1 }
 0x2ef   : > { %v796_v36 = vadd.f32 %v2348_v32, %v730_v30 }
 0x2f0   : > { %v787_v37 = vpop.f32.mrf.mxu1 }
 0x2f1   : > { %v804_v38 = vpack.c.bf16 %v796_v36, %v796_v36  ;;  %v788_v39 = vadd.f32 %v787_v37, %v720_v57  ;;  %v1279_v57 = vcombine.low %v1255_v51, %v1271_v52  ;;  %v2257_v36 = vld [vmem:[#allocation10] ss:$0 sm:$0xff] }
 0x2f2   : > { %v2349_v41 = vpop.f32.mrf.mxu1 }
 0x2f3   : > { %809 = vst.msk [vmem:[#allocation2 + $0x8] sm:$0xf] %vm806_vm2, %v804_v38  ;;  %v802_v44 = vpack.c.bf16 %v788_v39, %v788_v39  ;;  %v799_v45 = vadd.f32 %v2349_v41, %v735_v40  ;;  %v1283_v62 = vpack.c.bf16 %v1279_v57, %v1279_v57 }
 0x2f4   : > { %v790_v46 = vpop.f32.mrf.mxu1 }
 0x2f5   : > { %807 = vst.msk [vmem:[#allocation2] sm:$0xf] %vm806_vm2, %v802_v44  ;;  %v805_v47 = vpack.c.bf16 %v799_v45, %v799_v45  ;;  %v791_v48 = vadd.f32 %v790_v46, %v725_v23 }
 0x2f6   : > { %v3106_v49 = vpop.f32.mrf.mxu1 }
 0x2f7   : > { %810 = vst.msk [vmem:[#allocation2 + $0xc] sm:$0xf] %vm806_vm2, %v805_v47  ;;  %v803_v50 = vpack.c.bf16 %v791_v48, %v791_v48  ;;  %v873_v37 = vadd.f32 %v2257_v36, %v3106_v49 }
 0x2f8   : > { %v2356_v53 = vpop.f32.mrf.mxu1 }
 0x2f9   : > { %808 = vst.msk [vmem:[#allocation2 + $0x4] sm:$0xf] %vm806_vm2, %v803_v50 }
 0x2fa   : > { %v875_v54 = vpop.f32.mrf.mxu1  ;;  %v1289_v61 = vld [vmem:[#allocation2 + $0x8] sm:$0xf] }
 0x2fb   : > { %v1389_v5 = vsel %vm1295_vm3, %v1289_v61, 0 }
 0x2fc   : > { %v2357_v58 = vpop.f32.mrf.mxu1  ;;  %v1287_v59 = vld [vmem:[#allocation2] sm:$0xf] }
 0x2fd   : > { %v1297_v60 = vsel %vm1295_vm3, %v1287_v59, 0 }
 0x2fe   : > { %2367 = vmatpush3.bf16.msra.mxu1 %v1297_v60  ;;  %v1290_v6 = vld [vmem:[#allocation2 + $0xc] sm:$0xf] }
 0x2ff   : > { %2378 = vmatprep.subr.bf16.mxu1 %v2798_v15  ;;  %v1435_v10 = vsel %vm1295_vm3, %v1290_v6, 0 }
 0x300   : > { %v1288_v3 = vld [vmem:[#allocation2 + $0x4] sm:$0xf] }
 0x301   : > { %2369 = vmatmul.mubr.msk.bf16.vlgmr.msra.gmra.mxu1 %vm1291_vm4, %v1283_v62  ;;  %v1343_v4 = vsel %vm1295_vm3, %v1288_v3, 0 }
 0x302   : > { %2373 = vmatpush3.bf16.msra.mxu0 %v1343_v4  ;;  %2379 = vmatpush3.bf16.msra.mxu1 %v1389_v5 }
 0x303   : > { %2384 = vmatprep.subr.bf16.mxu0 %v2798_v15  ;;  %2380 = vmatprep.mubr.msk.bf16.mxu1 %vm2799_vm1, %v2798_v15 }
 0x304   : > { %2390 = vmatprep.subr.bf16.mxu1 %v2798_v15 }
 0x305   : > { %2375 = vmatmul.mubr.msk.bf16.vlgmr.msra.gmra.mxu0 %vm1291_vm4, %v1284_v8 }
 0x306   : > { %2385 = vmatpush3.bf16.msra.mxu0 %v1435_v10  ;;  %2386 = vmatprep.mubr.msk.bf16.mxu0 %vm2799_vm1, %v2798_v15 }
 0x307   : > { %2396 = vmatprep.subr.bf16.mxu0 %v2798_v15 }
 0x309   : > { %2381 = vmatmul.mubr.msk.bf16.vlgmr.msra.gmra.mxu1 %vm1291_vm4, %v1285_v11 }
 0x30a   : > { %2392 = vmatprep.mubr.msk.bf16.mxu1 %vm2799_vm1, %v2798_v15 }
 0x30d   : > { %2387 = vmatmul.mubr.msk.bf16.vlgmr.msra.gmra.mxu0 %vm1291_vm4, %v1286_v13 }
 0x30e   : > { %2398 = vmatprep.mubr.msk.bf16.mxu0 %vm2799_vm1, %v2798_v15 }
 0x3c1   : > { %v1333_v14 = vpop.f32.mrf.mxu1 }
 0x3c2   : > { %v1477_v17 = vsel %vm1291_vm4, %v1333_v14, -inf }
 0x3c3   : > { %1478 = vmax.xlane.f32.xlu1 %v1477_v17  ;;  %v2370_v18 = vpop.f32.mrf.mxu1 }
 0x3c5   : > { %v1336_v19 = vpop.f32.mrf.mxu1  ;;  %v1379_v20 = vpop.f32.mrf.mxu0 }
 0x3c6   : > { %v1480_v21 = vsel %vm1291_vm4, %v1379_v20, -inf }
 0x3c7   : > { %v2371_v22 = vpop.f32.mrf.mxu1  ;;  %1481 = vmax.xlane.f32.xlu0 %v1480_v21  ;;  %v2376_v23 = vpop.f32.mrf.mxu0 }
 0x3c9   : > { %v1382_v24 = vpop.f32.mrf.mxu0  ;;  %v1425_v25 = vpop.f32.mrf.mxu1 }
 0x3ca   : > { %v1483_v26 = vsel %vm1291_vm4, %v1425_v25, -inf }
 0x3cb   : > { %v2377_v27 = vpop.f32.mrf.mxu0  ;;  %1484 = vmax.xlane.f32.xlu1 %v1483_v26  ;;  %v2382_v28 = vpop.f32.mrf.mxu1 }
 0x3cd   : > { %v1428_v29 = vpop.f32.mrf.mxu1  ;;  %v1471_v30 = vpop.f32.mrf.mxu0 }
 0x3ce   : > { %v1486_v31 = vsel %vm1291_vm4, %v1471_v30, -inf }
 0x3cf   : > { %v2383_v32 = vpop.f32.mrf.mxu1  ;;  %1487 = vmax.xlane.f32.xlu1 %v1486_v31  ;;  %v2388_v33 = vpop.f32.mrf.mxu0 }
 0x3d1   : > { %v1474_v34 = vpop.f32.mrf.mxu0 }
 0x3d3   : > { %v2389_v35 = vpop.f32.mrf.mxu0 }
 0x3dd   : > { %882 = vrot.lane.b32.xlu0 %v873_v37, %s2802_s19 }
 0x3e0   : > { %879 = vrot.lane.b32.xlu1 %v873_v37, %s2801_s20 }
 0x3e4   : > { %885 = vrot.lane.b32.xlu1 %v873_v37, %s2803_s29  ;;  %s2297_s29 = sshll.u32 %s2784_s30, 7  ;;  %s2109_s30 = scalar_lea.sflag [#allocation6], %s629_s24 }
 0x3e5   : > { %s3284_s23 = scalar_lea.hbm %s3349_s18, %s2297_s29 }
 0x44c   : > { %v1479_v38 = vpop.xlane.xlu1 %1478 }
 0x44d   : > { %v1489_v39 = vsub.f32 %v1333_v14, %v1479_v38 }
 0x44f   : > { %v1493_v40 = vmul.f32 1.442695, %v1489_v39 }
 0x450   : > { %v1482_v41 = vpop.xlane.xlu0 %1481 }
 0x451   : > { %2580 = vpow2.f32 %v1493_v40  ;;  %v1490_v42 = vsub.f32 %v1379_v20, %v1482_v41 }
 0x453   : > { %v1495_v43 = vmul.f32 1.442695, %v1490_v42 }
 0x454   : > { %v1485_v44 = vpop.xlane.xlu1 %1484  ;;  %v883_v49 = vpop.permute.xlu0 %882 }
 0x455   : > { %2582 = vpow2.f32 %v1495_v43  ;;  %v1491_v45 = vsub.f32 %v1425_v25, %v1485_v44  ;;  %v888_v53 = vcombine.low %v873_v37, %v883_v49  ;;  %v889_v54 = vcombine.high %v873_v37, %v883_v49 }
 0x457   : > { %v1497_v46 = vmul.f32 1.442695, %v1491_v45  ;;  %v896_v60 = vrot.slane %v888_v53, %v3088_v7  ;;  %v903_v61 = vrot.slane %v889_v54, %v3088_v7 }
 0x458   : > { %v1488_v47 = vpop.xlane.xlu1 %1487 }
 0x459   : > { %2584 = vpow2.f32 %v1497_v46  ;;  %v1492_v48 = vsub.f32 %v1471_v30, %v1488_v47 }
 0x45b   : > { %v1499_v50 = vmul.f32 1.442695, %v1492_v48 }
 0x45c   : > { %v880_v51 = vpop.permute.xlu1 %879 }
 0x45d   : > { %2586 = vpow2.f32 %v1499_v50 }
 0x45e   : > { %v3142_v52 = vpop.eup %2580 }
 0x45f   : > { %v1501_v55 = vsel %vm1291_vm4, %v3142_v52, 0.0 }
 0x460   : > { %1502 = vadd.xlane.f32.xlu1 %v1501_v55  ;;  %v886_v56 = vpop.permute.xlu1 %885 }
 0x461   : > { %v904_v57 = vcombine.low %v880_v51, %v886_v56  ;;  %v905_v58 = vcombine.high %v880_v51, %v886_v56 }
 0x462   : > { %v3146_v59 = vpop.eup %2582 }
 0x463   : > { %v912_v62 = vrot.slane %v904_v57, %v3088_v7  ;;  %v919_v63 = vrot.slane %v905_v58, %v3088_v7  ;;  %v1504_v0 = vsel %vm1291_vm4, %v3146_v59, 0.0 }
 0x464   : > { %1505 = vadd.xlane.f32.xlu0 %v1504_v0 }
 0x465   : > { %v920_v1 = vcombine.low %v896_v60, %v912_v62  ;;  %v921_v3 = vcombine.high %v896_v60, %v912_v62  ;;  %v936_v4 = vcombine.low %v903_v61, %v919_v63  ;;  %v937_v5 = vcombine.high %v903_v61, %v919_v63  ;;  %v1717_v63 = vld [vmem:[%s3341_s10] sm:$0xf] }
 0x466   : > { %v3154_v6 = vpop.eup %2584  ;;  %v1725_v0 = vsel %vm1295_vm3, %v1717_v63, 0 }
 0x467   : > { %v928_v8 = vrot.slane %v920_v1, %v3094_v16  ;;  %v935_v9 = vrot.slane %v921_v3, %v3094_v16  ;;  %v944_v10 = vrot.slane %v936_v4, %v3094_v16  ;;  %v951_v11 = vrot.slane %v937_v5, %v3094_v16  ;;  %v1718_v1 = vld [vmem:[%s3341_s10 + $0x4] sm:$0xf]  ;;  %v1719_v4 = vld [vmem:[%s3341_s10 + $0x8] sm:$0xf] }
 0x468   : > { %v1507_v12 = vsel %vm1291_vm4, %v3154_v6, 0.0  ;;  %v1771_v3 = vsel %vm1295_vm3, %v1718_v1, 0 }
 0x469   : > { %v956_v13 = vcombine.low %v928_v8, %v935_v9  ;;  %v2261_v14 = vcombine.high %v928_v8, %v935_v9  ;;  %v972_v17 = vcombine.low %v944_v10, %v951_v11  ;;  %v2262_v18 = vcombine.high %v944_v10, %v951_v11  ;;  %1508 = vadd.xlane.f32.xlu1 %v1507_v12  ;;  %v1720_v10 = vld [vmem:[%s3341_s10 + $0xc] sm:$0xf] }
 0x46a   : > { %v3162_v19 = vpop.eup %2586  ;;  %v1817_v8 = vsel %vm1295_vm3, %v1719_v4, 0 }
 0x46b   : > { %v963_v20 = vrot.slane %v956_v13, %v3088_v7  ;;  %v971_v21 = vrot.slane %v2261_v14, %v3088_v7  ;;  %v979_v22 = vrot.slane %v972_v17, %v3088_v7  ;;  %v987_v23 = vrot.slane %v2262_v18, %v3088_v7 }
 0x46c   : > { %v1510_v24 = vsel %vm1291_vm4, %v3162_v19, 0.0  ;;  %v1863_v14 = vsel %vm1295_vm3, %v1720_v10, 0  ;;  %v2572_v10 = vld [vmem:[%s3347_s16 + $0x18] sm:$0xff]  }
 0x46d   : > { %v988_v25 = vcombine.low %v963_v20, %v971_v21  ;;  %v989_v26 = vcombine.high %v963_v20, %v971_v21  ;;  %v1004_v27 = vcombine.low %v979_v22, %v987_v23  ;;  %v1005_v28 = vcombine.high %v979_v22, %v987_v23  ;;  %1511 = vadd.xlane.f32.xlu1 %v1510_v24 }
 0x46f   : > { %v996_v29 = vrot.slane %v988_v25, %v3094_v16  ;;  %v1003_v30 = vrot.slane %v989_v26, %v3094_v16  ;;  %v1012_v31 = vrot.slane %v1004_v27, %v3094_v16  ;;  %v1019_v32 = vrot.slane %v1005_v28, %v3094_v16 }
 0x471   : > { %v1020_v33 = vcombine.low %v996_v29, %v1012_v31  ;;  %v1021_v34 = vcombine.high %v996_v29, %v1012_v31  ;;  %v1022_v35 = vcombine.low %v1003_v30, %v1019_v32  ;;  %v1023_v7 = vcombine.high %v1003_v30, %v1019_v32 }
 0x473   : > { %v1024_v36 = vpack.c.bf16 %v1020_v33, %v1020_v33  ;;  %v1025_v37 = vpack.c.bf16 %v1021_v34, %v1021_v34  ;;  %v1026_v38 = vpack.c.bf16 %v1022_v35, %v1022_v35  ;;  %v1027_v39 = vpack.c.bf16 %v1023_v7, %v1023_v7 }
 0x475   : > { %1028 = vst.msk [vmem:[#allocation3] sm:$0xf] %vm806_vm2, %v1024_v36  ;;  %1029 = vst.msk [vmem:[#allocation3 + $0x4] sm:$0xf] %vm806_vm2, %v1025_v37 }
 0x476   : > { %1030 = vst.msk [vmem:[#allocation3 + $0x8] sm:$0xf] %vm806_vm2, %v1026_v38  ;;  %1031 = vst.msk [vmem:[#allocation3 + $0xc] sm:$0xf] %vm806_vm2, %v1027_v39 }
 0x47c   : > { %v1525_v40 = vld [vmem:[#allocation3] sm:$0xf]  ;;  %v1526_v41 = vld [vmem:[#allocation3 + $0x4] sm:$0xf] }
 0x47d   : > { %v1533_v16 = vsel %vm1295_vm3, %v1525_v40, 0  ;;  %v1579_v42 = vsel %vm1295_vm3, %v1526_v41, 0  ;;  %v1527_v49 = vld [vmem:[#allocation3 + $0x8] sm:$0xf]  ;;  %v1528_v55 = vld [vmem:[#allocation3 + $0xc] sm:$0xf] }
 0x47e   : > { %2391 = vmatpush3.bf16.msra.mxu1 %v1533_v16  ;;  %2397 = vmatpush3.bf16.msra.mxu0 %v1579_v42  ;;  %v1625_v53 = vsel %vm1295_vm3, %v1527_v49, 0 }
 0x47f   : > { %2402 = vmatprep.subr.bf16.mxu1 %v2798_v15  ;;  %2408 = vmatprep.subr.bf16.mxu0 %v2798_v15 }
 0x4e9   : > { %v1503_v43 = vpop.xlane.xlu1 %1502 }
 0x4ea   : > { %2588 = vrcp.f32 %v1503_v43 }
 0x4ed   : > { %v1506_v44 = vpop.xlane.xlu0 %1505 }
 0x4ee   : > { %2590 = vrcp.f32 %v1506_v44 }
 0x4f2   : > { %v1509_v45 = vpop.xlane.xlu1 %1508 }
 0x4f3   : > { %2592 = vrcp.f32 %v1509_v45 }
 0x4f6   : > { %v1512_v46 = vpop.xlane.xlu1 %1511 }
 0x4f7   : > { %v2589_v47 = vpop.eup %2588  ;;  %2594 = vrcp.f32 %v1512_v46 }
 0x4f8   : > { %v1517_v48 = vmul.f32 %v2589_v47, %v3142_v52  ;;  %v1671_v52 = vsel %vm1295_vm3, %v1528_v55, 0  ;;  %v2283_v47 = vld [vmem:[%s3342_s11] ss:$0 sm:$0xff] }
 0x4fa   : > { %v1521_v50 = vpack.c.bf16 %v1517_v48, %v1517_v48 }
 0x4fb   : > { %v2591_v51 = vpop.eup %2590 }
 0x4fc   : > { %2393 = vmatmul.mubr.msk.bf16.vlgmr.msra.gmra.mxu1 %vm1291_vm4, %v1521_v50  ;;  %v1518_v54 = vmul.f32 %v2591_v51, %v3146_v59 }
 0x4fd   : > { %2403 = vmatpush3.bf16.msra.mxu1 %v1625_v53  ;;  %2404 = vmatprep.mubr.msk.bf16.mxu1 %vm2799_vm1, %v2798_v15 }
 0x4fe   : > { %v1522_v56 = vpack.c.bf16 %v1518_v54, %v1518_v54  ;;  %2414 = vmatprep.subr.bf16.mxu1 %v2798_v15 }
 0x500   : > { %v2593_v57 = vpop.eup %2592  ;;  %2399 = vmatmul.mubr.msk.bf16.vlgmr.msra.gmra.mxu0 %vm1291_vm4, %v1522_v56 }
 0x501   : > { %2409 = vmatpush3.bf16.msra.mxu0 %v1671_v52  ;;  %v1519_v58 = vmul.f32 %v2593_v57, %v3154_v6  ;;  %2410 = vmatprep.mubr.msk.bf16.mxu0 %vm2799_vm1, %v2798_v15 }
 0x502   : > { %2420 = vmatprep.subr.bf16.mxu0 %v2798_v15 }
 0x503   : > { %v1523_v59 = vpack.c.bf16 %v1519_v58, %v1519_v58 }
 0x504   : > { %v2595_v60 = vpop.eup %2594 }
 0x505   : > { %2405 = vmatmul.mubr.msk.bf16.vlgmr.msra.gmra.mxu1 %vm1291_vm4, %v1523_v59  ;;  %v1520_v61 = vmul.f32 %v2595_v60, %v3162_v19 }
 0x506   : > { %2416 = vmatprep.mubr.msk.bf16.mxu1 %vm2799_vm1, %v2798_v15  ;;  %2415 = vmatpush3.bf16.msra.mxu1 %v1725_v0 }
 0x507   : > { %v1524_v62 = vpack.c.bf16 %v1520_v61, %v1520_v61  ;;  %2426 = vmatprep.subr.bf16.mxu1 %v2798_v15  ;;  %v2570_v61 = vld [vmem:[%s3345_s14 + $0x8] sm:$0xff]  }
 0x509   : > { %2411 = vmatmul.mubr.msk.bf16.vlgmr.msra.gmra.mxu0 %vm1291_vm4, %v1524_v62  ;;  %v2571_v62 = vld [vmem:[%s3345_s14] sm:$0xff]  }
 0x50a   : > { %2422 = vmatprep.mubr.msk.bf16.mxu0 %vm2799_vm1, %v2798_v15  ;;  %2421 = vmatpush3.bf16.msra.mxu0 %v1771_v3  ;;  %v2284_v3 = vld [vmem:[%s3343_s12] ss:$0 sm:$0xff] }
 0x50b   : > { %2432 = vmatprep.subr.bf16.mxu0 %v2798_v15 }
 0x5bc   : > { %v1569_v5 = vpop.f32.mrf.mxu1 }
 0x5bd   : > { %v1713_v6 = vpack.c.bf16 %v1569_v5, %v1569_v5  ;;  %v2285_v5 = vld [vmem:[%s3344_s13] ss:$0 sm:$0xff] }
 0x5be   : > { %v2394_v9 = vpop.f32.mrf.mxu1 }
 0x5bf   : > { %2417 = vmatmul.mubr.msk.bf16.vlgmr.msra.gmra.mxu1 %vm1291_vm4, %v1713_v6 }
 0x5c0   : > { %v1572_v11 = vpop.f32.mrf.mxu1  ;;  %v1615_v12 = vpop.f32.mrf.mxu0  ;;  %2427 = vmatpush3.bf16.msra.mxu1 %v1817_v8  ;;  %2428 = vmatprep.mubr.msk.bf16.mxu1 %vm2799_vm1, %v2798_v15 }
 0x5c1   : > { %v1714_v13 = vpack.c.bf16 %v1615_v12, %v1615_v12  ;;  %2438 = vmatprep.subr.bf16.mxu1 %v2798_v15  ;;  %v2573_v11 = vld [vmem:[%s3347_s16 + $0x10] sm:$0xff]   ;;  %v2574_v12 = vld [vmem:[%s3347_s16 + $0x8] sm:$0xff]  }
 0x5c2   : > { %v2395_v17 = vpop.f32.mrf.mxu1  ;;  %v2400_v18 = vpop.f32.mrf.mxu0 }
 0x5c3   : > { %2423 = vmatmul.mubr.msk.bf16.vlgmr.msra.gmra.mxu0 %vm1291_vm4, %v1714_v13  ;;  %v2575_v13 = vld [vmem:[%s3347_s16] sm:$0xff]  }
 0x5c4   : > { %v1618_v19 = vpop.f32.mrf.mxu0  ;;  %2433 = vmatpush3.bf16.msra.mxu0 %v1863_v14  ;;  %2434 = vmatprep.mubr.msk.bf16.mxu0 %vm2799_vm1, %v2798_v15  ;;  %v2286_v14 = vld [vmem:[%s3346_s15] ss:$0 sm:$0xff] }
 0x5c5   : > { %v1661_v20 = vpop.f32.mrf.mxu1  ;;  %2446 = vmatprep.subr.bf16.mxu0 %v2798_v15 }
 0x5c6   : > { %v1715_v21 = vpack.c.bf16 %v1661_v20, %v1661_v20  ;;  %v2401_v22 = vpop.f32.mrf.mxu0 }
 0x5c7   : > { %v2406_v23 = vpop.f32.mrf.mxu1 }
 0x5c8   : > { %2429 = vmatmul.mubr.msk.bf16.vlgmr.msra.gmra.mxu1 %vm1291_vm4, %v1715_v21 }
 0x5c9   : > { %v1664_v24 = vpop.f32.mrf.mxu1  ;;  %v1707_v25 = vpop.f32.mrf.mxu0  ;;  %2442 = vmatprep.mubr.msk.bf16.mxu1 %vm2799_vm1, %v2798_v15  ;;  %2439 = vmatpush3.bf16.msra.mxu1 %v2570_v61 }
 0x5ca   : > { %v1716_v26 = vpack.c.bf16 %v1707_v25, %v1707_v25  ;;  %2440 = vmatprep.subr.bf16.mxu1 %v2798_v15 }
 0x5cb   : > { %v2407_v27 = vpop.f32.mrf.mxu1  ;;  %v2412_v28 = vpop.f32.mrf.mxu0 }
 0x5cc   : > { %2435 = vmatmul.mubr.msk.bf16.vlgmr.msra.gmra.mxu0 %vm1291_vm4, %v1716_v26  ;;  %v2290_v27 = vld [vmem:[%s3348_s17] ss:$0 sm:$0xff] }
 0x5cd   : > { %v1710_v29 = vpop.f32.mrf.mxu0  ;;  %2454 = vmatprep.mubr.msk.bf16.mxu0 %vm2799_vm1, %v2798_v15  ;;  %2441 = vmatpush3.bf16.msra.mxu1 %v2571_v62 }
 0x5ce   : > { %2447 = vmatpush3.bf16.msra.mxu0 %v2572_v10 }
 0x5cf   : > { %v2413_v30 = vpop.f32.mrf.mxu0  ;;  %2448 = vmatprep.subr.bf16.mxu0 %v2798_v15 }
 0x5d2   : > { %2449 = vmatpush3.bf16.msra.mxu0 %v2573_v11 }
 0x5d3   : > { %2450 = vmatprep.subr.bf16.mxu0 %v2798_v15 }
 0x5d6   : > { %2451 = vmatpush3.bf16.msra.mxu0 %v2574_v12 }
 0x5d7   : > { %2452 = vmatprep.subr.bf16.mxu0 %v2798_v15 }
 0x5da   : > { %2453 = vmatpush3.bf16.msra.mxu0 %v2575_v13 }
 0x67f   : > { %v1761_v31 = vpop.f32.mrf.mxu1 }
 0x680   : > { %v1905_v39 = vsel %vm644_vm0, %v1761_v31, 0.0 }
 0x681   : > { %v2418_v32 = vpop.f32.mrf.mxu1 }
 0x683   : > { %v1764_v33 = vpop.f32.mrf.mxu1  ;;  %v1807_v34 = vpop.f32.mrf.mxu0 }
 0x684   : > { %v1906_v36 = vsel %vm644_vm0, %v1807_v34, 0.0 }
 0x685   : > { %v2419_v35 = vpop.f32.mrf.mxu1  ;;  %v2424_v7 = vpop.f32.mrf.mxu0  ;;  %v1907_v16 = vadd.f32 %v1906_v36, %v1905_v39 }
 0x687   : > { %v1810_v37 = vpop.f32.mrf.mxu0 }
 0x688   : > { %v1853_v38 = vpop.f32.mrf.mxu1 }
 0x689   : > { %v1908_v40 = vsel %vm644_vm0, %v1853_v38, 0.0  ;;  %v2425_v41 = vpop.f32.mrf.mxu0 }
 0x68a   : > { %v2430_v42 = vpop.f32.mrf.mxu1  ;;  %v1909_v43 = vadd.f32 %v1908_v40, %v1907_v16 }
 0x68c   : > { %v1856_v44 = vpop.f32.mrf.mxu1  ;;  %v1899_v45 = vpop.f32.mrf.mxu0 }
 0x68d   : > { %v1910_v46 = vsel %vm644_vm0, %v1899_v45, 0.0 }
 0x68e   : > { %v1911_v48 = vadd.f32 %v1910_v46, %v1909_v43  ;;  %v2431_v49 = vpop.f32.mrf.mxu1  ;;  %v2436_v50 = vpop.f32.mrf.mxu0 }
 0x690   : > { %v1919_v51 = vadd.f32 %v2283_v47, %v1911_v48  ;;  %v1902_v53 = vpop.f32.mrf.mxu0 }
 0x692   : > { %v2437_v54 = vpop.f32.mrf.mxu0  ;;  %v1920_v55 = vadd.f32 %v1919_v51, %v3026_v2 }
 0x694   : > { %v1921_v56 = vsel %vm644_vm0, %v1920_v55, 0.0 }
 0x695   : > { %1922 = vadd.xlane.f32.xlu1 %v1921_v56 }
 0x71e   : > { %v1923_v57 = vpop.xlane.xlu1 %1922 }
 0x71f   : > { %v1924_v52 = vmul.f32 0.03125, %v1923_v57 }
 0x721   : > { %v1925_v58 = vsub.f32 %v1920_v55, %v1924_v52 }
 0x723   : > { %v1926_v59 = vmul.f32 %v1925_v58, %v1925_v58 }
 0x725   : > { %v1927_v60 = vsel %vm644_vm0, %v1926_v59, 0.0 }
 0x726   : > { %1928 = vadd.xlane.f32.xlu1 %v1927_v60 }
 0x7af   : > { %v1929_v2 = vpop.xlane.xlu1 %1928 }
 0x7b0   : > { %v1930_v63 = vmul.f32 0.03125, %v1929_v2 }
 0x7b2   : > { %v1931_v0 = vadd.f32 1e-05, %v1930_v63 }
 0x7b4   : > { %2596 = vrsqrt.f32 %v1931_v0 }
 0x7c1   : > { %v2597_v1 = vpop.eup %2596 }
 0x7c2   : > { %v1933_v4 = vmul.f32 %v2597_v1, %v1925_v58 }
 0x7c4   : > { %v1941_v6 = vmul.f32 %v2284_v3, %v1933_v4 }
 0x7c6   : > { %v1949_v8 = vadd.f32 %v2285_v5, %v1941_v6 }
 0x7c8   : > { %v1950_v9 = vpack.c.bf16 %v1949_v8, %v1949_v8 }
 0x7ca   : > { %2443 = vmatmul.mubr.msk.bf16.vlgmr.msra.gmra.mxu1 %vm644_vm0, %v1950_v9 }
 0x88a   : > { %v2011_v17 = vpop.f32.mrf.mxu1 }
 0x88b   : > { %v2012_v18 = vadd.f32 %v2286_v14, %v2011_v17 }
 0x88c   : > { %v2444_v19 = vpop.f32.mrf.mxu1 }
 0x88d   : > { %v2018_v20 = vmul.f32 0.70710677, %v2012_v18  ;;  %v2017_v15 = vmul.f32 0.5, %v2012_v18 }
 0x88e   : > { %v2014_v21 = vpop.f32.mrf.mxu1 }
 0x88f   : > { %2598 = verf.f32 %v2018_v20 }
 0x890   : > { %v2445_v22 = vpop.f32.mrf.mxu1 }
 0x89c   : > { %v2599_v23 = vpop.eup %2598 }
 0x89d   : > { %v2020_v24 = vadd.f32 1.0, %v2599_v23 }
 0x89f   : > { %v2021_v25 = vmul.f32 %v2020_v24, %v2017_v15 }
 0x8a1   : > { %v2022_v26 = vpack.c.bf16 %v2021_v25, %v2021_v25 }
 0x8a3   : > { %2455 = vmatmul.mubr.msk.bf16.vlgmr.msra.gmra.mxu0 %vm2062_vm5, %v2022_v26 }
 0x963   : > { %v2100_v28 = vpop.f32.mrf.mxu0 }
 0x964   : > { %v2101_v29 = vadd.f32 %v2290_v27, %v2100_v28 }
 0x965   : > { %v2456_v30 = vpop.f32.mrf.mxu0 }
 0x966   : > { %v2106_v31 = vadd.f32 %v2101_v29, %v1920_v55 }
 0x967   : > { %v2103_v32 = vpop.f32.mrf.mxu0 }
 0x968   : > { %2107 = vst.msk [vmem:[%s631_s3] sm:$0xff] %vm644_vm0, %v2106_v31 }
 0x969   : > { %v2457_v33 = vpop.f32.mrf.mxu0 }
 0x96a   : > { %2717 = shalt.err (!%p2714_p1)
}
 0x96b   : > { %s2718_s20 = scalar_lea.hbm %s3284_s23, 128  ;;  %s2722_s29 = scalar_lea.hbm %s3349_s18, 256 }
 0x96c   : > { %p2719_p2 = scmp.ne.s32.totalorder %s3284_s23, %s2718_s20  ;;  %p2723_p4 = scmp.lt.s32.totalorder %s3284_s23, %s3349_s18 }
 0x96d   : > { %p2724_p10 = scmp.lt.s32.totalorder %s2722_s29, %s2718_s20 }
 0x96e   : > { %p2720_p3 = pnand %p2719_p2, %p3383_p11 }
 0x96f   : > { %p2725_p13 = por %p2724_p10, %p2723_p4 }
 0x970   : > { %p2721_p8 = pneg %p2720_p3 }
 0x972   : > { %p2726_p0 = pnand %p2725_p13, %p2721_p8 }
 0x974   : > { %2729 = shalt.err (!%p2726_p0)
}
 0x975   : > { %2474 = dma.vmem_to_hbm [thread:$0]  (%p3383_p11), %s3286_s21, 128, %s3284_s23, %s2109_s30  }
 0x976 PF: > { %s3384_s25 = sld [smem:[#allocation20_spill]] }
 0x977   : > { %s3385_s22 = sld [smem:[#allocation17_spill]] }
 0x978   : > { %s3386_s27 = sld [smem:[#allocation22_spill]] }
 0x97c   : > { %p2501_p5 = scmp.ge.s32.totalorder %s3384_s25, 2 }
 0x97d   : > { %s2135_s0 = sand.u32 1, %s3385_s22  }
 0x97e   : > { %p3387_p6 = scmp.ne.s32.totalorder %s3386_s27, 0  ;;  %s2136_s1 = scalar_lea.sflag [#allocation6], %s2135_s0 }
 0x980   : > { %p2490_p7 = pnand %p2501_p5, %p3387_p6 }
 0x982   : > { %p2491_p9 = pneg %p2490_p7 }
 0x984   : > { %2767 = dma.done.wait (%p2491_p9), %s2136_s1, 128  }
 0x985   : > { %2769 = vsyncadd (%p2491_p9), %s2136_s1, 4294967168  ;;  %s34_s19 = sadd.s32 1, %s3384_s25   ;;  %s3388_s2 = sld [smem:[#allocation18_spill]] }
 0x986   : > { %p31_p12 = scmp.ge.s32.totalorder %s34_s19, 4   ;;  %s3389_s29 = sld [smem:[#allocation23_spill]] }
 0x987   : > { %s3390_s30 = sld [smem:[#allocation19_spill]]  ;;  %s3392_s27 = smov %s2776_s28 }
 0x988   : > { %s3391_s0 = sld [smem:[#allocation21_spill]]  ;;  %33 = sbr.rel (!%p31_p12) target bundleno = 12 (0xc), region = 150 }
 0x98b   : > { %s3393_s28 = smov %s3388_s2 }
 0x98d   :  { %2141 = vsyncpa [#allocation5], 1 }
 0x98e   :  { %2143 = vsyncpa [#allocation5 + $0x1], 1 }
 0x98f   :  { %2144 = vsyncpa [#allocation8], 1 }
 0x990   :  { %2145 = vsyncpa [#allocation11], 1 }
 0x991   :  { %2146 = vsyncpa [#allocation6], 1 }
 0x992   :  { %2148 = vsyncpa [#allocation6 + $0x1], 1 }

</bundles_post_ra>
